<compile_context>
chip_gen: v7x
topology: tpu7x:2x2x1
jax: 0.10.0
libtpu: 0.0.40
codegen_flags: <defaults>
</compile_context>

<pallas_src>
import math

import jax
import jax.numpy as jnp
from jax.experimental import pallas as pl
from jax.experimental.pallas import tpu as pltpu


def _round_up(x, m):
    return (x + m - 1) // m * m


# ----------------------------------------------------------------------------
# Fused stem kernel (one frame per grid step)
# ----------------------------------------------------------------------------
def _make_stem_kernel(Hq, Wq):
    """Hq = H//4, Wq = W//4 (spatial dims after stride-2 conv + 2x2 pool)."""
    Wp = Wq + 1                  # flattened row pitch (one garbage lane per row)
    L = Hq * Wp                  # flattened spatial length per output phase
    inv_cnt = 1.0 / float(4 * Hq * Wq)

    def kernel(ph_ref, wdw_ref, bdw_ref, wpw_ref, bpw_ref,
               w1_ref, b1_ref, w2_ref, b2_ref, bns_ref, bnb_ref, o_ref):
        # ph_ref : [1, 16, C2, Lpad]  mod-4 phase planes of the zero-padded frame,
        #                             channels on sublanes, flattened spatial on lanes.
        # o_ref  : [1, Cout, L]       pooled stem output (garbage lane at col == Wq).
        col = jax.lax.broadcasted_iota(jnp.int32, (1, L), 1) % Wp
        valid = (col < Wq).astype(jnp.float32)                      # [1, L]

        wdw = wdw_ref[...]                                           # [25, C2, 1]
        bdw = bdw_ref[...]                                           # [C2, 1]
        wpw = wpw_ref[...]                                           # [Cout, C2]
        bpw = bpw_ref[...]                                           # [Cout, 1]

        # ---- depthwise 5x5 / stride-2 conv, decomposed into the 4 output
        #      parity phases (so the trailing 2x2 avg-pool is a phase mean) ----
        acc = []                  # 4 x [C2, L]
        sum_c2 = None             # [C2, 1]: masked spatial sum over all phases
        for qy in range(2):
            for qx in range(2):
                a = None
                for dy in range(5):
                    sy, oy = (2 * qy + dy) % 4, (2 * qy + dy) // 4
                    for dx in range(5):
                        sx, ox = (2 * qx + dx) % 4, (2 * qx + dx) // 4
                        start = oy * Wp + ox
                        win = ph_ref[0, sy * 4 + sx, :, start:start + L]  # [C2, L]
                        term = win * wdw[dy * 5 + dx]                     # [C2,1] bcast
                        a = term if a is None else a + term
                a = a + bdw                                               # [C2, L]
                acc.append(a)
                ps = jnp.sum(a * valid, axis=1, keepdims=True)            # [C2, 1]
                sum_c2 = ps if sum_c2 is None else sum_c2 + ps

        # ---- SE squeeze: global avg-pool of the pointwise-conv output,
        #      obtained from mean(depthwise) via linearity of the 1x1 conv ----
        m = jnp.dot(wpw, sum_c2 * inv_cnt,
                    preferred_element_type=jnp.float32) + bpw             # [Cout, 1]
        h = jnp.dot(w1_ref[...], m,
                    preferred_element_type=jnp.float32) + b1_ref[...]     # [Cr, 1]
        h = jnp.maximum(h, 0.0)
        g = jnp.dot(w2_ref[...], h,
                    preferred_element_type=jnp.float32) + b2_ref[...]     # [Cout, 1]
        e = jnp.exp(-jnp.abs(g))                                          # stable sigmoid
        s = jnp.where(g >= 0, 1.0 / (1.0 + e), e / (1.0 + e))             # [Cout, 1]

        scale = s * bns_ref[...]              # SE scale fused with eval-BN scale
        shift = bnb_ref[...]

        # ---- pointwise 1x1 conv + SE + BN + ReLU per phase;
        #      AvgPool2d(2,2) == mean over the 4 parity phases ----
        out = None
        for p in range(4):
            z = jnp.dot(wpw, acc[p], preferred_element_type=jnp.float32) + bpw  # [Cout, L]
            r = jnp.maximum(z * scale + shift, 0.0)
            out = r if out is None else out + r
        o_ref[0] = 0.25 * out

    return kernel


# ----------------------------------------------------------------------------
# Forward wrapper (glue: diff, padding, phase de-interleave, param reshapes)
# ----------------------------------------------------------------------------
def tsdm_module_forward(x, params):
    """TSDM_Module.forward (mode='WTS', eval mode).

    x: [N, C, D, H, W] with H, W divisible by 4.  Returns [N*D, out_c, H//4, W//4].
    """
    N, C, D, H, W = x.shape
    assert H % 4 == 0 and W % 4 == 0, "H and W must be divisible by 4"
    x = x.astype(jnp.float32)
    C2 = 2 * C

    # WTS temporal shift differences (circular shifts, identical to the torch.cat form)
    x1 = jnp.roll(x, 1, axis=2)
    x3 = jnp.roll(x, -1, axis=2)
    xd = jnp.concatenate([x - x1, x3 - x], axis=1)                 # [N, 2C, D, H, W]
    F_ = N * D
    xf = jnp.transpose(xd, (0, 2, 1, 3, 4)).reshape(F_, C2, H, W)  # frames, NCHW

    Hq, Wq = H // 4, W // 4
    Wp = Wq + 1
    Lq = (Hq + 1) * Wp
    L = Hq * Wp
    Lpad = _round_up(Lq + 1, 128)   # headroom for the worst-case (+1,+1) tap window

    # pad by 2 (conv padding) and de-interleave into 16 mod-4 phase planes, each
    # flattened row-major onto the lane axis (pitch Wq+1), channels on sublanes.
    xp = jnp.pad(xf, ((0, 0), (0, 0), (2, 2), (2, 2)))             # [F, C2, H+4, W+4]
    ph = xp.reshape(F_, C2, Hq + 1, 4, Wp, 4)
    ph = jnp.transpose(ph, (0, 3, 5, 1, 2, 4)).reshape(F_, 16, C2, Lq)
    ph = jnp.pad(ph, ((0, 0), (0, 0), (0, 0), (0, Lpad - Lq)))

    # parameters, pre-shaped channels-on-sublanes for the kernel
    w_dw = jnp.transpose(params["dw_w"].astype(jnp.float32), (1, 2, 0)).reshape(25, C2, 1)
    b_dw = params["dw_b"].reshape(C2, 1).astype(jnp.float32)
    w_pw = params["pw_w"].astype(jnp.float32)                      # [Cout, C2]
    Cout = w_pw.shape[0]
    b_pw = params["pw_b"].reshape(Cout, 1).astype(jnp.float32)
    w_se1 = params["se_w1"].astype(jnp.float32)                    # [Cr, Cout]
    Cr = w_se1.shape[0]
    b_se1 = params["se_b1"].reshape(Cr, 1).astype(jnp.float32)
    w_se2 = params["se_w2"].astype(jnp.float32)                    # [Cout, Cr]
    b_se2 = params["se_b2"].reshape(Cout, 1).astype(jnp.float32)
    eps = 1e-5
    bn_scale = params["bn_gamma"] / jnp.sqrt(params["bn_var"] + eps)
    bn_shift = params["bn_beta"] - params["bn_mean"] * bn_scale
    bn_scale = bn_scale.reshape(Cout, 1).astype(jnp.float32)
    bn_shift = bn_shift.reshape(Cout, 1).astype(jnp.float32)

    def _full(shape):
        return pl.BlockSpec(shape, lambda f: (0,) * len(shape))

    out = pl.pallas_call(
        _make_stem_kernel(Hq, Wq),
        out_shape=jax.ShapeDtypeStruct((F_, Cout, L), jnp.float32),
        grid=(F_,),
        in_specs=[
            pl.BlockSpec((1, 16, C2, Lpad), lambda f: (f, 0, 0, 0)),
            _full((25, C2, 1)), _full((C2, 1)),
            _full((Cout, C2)), _full((Cout, 1)),
            _full((Cr, Cout)), _full((Cr, 1)),
            _full((Cout, Cr)), _full((Cout, 1)),
            _full((Cout, 1)), _full((Cout, 1)),
        ],
        out_specs=pl.BlockSpec((1, Cout, L), lambda f: (f, 0, 0)),
        compiler_params=pltpu.CompilerParams(
            dimension_semantics=("parallel",)),
    )(ph, w_dw, b_dw, w_pw, b_pw, w_se1, b_se1, w_se2, b_se2, bn_scale, bn_shift)

    # drop the per-row garbage lane and restore [F, Cout, H//4, W//4]
    return out.reshape(F_, Cout, Hq, Wp)[:, :, :, :Wq]


# ----------------------------------------------------------------------------
# Pure-JAX (XLA) reference of the same forward, used for an in-script self-check
# ----------------------------------------------------------------------------
def tsdm_module_reference(x, params):
    N, C, D, H, W = x.shape
    x = x.astype(jnp.float32)
    x1 = jnp.roll(x, 1, axis=2)
    x3 = jnp.roll(x, -1, axis=2)
    xd = jnp.concatenate([x - x1, x3 - x], axis=1)
    C2 = 2 * C
    xf = jnp.transpose(xd, (0, 2, 1, 3, 4)).reshape(N * D, C2, H, W)

    hi = jax.lax.Precision.HIGHEST
    y = jax.lax.conv_general_dilated(
        xf, params["dw_w"][:, None, :, :].astype(jnp.float32),
        window_strides=(2, 2), padding=((2, 2), (2, 2)),
        dimension_numbers=("NCHW", "OIHW", "NCHW"),
        feature_group_count=C2, precision=hi)
    y = y + params["dw_b"][None, :, None, None]
    z = jnp.einsum("oc,nchw->nohw", params["pw_w"], y, precision=hi)
    z = z + params["pw_b"][None, :, None, None]
    m = z.mean(axis=(2, 3))
    h = jnp.maximum(jnp.einsum("rc,nc->nr", params["se_w1"], m, precision=hi)
                    + params["se_b1"], 0.0)
    s = jax.nn.sigmoid(jnp.einsum("cr,nr->nc", params["se_w2"], h, precision=hi)
                       + params["se_b2"])
    z = z * s[:, :, None, None]
    eps = 1e-5
    scale = params["bn_gamma"] / jnp.sqrt(params["bn_var"] + eps)
    shift = params["bn_beta"] - params["bn_mean"] * scale
    z = jnp.maximum(z * scale[None, :, None, None] + shift[None, :, None, None], 0.0)
    F_, Co, Ho, Wo = z.shape
    return z.reshape(F_, Co, Ho // 2, 2, Wo // 2, 2).mean(axis=(3, 5))


# ----------------------------------------------------------------------------
# Deterministic parameter init (PyTorch-default BN stats; eval mode)
# ----------------------------------------------------------------------------
def init_params(key, in_c=3, out_c=24, reduction=4):
    c2 = 2 * in_c
    cr = max(out_c // reduction, 1)
    ks = iter(jax.random.split(key, 16))

    def W(shape, fan_in):
        return jax.random.normal(next(ks), shape, jnp.float32) / math.sqrt(fan_in)

    def B(n):
        return 0.01 * jax.random.normal(next(ks), (n,), jnp.float32)

    return {
        "dw_w": W((c2, 5, 5), 25),          # depthwise Conv2d weight [C2,1,5,5] squeezed
        "dw_b": B(c2),
        "pw_w": W((out_c, c2), c2),         # Conv2d(C2, out_c, 1)
        "pw_b": B(out_c),
        "se_w1": W((cr, out_c), out_c),     # Conv2d(out_c, out_c//4, 1)
        "se_b1": B(cr),
        "se_w2": W((out_c, cr), cr),        # Conv2d(out_c//4, out_c, 1)
        "se_b2": B(out_c),
        "bn_gamma": jnp.ones((out_c,), jnp.float32),
        "bn_beta": jnp.zeros((out_c,), jnp.float32),
        "bn_mean": jnp.zeros((out_c,), jnp.float32),
        "bn_var": jnp.ones((out_c,), jnp.float32),
    }


if __name__ == "__main__":
    key = jax.random.PRNGKey(0)
    kx, kp = jax.random.split(key)

    # small shapes: batch=2, 3 channels, 8 frames, 16x16 spatial -> 16 frame grid steps
    N, C, D, H, W = 2, 3, 8, 16, 16
    x = jax.random.normal(kx, (N, C, D, H, W), jnp.float32)
    params = init_params(kp, in_c=C, out_c=24)

    fwd = jax.jit(tsdm_module_forward)
    out = jax.block_until_ready(fwd(x, params))

    assert out.shape == (N * D, 24, H // 4, W // 4), out.shape
    assert bool(jnp.all(jnp.isfinite(out)))

    ref = jax.block_until_ready(jax.jit(tsdm_module_reference)(x, params))
    err = float(jnp.max(jnp.abs(out - ref)))
    assert err < 5e-2, f"max abs err vs reference: {err}"

    print("KERNEL_OK")
</pallas_src>

<mosaic_0001>
module attributes {stable_mosaic.version = 11 : i64} {
  func.func @kernel(%arg0: i32, %arg1: memref<1x16x6x128xf32, #tpu.memory_space<vmem>>, %arg2: memref<25x6x1xf32, #tpu.memory_space<vmem>>, %arg3: memref<6x1xf32, #tpu.memory_space<vmem>>, %arg4: memref<24x6xf32, #tpu.memory_space<vmem>>, %arg5: memref<24x1xf32, #tpu.memory_space<vmem>>, %arg6: memref<6x24xf32, #tpu.memory_space<vmem>>, %arg7: memref<6x1xf32, #tpu.memory_space<vmem>>, %arg8: memref<24x6xf32, #tpu.memory_space<vmem>>, %arg9: memref<24x1xf32, #tpu.memory_space<vmem>>, %arg10: memref<24x1xf32, #tpu.memory_space<vmem>>, %arg11: memref<24x1xf32, #tpu.memory_space<vmem>>, %arg12: memref<1x24x20xf32, #tpu.memory_space<vmem>>) attributes {dimension_semantics = [#tpu.dimension_semantics<parallel>], iteration_bounds = array<i64: 16>, scalar_prefetch = 0 : i64, scratch_operands = 0 : i64, tpu.core_type = #tpu.core_type<tc>, window_params = [{transform_indices = @transform_0, window_bounds = array<i64: 1, 16, 6, 128>}, {pipeline_mode = #tpu.pipeline_mode<synchronous>, transform_indices = @transform_1, window_bounds = array<i64: 25, 6, 1>}, {pipeline_mode = #tpu.pipeline_mode<synchronous>, transform_indices = @transform_2, window_bounds = array<i64: 6, 1>}, {pipeline_mode = #tpu.pipeline_mode<synchronous>, transform_indices = @transform_3, window_bounds = array<i64: 24, 6>}, {pipeline_mode = #tpu.pipeline_mode<synchronous>, transform_indices = @transform_4, window_bounds = array<i64: 24, 1>}, {pipeline_mode = #tpu.pipeline_mode<synchronous>, transform_indices = @transform_5, window_bounds = array<i64: 6, 24>}, {pipeline_mode = #tpu.pipeline_mode<synchronous>, transform_indices = @transform_6, window_bounds = array<i64: 6, 1>}, {pipeline_mode = #tpu.pipeline_mode<synchronous>, transform_indices = @transform_7, window_bounds = array<i64: 24, 6>}, {pipeline_mode = #tpu.pipeline_mode<synchronous>, transform_indices = @transform_8, window_bounds = array<i64: 24, 1>}, {pipeline_mode = #tpu.pipeline_mode<synchronous>, transform_indices = @transform_9, window_bounds = array<i64: 24, 1>}, {pipeline_mode = #tpu.pipeline_mode<synchronous>, transform_indices = @transform_10, window_bounds = array<i64: 24, 1>}, {transform_indices = @transform_11, window_bounds = array<i64: 1, 24, 20>}]} {
    %0 = tpu.iota {dimensions = array<i32: 1>} : vector<1x20xi32>
    %c5_i32 = arith.constant 5 : i32
    %c0_i32 = arith.constant 0 : i32
    %1 = arith.cmpi eq, %c5_i32, %c0_i32 : i32
    %c1_i32 = arith.constant 1 : i32
    %2 = arith.select %1, %c1_i32, %c5_i32 : i32
    %3 = vector.broadcast %2 : i32 to vector<1x20xi32>
    %4 = arith.remsi %0, %3 : vector<1x20xi32>
    %c0_i32_0 = arith.constant 0 : i32
    %5 = vector.broadcast %c0_i32_0 : i32 to vector<1x20xi32>
    %6 = arith.cmpi ne, %4, %5 : vector<1x20xi32>
    %c0_i32_1 = arith.constant 0 : i32
    %7 = vector.broadcast %c0_i32_1 : i32 to vector<1x20xi32>
    %8 = arith.cmpi slt, %4, %7 : vector<1x20xi32>
    %c0_i32_2 = arith.constant 0 : i32
    %9 = arith.cmpi slt, %2, %c0_i32_2 : i32
    %10 = vector.broadcast %9 : i1 to vector<1x20xi1>
    %11 = vector.broadcast %10 : vector<1x20xi1> to vector<1x20xi1>
    %12 = arith.xori %8, %11 : vector<1x20xi1>
    %13 = arith.andi %12, %6 : vector<1x20xi1>
    %14 = vector.broadcast %2 : i32 to vector<1x20xi32>
    %15 = arith.addi %4, %14 : vector<1x20xi32>
    %16 = arith.select %13, %15, %4 : vector<1x20xi1>, vector<1x20xi32>
    %c4_i32 = arith.constant 4 : i32
    %17 = vector.broadcast %c4_i32 : i32 to vector<1x20xi32>
    %18 = arith.cmpi slt, %16, %17 : vector<1x20xi32>
    %19 = arith.extui %18 : vector<1x20xi1> to vector<1x20xi32>
    %20 = arith.sitofp %19 : vector<1x20xi32> to vector<1x20xf32>
    %c0 = arith.constant 0 : index
    %c0_3 = arith.constant 0 : index
    %c0_4 = arith.constant 0 : index
    %21 = vector.load %arg2[%c0, %c0_3, %c0_4] : memref<25x6x1xf32, #tpu.memory_space<vmem>>, vector<25x6x1xf32>
    %c0_5 = arith.constant 0 : index
    %c0_6 = arith.constant 0 : index
    %22 = vector.load %arg3[%c0_5, %c0_6] : memref<6x1xf32, #tpu.memory_space<vmem>>, vector<6x1xf32>
    %c0_7 = arith.constant 0 : index
    %c0_8 = arith.constant 0 : index
    %23 = vector.load %arg4[%c0_7, %c0_8] : memref<24x6xf32, #tpu.memory_space<vmem>>, vector<24x6xf32>
    %c0_9 = arith.constant 0 : index
    %c0_10 = arith.constant 0 : index
    %24 = vector.load %arg5[%c0_9, %c0_10] : memref<24x1xf32, #tpu.memory_space<vmem>>, vector<24x1xf32>
    %c0_11 = arith.constant 0 : index
    %c0_12 = arith.constant 0 : index
    %c0_13 = arith.constant 0 : index
    %c0_14 = arith.constant 0 : index
    %25 = vector.load %arg1[%c0_11, %c0_12, %c0_13, %c0_14] : memref<1x16x6x128xf32, #tpu.memory_space<vmem>>, vector<1x1x6x20xf32>
    %26 = vector.shape_cast %25 : vector<1x1x6x20xf32> to vector<6x20xf32>
    %27 = vector.extract_strided_slice %21 {offsets = [0, 0, 0], sizes = [1, 6, 1], strides = [1, 1, 1]} : vector<25x6x1xf32> to vector<1x6x1xf32>
    %28 = vector.shape_cast %27 : vector<1x6x1xf32> to vector<6x1xf32>
    %29 = vector.broadcast %28 : vector<6x1xf32> to vector<6x20xf32>
    %30 = arith.mulf %26, %29 : vector<6x20xf32>
    %c0_15 = arith.constant 0 : index
    %c1 = arith.constant 1 : index
    %c0_16 = arith.constant 0 : index
    %c0_17 = arith.constant 0 : index
    %31 = vector.load %arg1[%c0_15, %c1, %c0_16, %c0_17] : memref<1x16x6x128xf32, #tpu.memory_space<vmem>>, vector<1x1x6x20xf32>
    %32 = vector.shape_cast %31 : vector<1x1x6x20xf32> to vector<6x20xf32>
    %33 = vector.extract_strided_slice %21 {offsets = [1, 0, 0], sizes = [1, 6, 1], strides = [1, 1, 1]} : vector<25x6x1xf32> to vector<1x6x1xf32>
    %34 = vector.shape_cast %33 : vector<1x6x1xf32> to vector<6x1xf32>
    %35 = vector.broadcast %34 : vector<6x1xf32> to vector<6x20xf32>
    %36 = arith.mulf %32, %35 : vector<6x20xf32>
    %37 = arith.addf %30, %36 : vector<6x20xf32>
    %c0_18 = arith.constant 0 : index
    %c2 = arith.constant 2 : index
    %c0_19 = arith.constant 0 : index
    %c0_20 = arith.constant 0 : index
    %38 = vector.load %arg1[%c0_18, %c2, %c0_19, %c0_20] : memref<1x16x6x128xf32, #tpu.memory_space<vmem>>, vector<1x1x6x20xf32>
    %39 = vector.shape_cast %38 : vector<1x1x6x20xf32> to vector<6x20xf32>
    %40 = vector.extract_strided_slice %21 {offsets = [2, 0, 0], sizes = [1, 6, 1], strides = [1, 1, 1]} : vector<25x6x1xf32> to vector<1x6x1xf32>
    %41 = vector.shape_cast %40 : vector<1x6x1xf32> to vector<6x1xf32>
    %42 = vector.broadcast %41 : vector<6x1xf32> to vector<6x20xf32>
    %43 = arith.mulf %39, %42 : vector<6x20xf32>
    %44 = arith.addf %37, %43 : vector<6x20xf32>
    %c0_21 = arith.constant 0 : index
    %c3 = arith.constant 3 : index
    %c0_22 = arith.constant 0 : index
    %c0_23 = arith.constant 0 : index
    %45 = vector.load %arg1[%c0_21, %c3, %c0_22, %c0_23] : memref<1x16x6x128xf32, #tpu.memory_space<vmem>>, vector<1x1x6x20xf32>
    %46 = vector.shape_cast %45 : vector<1x1x6x20xf32> to vector<6x20xf32>
    %47 = vector.extract_strided_slice %21 {offsets = [3, 0, 0], sizes = [1, 6, 1], strides = [1, 1, 1]} : vector<25x6x1xf32> to vector<1x6x1xf32>
    %48 = vector.shape_cast %47 : vector<1x6x1xf32> to vector<6x1xf32>
    %49 = vector.broadcast %48 : vector<6x1xf32> to vector<6x20xf32>
    %50 = arith.mulf %46, %49 : vector<6x20xf32>
    %51 = arith.addf %44, %50 : vector<6x20xf32>
    %c0_24 = arith.constant 0 : index
    %c0_25 = arith.constant 0 : index
    %c0_26 = arith.constant 0 : index
    %c1_27 = arith.constant 1 : index
    %52 = vector.load %arg1[%c0_24, %c0_25, %c0_26, %c1_27] : memref<1x16x6x128xf32, #tpu.memory_space<vmem>>, vector<1x1x6x20xf32>
    %53 = vector.shape_cast %52 : vector<1x1x6x20xf32> to vector<6x20xf32>
    %54 = vector.extract_strided_slice %21 {offsets = [4, 0, 0], sizes = [1, 6, 1], strides = [1, 1, 1]} : vector<25x6x1xf32> to vector<1x6x1xf32>
    %55 = vector.shape_cast %54 : vector<1x6x1xf32> to vector<6x1xf32>
    %56 = vector.broadcast %55 : vector<6x1xf32> to vector<6x20xf32>
    %57 = arith.mulf %53, %56 : vector<6x20xf32>
    %58 = arith.addf %51, %57 : vector<6x20xf32>
    %c0_28 = arith.constant 0 : index
    %c4 = arith.constant 4 : index
    %c0_29 = arith.constant 0 : index
    %c0_30 = arith.constant 0 : index
    %59 = vector.load %arg1[%c0_28, %c4, %c0_29, %c0_30] : memref<1x16x6x128xf32, #tpu.memory_space<vmem>>, vector<1x1x6x20xf32>
    %60 = vector.shape_cast %59 : vector<1x1x6x20xf32> to vector<6x20xf32>
    %61 = vector.extract_strided_slice %21 {offsets = [5, 0, 0], sizes = [1, 6, 1], strides = [1, 1, 1]} : vector<25x6x1xf32> to vector<1x6x1xf32>
    %62 = vector.shape_cast %61 : vector<1x6x1xf32> to vector<6x1xf32>
    %63 = vector.broadcast %62 : vector<6x1xf32> to vector<6x20xf32>
    %64 = arith.mulf %60, %63 : vector<6x20xf32>
    %65 = arith.addf %58, %64 : vector<6x20xf32>
    %c0_31 = arith.constant 0 : index
    %c5 = arith.constant 5 : index
    %c0_32 = arith.constant 0 : index
    %c0_33 = arith.constant 0 : index
    %66 = vector.load %arg1[%c0_31, %c5, %c0_32, %c0_33] : memref<1x16x6x128xf32, #tpu.memory_space<vmem>>, vector<1x1x6x20xf32>
    %67 = vector.shape_cast %66 : vector<1x1x6x20xf32> to vector<6x20xf32>
    %68 = vector.extract_strided_slice %21 {offsets = [6, 0, 0], sizes = [1, 6, 1], strides = [1, 1, 1]} : vector<25x6x1xf32> to vector<1x6x1xf32>
    %69 = vector.shape_cast %68 : vector<1x6x1xf32> to vector<6x1xf32>
    %70 = vector.broadcast %69 : vector<6x1xf32> to vector<6x20xf32>
    %71 = arith.mulf %67, %70 : vector<6x20xf32>
    %72 = arith.addf %65, %71 : vector<6x20xf32>
    %c0_34 = arith.constant 0 : index
    %c6 = arith.constant 6 : index
    %c0_35 = arith.constant 0 : index
    %c0_36 = arith.constant 0 : index
    %73 = vector.load %arg1[%c0_34, %c6, %c0_35, %c0_36] : memref<1x16x6x128xf32, #tpu.memory_space<vmem>>, vector<1x1x6x20xf32>
    %74 = vector.shape_cast %73 : vector<1x1x6x20xf32> to vector<6x20xf32>
    %75 = vector.extract_strided_slice %21 {offsets = [7, 0, 0], sizes = [1, 6, 1], strides = [1, 1, 1]} : vector<25x6x1xf32> to vector<1x6x1xf32>
    %76 = vector.shape_cast %75 : vector<1x6x1xf32> to vector<6x1xf32>
    %77 = vector.broadcast %76 : vector<6x1xf32> to vector<6x20xf32>
    %78 = arith.mulf %74, %77 : vector<6x20xf32>
    %79 = arith.addf %72, %78 : vector<6x20xf32>
    %c0_37 = arith.constant 0 : index
    %c7 = arith.constant 7 : index
    %c0_38 = arith.constant 0 : index
    %c0_39 = arith.constant 0 : index
    %80 = vector.load %arg1[%c0_37, %c7, %c0_38, %c0_39] : memref<1x16x6x128xf32, #tpu.memory_space<vmem>>, vector<1x1x6x20xf32>
    %81 = vector.shape_cast %80 : vector<1x1x6x20xf32> to vector<6x20xf32>
    %82 = vector.extract_strided_slice %21 {offsets = [8, 0, 0], sizes = [1, 6, 1], strides = [1, 1, 1]} : vector<25x6x1xf32> to vector<1x6x1xf32>
    %83 = vector.shape_cast %82 : vector<1x6x1xf32> to vector<6x1xf32>
    %84 = vector.broadcast %83 : vector<6x1xf32> to vector<6x20xf32>
    %85 = arith.mulf %81, %84 : vector<6x20xf32>
    %86 = arith.addf %79, %85 : vector<6x20xf32>
    %c0_40 = arith.constant 0 : index
    %c4_41 = arith.constant 4 : index
    %c0_42 = arith.constant 0 : index
    %c1_43 = arith.constant 1 : index
    %87 = vector.load %arg1[%c0_40, %c4_41, %c0_42, %c1_43] : memref<1x16x6x128xf32, #tpu.memory_space<vmem>>, vector<1x1x6x20xf32>
    %88 = vector.shape_cast %87 : vector<1x1x6x20xf32> to vector<6x20xf32>
    %89 = vector.extract_strided_slice %21 {offsets = [9, 0, 0], sizes = [1, 6, 1], strides = [1, 1, 1]} : vector<25x6x1xf32> to vector<1x6x1xf32>
    %90 = vector.shape_cast %89 : vector<1x6x1xf32> to vector<6x1xf32>
    %91 = vector.broadcast %90 : vector<6x1xf32> to vector<6x20xf32>
    %92 = arith.mulf %88, %91 : vector<6x20xf32>
    %93 = arith.addf %86, %92 : vector<6x20xf32>
    %c0_44 = arith.constant 0 : index
    %c8 = arith.constant 8 : index
    %c0_45 = arith.constant 0 : index
    %c0_46 = arith.constant 0 : index
    %94 = vector.load %arg1[%c0_44, %c8, %c0_45, %c0_46] : memref<1x16x6x128xf32, #tpu.memory_space<vmem>>, vector<1x1x6x20xf32>
    %95 = vector.shape_cast %94 : vector<1x1x6x20xf32> to vector<6x20xf32>
    %96 = vector.extract_strided_slice %21 {offsets = [10, 0, 0], sizes = [1, 6, 1], strides = [1, 1, 1]} : vector<25x6x1xf32> to vector<1x6x1xf32>
    %97 = vector.shape_cast %96 : vector<1x6x1xf32> to vector<6x1xf32>
    %98 = vector.broadcast %97 : vector<6x1xf32> to vector<6x20xf32>
    %99 = arith.mulf %95, %98 : vector<6x20xf32>
    %100 = arith.addf %93, %99 : vector<6x20xf32>
    %c0_47 = arith.constant 0 : index
    %c9 = arith.constant 9 : index
    %c0_48 = arith.constant 0 : index
    %c0_49 = arith.constant 0 : index
    %101 = vector.load %arg1[%c0_47, %c9, %c0_48, %c0_49] : memref<1x16x6x128xf32, #tpu.memory_space<vmem>>, vector<1x1x6x20xf32>
    %102 = vector.shape_cast %101 : vector<1x1x6x20xf32> to vector<6x20xf32>
    %103 = vector.extract_strided_slice %21 {offsets = [11, 0, 0], sizes = [1, 6, 1], strides = [1, 1, 1]} : vector<25x6x1xf32> to vector<1x6x1xf32>
    %104 = vector.shape_cast %103 : vector<1x6x1xf32> to vector<6x1xf32>
    %105 = vector.broadcast %104 : vector<6x1xf32> to vector<6x20xf32>
    %106 = arith.mulf %102, %105 : vector<6x20xf32>
    %107 = arith.addf %100, %106 : vector<6x20xf32>
    %c0_50 = arith.constant 0 : index
    %c10 = arith.constant 10 : index
    %c0_51 = arith.constant 0 : index
    %c0_52 = arith.constant 0 : index
    %108 = vector.load %arg1[%c0_50, %c10, %c0_51, %c0_52] : memref<1x16x6x128xf32, #tpu.memory_space<vmem>>, vector<1x1x6x20xf32>
    %109 = vector.shape_cast %108 : vector<1x1x6x20xf32> to vector<6x20xf32>
    %110 = vector.extract_strided_slice %21 {offsets = [12, 0, 0], sizes = [1, 6, 1], strides = [1, 1, 1]} : vector<25x6x1xf32> to vector<1x6x1xf32>
    %111 = vector.shape_cast %110 : vector<1x6x1xf32> to vector<6x1xf32>
    %112 = vector.broadcast %111 : vector<6x1xf32> to vector<6x20xf32>
    %113 = arith.mulf %109, %112 : vector<6x20xf32>
    %114 = arith.addf %107, %113 : vector<6x20xf32>
    %c0_53 = arith.constant 0 : index
    %c11 = arith.constant 11 : index
    %c0_54 = arith.constant 0 : index
    %c0_55 = arith.constant 0 : index
    %115 = vector.load %arg1[%c0_53, %c11, %c0_54, %c0_55] : memref<1x16x6x128xf32, #tpu.memory_space<vmem>>, vector<1x1x6x20xf32>
    %116 = vector.shape_cast %115 : vector<1x1x6x20xf32> to vector<6x20xf32>
    %117 = vector.extract_strided_slice %21 {offsets = [13, 0, 0], sizes = [1, 6, 1], strides = [1, 1, 1]} : vector<25x6x1xf32> to vector<1x6x1xf32>
    %118 = vector.shape_cast %117 : vector<1x6x1xf32> to vector<6x1xf32>
    %119 = vector.broadcast %118 : vector<6x1xf32> to vector<6x20xf32>
    %120 = arith.mulf %116, %119 : vector<6x20xf32>
    %121 = arith.addf %114, %120 : vector<6x20xf32>
    %c0_56 = arith.constant 0 : index
    %c8_57 = arith.constant 8 : index
    %c0_58 = arith.constant 0 : index
    %c1_59 = arith.constant 1 : index
    %122 = vector.load %arg1[%c0_56, %c8_57, %c0_58, %c1_59] : memref<1x16x6x128xf32, #tpu.memory_space<vmem>>, vector<1x1x6x20xf32>
    %123 = vector.shape_cast %122 : vector<1x1x6x20xf32> to vector<6x20xf32>
    %124 = vector.extract_strided_slice %21 {offsets = [14, 0, 0], sizes = [1, 6, 1], strides = [1, 1, 1]} : vector<25x6x1xf32> to vector<1x6x1xf32>
    %125 = vector.shape_cast %124 : vector<1x6x1xf32> to vector<6x1xf32>
    %126 = vector.broadcast %125 : vector<6x1xf32> to vector<6x20xf32>
    %127 = arith.mulf %123, %126 : vector<6x20xf32>
    %128 = arith.addf %121, %127 : vector<6x20xf32>
    %c0_60 = arith.constant 0 : index
    %c12 = arith.constant 12 : index
    %c0_61 = arith.constant 0 : index
    %c0_62 = arith.constant 0 : index
    %129 = vector.load %arg1[%c0_60, %c12, %c0_61, %c0_62] : memref<1x16x6x128xf32, #tpu.memory_space<vmem>>, vector<1x1x6x20xf32>
    %130 = vector.shape_cast %129 : vector<1x1x6x20xf32> to vector<6x20xf32>
    %131 = vector.extract_strided_slice %21 {offsets = [15, 0, 0], sizes = [1, 6, 1], strides = [1, 1, 1]} : vector<25x6x1xf32> to vector<1x6x1xf32>
    %132 = vector.shape_cast %131 : vector<1x6x1xf32> to vector<6x1xf32>
    %133 = vector.broadcast %132 : vector<6x1xf32> to vector<6x20xf32>
    %134 = arith.mulf %130, %133 : vector<6x20xf32>
    %135 = arith.addf %128, %134 : vector<6x20xf32>
    %c0_63 = arith.constant 0 : index
    %c13 = arith.constant 13 : index
    %c0_64 = arith.constant 0 : index
    %c0_65 = arith.constant 0 : index
    %136 = vector.load %arg1[%c0_63, %c13, %c0_64, %c0_65] : memref<1x16x6x128xf32, #tpu.memory_space<vmem>>, vector<1x1x6x20xf32>
    %137 = vector.shape_cast %136 : vector<1x1x6x20xf32> to vector<6x20xf32>
    %138 = vector.extract_strided_slice %21 {offsets = [16, 0, 0], sizes = [1, 6, 1], strides = [1, 1, 1]} : vector<25x6x1xf32> to vector<1x6x1xf32>
    %139 = vector.shape_cast %138 : vector<1x6x1xf32> to vector<6x1xf32>
    %140 = vector.broadcast %139 : vector<6x1xf32> to vector<6x20xf32>
    %141 = arith.mulf %137, %140 : vector<6x20xf32>
    %142 = arith.addf %135, %141 : vector<6x20xf32>
    %c0_66 = arith.constant 0 : index
    %c14 = arith.constant 14 : index
    %c0_67 = arith.constant 0 : index
    %c0_68 = arith.constant 0 : index
    %143 = vector.load %arg1[%c0_66, %c14, %c0_67, %c0_68] : memref<1x16x6x128xf32, #tpu.memory_space<vmem>>, vector<1x1x6x20xf32>
    %144 = vector.shape_cast %143 : vector<1x1x6x20xf32> to vector<6x20xf32>
    %145 = vector.extract_strided_slice %21 {offsets = [17, 0, 0], sizes = [1, 6, 1], strides = [1, 1, 1]} : vector<25x6x1xf32> to vector<1x6x1xf32>
    %146 = vector.shape_cast %145 : vector<1x6x1xf32> to vector<6x1xf32>
    %147 = vector.broadcast %146 : vector<6x1xf32> to vector<6x20xf32>
    %148 = arith.mulf %144, %147 : vector<6x20xf32>
    %149 = arith.addf %142, %148 : vector<6x20xf32>
    %c0_69 = arith.constant 0 : index
    %c15 = arith.constant 15 : index
    %c0_70 = arith.constant 0 : index
    %c0_71 = arith.constant 0 : index
    %150 = vector.load %arg1[%c0_69, %c15, %c0_70, %c0_71] : memref<1x16x6x128xf32, #tpu.memory_space<vmem>>, vector<1x1x6x20xf32>
    %151 = vector.shape_cast %150 : vector<1x1x6x20xf32> to vector<6x20xf32>
    %152 = vector.extract_strided_slice %21 {offsets = [18, 0, 0], sizes = [1, 6, 1], strides = [1, 1, 1]} : vector<25x6x1xf32> to vector<1x6x1xf32>
    %153 = vector.shape_cast %152 : vector<1x6x1xf32> to vector<6x1xf32>
    %154 = vector.broadcast %153 : vector<6x1xf32> to vector<6x20xf32>
    %155 = arith.mulf %151, %154 : vector<6x20xf32>
    %156 = arith.addf %149, %155 : vector<6x20xf32>
    %c0_72 = arith.constant 0 : index
    %c12_73 = arith.constant 12 : index
    %c0_74 = arith.constant 0 : index
    %c1_75 = arith.constant 1 : index
    %157 = vector.load %arg1[%c0_72, %c12_73, %c0_74, %c1_75] : memref<1x16x6x128xf32, #tpu.memory_space<vmem>>, vector<1x1x6x20xf32>
    %158 = vector.shape_cast %157 : vector<1x1x6x20xf32> to vector<6x20xf32>
    %159 = vector.extract_strided_slice %21 {offsets = [19, 0, 0], sizes = [1, 6, 1], strides = [1, 1, 1]} : vector<25x6x1xf32> to vector<1x6x1xf32>
    %160 = vector.shape_cast %159 : vector<1x6x1xf32> to vector<6x1xf32>
    %161 = vector.broadcast %160 : vector<6x1xf32> to vector<6x20xf32>
    %162 = arith.mulf %158, %161 : vector<6x20xf32>
    %163 = arith.addf %156, %162 : vector<6x20xf32>
    %c0_76 = arith.constant 0 : index
    %c0_77 = arith.constant 0 : index
    %c0_78 = arith.constant 0 : index
    %c5_79 = arith.constant 5 : index
    %164 = vector.load %arg1[%c0_76, %c0_77, %c0_78, %c5_79] : memref<1x16x6x128xf32, #tpu.memory_space<vmem>>, vector<1x1x6x20xf32>
    %165 = vector.shape_cast %164 : vector<1x1x6x20xf32> to vector<6x20xf32>
    %166 = vector.extract_strided_slice %21 {offsets = [20, 0, 0], sizes = [1, 6, 1], strides = [1, 1, 1]} : vector<25x6x1xf32> to vector<1x6x1xf32>
    %167 = vector.shape_cast %166 : vector<1x6x1xf32> to vector<6x1xf32>
    %168 = vector.broadcast %167 : vector<6x1xf32> to vector<6x20xf32>
    %169 = arith.mulf %165, %168 : vector<6x20xf32>
    %170 = arith.addf %163, %169 : vector<6x20xf32>
    %c0_80 = arith.constant 0 : index
    %c1_81 = arith.constant 1 : index
    %c0_82 = arith.constant 0 : index
    %c5_83 = arith.constant 5 : index
    %171 = vector.load %arg1[%c0_80, %c1_81, %c0_82, %c5_83] : memref<1x16x6x128xf32, #tpu.memory_space<vmem>>, vector<1x1x6x20xf32>
    %172 = vector.shape_cast %171 : vector<1x1x6x20xf32> to vector<6x20xf32>
    %173 = vector.extract_strided_slice %21 {offsets = [21, 0, 0], sizes = [1, 6, 1], strides = [1, 1, 1]} : vector<25x6x1xf32> to vector<1x6x1xf32>
    %174 = vector.shape_cast %173 : vector<1x6x1xf32> to vector<6x1xf32>
    %175 = vector.broadcast %174 : vector<6x1xf32> to vector<6x20xf32>
    %176 = arith.mulf %172, %175 : vector<6x20xf32>
    %177 = arith.addf %170, %176 : vector<6x20xf32>
    %c0_84 = arith.constant 0 : index
    %c2_85 = arith.constant 2 : index
    %c0_86 = arith.constant 0 : index
    %c5_87 = arith.constant 5 : index
    %178 = vector.load %arg1[%c0_84, %c2_85, %c0_86, %c5_87] : memref<1x16x6x128xf32, #tpu.memory_space<vmem>>, vector<1x1x6x20xf32>
    %179 = vector.shape_cast %178 : vector<1x1x6x20xf32> to vector<6x20xf32>
    %180 = vector.extract_strided_slice %21 {offsets = [22, 0, 0], sizes = [1, 6, 1], strides = [1, 1, 1]} : vector<25x6x1xf32> to vector<1x6x1xf32>
    %181 = vector.shape_cast %180 : vector<1x6x1xf32> to vector<6x1xf32>
    %182 = vector.broadcast %181 : vector<6x1xf32> to vector<6x20xf32>
    %183 = arith.mulf %179, %182 : vector<6x20xf32>
    %184 = arith.addf %177, %183 : vector<6x20xf32>
    %c0_88 = arith.constant 0 : index
    %c3_89 = arith.constant 3 : index
    %c0_90 = arith.constant 0 : index
    %c5_91 = arith.constant 5 : index
    %185 = vector.load %arg1[%c0_88, %c3_89, %c0_90, %c5_91] : memref<1x16x6x128xf32, #tpu.memory_space<vmem>>, vector<1x1x6x20xf32>
    %186 = vector.shape_cast %185 : vector<1x1x6x20xf32> to vector<6x20xf32>
    %187 = vector.extract_strided_slice %21 {offsets = [23, 0, 0], sizes = [1, 6, 1], strides = [1, 1, 1]} : vector<25x6x1xf32> to vector<1x6x1xf32>
    %188 = vector.shape_cast %187 : vector<1x6x1xf32> to vector<6x1xf32>
    %189 = vector.broadcast %188 : vector<6x1xf32> to vector<6x20xf32>
    %190 = arith.mulf %186, %189 : vector<6x20xf32>
    %191 = arith.addf %184, %190 : vector<6x20xf32>
    %c0_92 = arith.constant 0 : index
    %c0_93 = arith.constant 0 : index
    %c0_94 = arith.constant 0 : index
    %c6_95 = arith.constant 6 : index
    %192 = vector.load %arg1[%c0_92, %c0_93, %c0_94, %c6_95] : memref<1x16x6x128xf32, #tpu.memory_space<vmem>>, vector<1x1x6x20xf32>
    %193 = vector.shape_cast %192 : vector<1x1x6x20xf32> to vector<6x20xf32>
    %194 = vector.extract_strided_slice %21 {offsets = [24, 0, 0], sizes = [1, 6, 1], strides = [1, 1, 1]} : vector<25x6x1xf32> to vector<1x6x1xf32>
    %195 = vector.shape_cast %194 : vector<1x6x1xf32> to vector<6x1xf32>
    %196 = vector.broadcast %195 : vector<6x1xf32> to vector<6x20xf32>
    %197 = arith.mulf %193, %196 : vector<6x20xf32>
    %198 = arith.addf %191, %197 : vector<6x20xf32>
    %199 = vector.broadcast %22 : vector<6x1xf32> to vector<6x20xf32>
    %200 = arith.addf %198, %199 : vector<6x20xf32>
    %201 = vector.broadcast %20 : vector<1x20xf32> to vector<6x20xf32>
    %202 = arith.mulf %200, %201 : vector<6x20xf32>
    %cst = arith.constant dense<0.000000e+00> : vector<6xf32>
    %203 = vector.multi_reduction <add>, %202, %cst [1] : vector<6x20xf32> to vector<6xf32>
    %204 = vector.shape_cast %203 : vector<6xf32> to vector<6x1xf32>
    %c0_96 = arith.constant 0 : index
    %c2_97 = arith.constant 2 : index
    %c0_98 = arith.constant 0 : index
    %c0_99 = arith.constant 0 : index
    %205 = vector.load %arg1[%c0_96, %c2_97, %c0_98, %c0_99] : memref<1x16x6x128xf32, #tpu.memory_space<vmem>>, vector<1x1x6x20xf32>
    %206 = vector.shape_cast %205 : vector<1x1x6x20xf32> to vector<6x20xf32>
    %207 = vector.extract_strided_slice %21 {offsets = [0, 0, 0], sizes = [1, 6, 1], strides = [1, 1, 1]} : vector<25x6x1xf32> to vector<1x6x1xf32>
    %208 = vector.shape_cast %207 : vector<1x6x1xf32> to vector<6x1xf32>
    %209 = vector.broadcast %208 : vector<6x1xf32> to vector<6x20xf32>
    %210 = arith.mulf %206, %209 : vector<6x20xf32>
    %c0_100 = arith.constant 0 : index
    %c3_101 = arith.constant 3 : index
    %c0_102 = arith.constant 0 : index
    %c0_103 = arith.constant 0 : index
    %211 = vector.load %arg1[%c0_100, %c3_101, %c0_102, %c0_103] : memref<1x16x6x128xf32, #tpu.memory_space<vmem>>, vector<1x1x6x20xf32>
    %212 = vector.shape_cast %211 : vector<1x1x6x20xf32> to vector<6x20xf32>
    %213 = vector.extract_strided_slice %21 {offsets = [1, 0, 0], sizes = [1, 6, 1], strides = [1, 1, 1]} : vector<25x6x1xf32> to vector<1x6x1xf32>
    %214 = vector.shape_cast %213 : vector<1x6x1xf32> to vector<6x1xf32>
    %215 = vector.broadcast %214 : vector<6x1xf32> to vector<6x20xf32>
    %216 = arith.mulf %212, %215 : vector<6x20xf32>
    %217 = arith.addf %210, %216 : vector<6x20xf32>
    %c0_104 = arith.constant 0 : index
    %c0_105 = arith.constant 0 : index
    %c0_106 = arith.constant 0 : index
    %c1_107 = arith.constant 1 : index
    %218 = vector.load %arg1[%c0_104, %c0_105, %c0_106, %c1_107] : memref<1x16x6x128xf32, #tpu.memory_space<vmem>>, vector<1x1x6x20xf32>
    %219 = vector.shape_cast %218 : vector<1x1x6x20xf32> to vector<6x20xf32>
    %220 = vector.extract_strided_slice %21 {offsets = [2, 0, 0], sizes = [1, 6, 1], strides = [1, 1, 1]} : vector<25x6x1xf32> to vector<1x6x1xf32>
    %221 = vector.shape_cast %220 : vector<1x6x1xf32> to vector<6x1xf32>
    %222 = vector.broadcast %221 : vector<6x1xf32> to vector<6x20xf32>
    %223 = arith.mulf %219, %222 : vector<6x20xf32>
    %224 = arith.addf %217, %223 : vector<6x20xf32>
    %c0_108 = arith.constant 0 : index
    %c1_109 = arith.constant 1 : index
    %c0_110 = arith.constant 0 : index
    %c1_111 = arith.constant 1 : index
    %225 = vector.load %arg1[%c0_108, %c1_109, %c0_110, %c1_111] : memref<1x16x6x128xf32, #tpu.memory_space<vmem>>, vector<1x1x6x20xf32>
    %226 = vector.shape_cast %225 : vector<1x1x6x20xf32> to vector<6x20xf32>
    %227 = vector.extract_strided_slice %21 {offsets = [3, 0, 0], sizes = [1, 6, 1], strides = [1, 1, 1]} : vector<25x6x1xf32> to vector<1x6x1xf32>
    %228 = vector.shape_cast %227 : vector<1x6x1xf32> to vector<6x1xf32>
    %229 = vector.broadcast %228 : vector<6x1xf32> to vector<6x20xf32>
    %230 = arith.mulf %226, %229 : vector<6x20xf32>
    %231 = arith.addf %224, %230 : vector<6x20xf32>
    %c0_112 = arith.constant 0 : index
    %c2_113 = arith.constant 2 : index
    %c0_114 = arith.constant 0 : index
    %c1_115 = arith.constant 1 : index
    %232 = vector.load %arg1[%c0_112, %c2_113, %c0_114, %c1_115] : memref<1x16x6x128xf32, #tpu.memory_space<vmem>>, vector<1x1x6x20xf32>
    %233 = vector.shape_cast %232 : vector<1x1x6x20xf32> to vector<6x20xf32>
    %234 = vector.extract_strided_slice %21 {offsets = [4, 0, 0], sizes = [1, 6, 1], strides = [1, 1, 1]} : vector<25x6x1xf32> to vector<1x6x1xf32>
    %235 = vector.shape_cast %234 : vector<1x6x1xf32> to vector<6x1xf32>
    %236 = vector.broadcast %235 : vector<6x1xf32> to vector<6x20xf32>
    %237 = arith.mulf %233, %236 : vector<6x20xf32>
    %238 = arith.addf %231, %237 : vector<6x20xf32>
    %c0_116 = arith.constant 0 : index
    %c6_117 = arith.constant 6 : index
    %c0_118 = arith.constant 0 : index
    %c0_119 = arith.constant 0 : index
    %239 = vector.load %arg1[%c0_116, %c6_117, %c0_118, %c0_119] : memref<1x16x6x128xf32, #tpu.memory_space<vmem>>, vector<1x1x6x20xf32>
    %240 = vector.shape_cast %239 : vector<1x1x6x20xf32> to vector<6x20xf32>
    %241 = vector.extract_strided_slice %21 {offsets = [5, 0, 0], sizes = [1, 6, 1], strides = [1, 1, 1]} : vector<25x6x1xf32> to vector<1x6x1xf32>
    %242 = vector.shape_cast %241 : vector<1x6x1xf32> to vector<6x1xf32>
    %243 = vector.broadcast %242 : vector<6x1xf32> to vector<6x20xf32>
    %244 = arith.mulf %240, %243 : vector<6x20xf32>
    %245 = arith.addf %238, %244 : vector<6x20xf32>
    %c0_120 = arith.constant 0 : index
    %c7_121 = arith.constant 7 : index
    %c0_122 = arith.constant 0 : index
    %c0_123 = arith.constant 0 : index
    %246 = vector.load %arg1[%c0_120, %c7_121, %c0_122, %c0_123] : memref<1x16x6x128xf32, #tpu.memory_space<vmem>>, vector<1x1x6x20xf32>
    %247 = vector.shape_cast %246 : vector<1x1x6x20xf32> to vector<6x20xf32>
    %248 = vector.extract_strided_slice %21 {offsets = [6, 0, 0], sizes = [1, 6, 1], strides = [1, 1, 1]} : vector<25x6x1xf32> to vector<1x6x1xf32>
    %249 = vector.shape_cast %248 : vector<1x6x1xf32> to vector<6x1xf32>
    %250 = vector.broadcast %249 : vector<6x1xf32> to vector<6x20xf32>
    %251 = arith.mulf %247, %250 : vector<6x20xf32>
    %252 = arith.addf %245, %251 : vector<6x20xf32>
    %c0_124 = arith.constant 0 : index
    %c4_125 = arith.constant 4 : index
    %c0_126 = arith.constant 0 : index
    %c1_127 = arith.constant 1 : index
    %253 = vector.load %arg1[%c0_124, %c4_125, %c0_126, %c1_127] : memref<1x16x6x128xf32, #tpu.memory_space<vmem>>, vector<1x1x6x20xf32>
    %254 = vector.shape_cast %253 : vector<1x1x6x20xf32> to vector<6x20xf32>
    %255 = vector.extract_strided_slice %21 {offsets = [7, 0, 0], sizes = [1, 6, 1], strides = [1, 1, 1]} : vector<25x6x1xf32> to vector<1x6x1xf32>
    %256 = vector.shape_cast %255 : vector<1x6x1xf32> to vector<6x1xf32>
    %257 = vector.broadcast %256 : vector<6x1xf32> to vector<6x20xf32>
    %258 = arith.mulf %254, %257 : vector<6x20xf32>
    %259 = arith.addf %252, %258 : vector<6x20xf32>
    %c0_128 = arith.constant 0 : index
    %c5_129 = arith.constant 5 : index
    %c0_130 = arith.constant 0 : index
    %c1_131 = arith.constant 1 : index
    %260 = vector.load %arg1[%c0_128, %c5_129, %c0_130, %c1_131] : memref<1x16x6x128xf32, #tpu.memory_space<vmem>>, vector<1x1x6x20xf32>
    %261 = vector.shape_cast %260 : vector<1x1x6x20xf32> to vector<6x20xf32>
    %262 = vector.extract_strided_slice %21 {offsets = [8, 0, 0], sizes = [1, 6, 1], strides = [1, 1, 1]} : vector<25x6x1xf32> to vector<1x6x1xf32>
    %263 = vector.shape_cast %262 : vector<1x6x1xf32> to vector<6x1xf32>
    %264 = vector.broadcast %263 : vector<6x1xf32> to vector<6x20xf32>
    %265 = arith.mulf %261, %264 : vector<6x20xf32>
    %266 = arith.addf %259, %265 : vector<6x20xf32>
    %c0_132 = arith.constant 0 : index
    %c6_133 = arith.constant 6 : index
    %c0_134 = arith.constant 0 : index
    %c1_135 = arith.constant 1 : index
    %267 = vector.load %arg1[%c0_132, %c6_133, %c0_134, %c1_135] : memref<1x16x6x128xf32, #tpu.memory_space<vmem>>, vector<1x1x6x20xf32>
    %268 = vector.shape_cast %267 : vector<1x1x6x20xf32> to vector<6x20xf32>
    %269 = vector.extract_strided_slice %21 {offsets = [9, 0, 0], sizes = [1, 6, 1], strides = [1, 1, 1]} : vector<25x6x1xf32> to vector<1x6x1xf32>
    %270 = vector.shape_cast %269 : vector<1x6x1xf32> to vector<6x1xf32>
    %271 = vector.broadcast %270 : vector<6x1xf32> to vector<6x20xf32>
    %272 = arith.mulf %268, %271 : vector<6x20xf32>
    %273 = arith.addf %266, %272 : vector<6x20xf32>
    %c0_136 = arith.constant 0 : index
    %c10_137 = arith.constant 10 : index
    %c0_138 = arith.constant 0 : index
    %c0_139 = arith.constant 0 : index
    %274 = vector.load %arg1[%c0_136, %c10_137, %c0_138, %c0_139] : memref<1x16x6x128xf32, #tpu.memory_space<vmem>>, vector<1x1x6x20xf32>
    %275 = vector.shape_cast %274 : vector<1x1x6x20xf32> to vector<6x20xf32>
    %276 = vector.extract_strided_slice %21 {offsets = [10, 0, 0], sizes = [1, 6, 1], strides = [1, 1, 1]} : vector<25x6x1xf32> to vector<1x6x1xf32>
    %277 = vector.shape_cast %276 : vector<1x6x1xf32> to vector<6x1xf32>
    %278 = vector.broadcast %277 : vector<6x1xf32> to vector<6x20xf32>
    %279 = arith.mulf %275, %278 : vector<6x20xf32>
    %280 = arith.addf %273, %279 : vector<6x20xf32>
    %c0_140 = arith.constant 0 : index
    %c11_141 = arith.constant 11 : index
    %c0_142 = arith.constant 0 : index
    %c0_143 = arith.constant 0 : index
    %281 = vector.load %arg1[%c0_140, %c11_141, %c0_142, %c0_143] : memref<1x16x6x128xf32, #tpu.memory_space<vmem>>, vector<1x1x6x20xf32>
    %282 = vector.shape_cast %281 : vector<1x1x6x20xf32> to vector<6x20xf32>
    %283 = vector.extract_strided_slice %21 {offsets = [11, 0, 0], sizes = [1, 6, 1], strides = [1, 1, 1]} : vector<25x6x1xf32> to vector<1x6x1xf32>
    %284 = vector.shape_cast %283 : vector<1x6x1xf32> to vector<6x1xf32>
    %285 = vector.broadcast %284 : vector<6x1xf32> to vector<6x20xf32>
    %286 = arith.mulf %282, %285 : vector<6x20xf32>
    %287 = arith.addf %280, %286 : vector<6x20xf32>
    %c0_144 = arith.constant 0 : index
    %c8_145 = arith.constant 8 : index
    %c0_146 = arith.constant 0 : index
    %c1_147 = arith.constant 1 : index
    %288 = vector.load %arg1[%c0_144, %c8_145, %c0_146, %c1_147] : memref<1x16x6x128xf32, #tpu.memory_space<vmem>>, vector<1x1x6x20xf32>
    %289 = vector.shape_cast %288 : vector<1x1x6x20xf32> to vector<6x20xf32>
    %290 = vector.extract_strided_slice %21 {offsets = [12, 0, 0], sizes = [1, 6, 1], strides = [1, 1, 1]} : vector<25x6x1xf32> to vector<1x6x1xf32>
    %291 = vector.shape_cast %290 : vector<1x6x1xf32> to vector<6x1xf32>
    %292 = vector.broadcast %291 : vector<6x1xf32> to vector<6x20xf32>
    %293 = arith.mulf %289, %292 : vector<6x20xf32>
    %294 = arith.addf %287, %293 : vector<6x20xf32>
    %c0_148 = arith.constant 0 : index
    %c9_149 = arith.constant 9 : index
    %c0_150 = arith.constant 0 : index
    %c1_151 = arith.constant 1 : index
    %295 = vector.load %arg1[%c0_148, %c9_149, %c0_150, %c1_151] : memref<1x16x6x128xf32, #tpu.memory_space<vmem>>, vector<1x1x6x20xf32>
    %296 = vector.shape_cast %295 : vector<1x1x6x20xf32> to vector<6x20xf32>
    %297 = vector.extract_strided_slice %21 {offsets = [13, 0, 0], sizes = [1, 6, 1], strides = [1, 1, 1]} : vector<25x6x1xf32> to vector<1x6x1xf32>
    %298 = vector.shape_cast %297 : vector<1x6x1xf32> to vector<6x1xf32>
    %299 = vector.broadcast %298 : vector<6x1xf32> to vector<6x20xf32>
    %300 = arith.mulf %296, %299 : vector<6x20xf32>
    %301 = arith.addf %294, %300 : vector<6x20xf32>
    %c0_152 = arith.constant 0 : index
    %c10_153 = arith.constant 10 : index
    %c0_154 = arith.constant 0 : index
    %c1_155 = arith.constant 1 : index
    %302 = vector.load %arg1[%c0_152, %c10_153, %c0_154, %c1_155] : memref<1x16x6x128xf32, #tpu.memory_space<vmem>>, vector<1x1x6x20xf32>
    %303 = vector.shape_cast %302 : vector<1x1x6x20xf32> to vector<6x20xf32>
    %304 = vector.extract_strided_slice %21 {offsets = [14, 0, 0], sizes = [1, 6, 1], strides = [1, 1, 1]} : vector<25x6x1xf32> to vector<1x6x1xf32>
    %305 = vector.shape_cast %304 : vector<1x6x1xf32> to vector<6x1xf32>
    %306 = vector.broadcast %305 : vector<6x1xf32> to vector<6x20xf32>
    %307 = arith.mulf %303, %306 : vector<6x20xf32>
    %308 = arith.addf %301, %307 : vector<6x20xf32>
    %c0_156 = arith.constant 0 : index
    %c14_157 = arith.constant 14 : index
    %c0_158 = arith.constant 0 : index
    %c0_159 = arith.constant 0 : index
    %309 = vector.load %arg1[%c0_156, %c14_157, %c0_158, %c0_159] : memref<1x16x6x128xf32, #tpu.memory_space<vmem>>, vector<1x1x6x20xf32>
    %310 = vector.shape_cast %309 : vector<1x1x6x20xf32> to vector<6x20xf32>
    %311 = vector.extract_strided_slice %21 {offsets = [15, 0, 0], sizes = [1, 6, 1], strides = [1, 1, 1]} : vector<25x6x1xf32> to vector<1x6x1xf32>
    %312 = vector.shape_cast %311 : vector<1x6x1xf32> to vector<6x1xf32>
    %313 = vector.broadcast %312 : vector<6x1xf32> to vector<6x20xf32>
    %314 = arith.mulf %310, %313 : vector<6x20xf32>
    %315 = arith.addf %308, %314 : vector<6x20xf32>
    %c0_160 = arith.constant 0 : index
    %c15_161 = arith.constant 15 : index
    %c0_162 = arith.constant 0 : index
    %c0_163 = arith.constant 0 : index
    %316 = vector.load %arg1[%c0_160, %c15_161, %c0_162, %c0_163] : memref<1x16x6x128xf32, #tpu.memory_space<vmem>>, vector<1x1x6x20xf32>
    %317 = vector.shape_cast %316 : vector<1x1x6x20xf32> to vector<6x20xf32>
    %318 = vector.extract_strided_slice %21 {offsets = [16, 0, 0], sizes = [1, 6, 1], strides = [1, 1, 1]} : vector<25x6x1xf32> to vector<1x6x1xf32>
    %319 = vector.shape_cast %318 : vector<1x6x1xf32> to vector<6x1xf32>
    %320 = vector.broadcast %319 : vector<6x1xf32> to vector<6x20xf32>
    %321 = arith.mulf %317, %320 : vector<6x20xf32>
    %322 = arith.addf %315, %321 : vector<6x20xf32>
    %c0_164 = arith.constant 0 : index
    %c12_165 = arith.constant 12 : index
    %c0_166 = arith.constant 0 : index
    %c1_167 = arith.constant 1 : index
    %323 = vector.load %arg1[%c0_164, %c12_165, %c0_166, %c1_167] : memref<1x16x6x128xf32, #tpu.memory_space<vmem>>, vector<1x1x6x20xf32>
    %324 = vector.shape_cast %323 : vector<1x1x6x20xf32> to vector<6x20xf32>
    %325 = vector.extract_strided_slice %21 {offsets = [17, 0, 0], sizes = [1, 6, 1], strides = [1, 1, 1]} : vector<25x6x1xf32> to vector<1x6x1xf32>
    %326 = vector.shape_cast %325 : vector<1x6x1xf32> to vector<6x1xf32>
    %327 = vector.broadcast %326 : vector<6x1xf32> to vector<6x20xf32>
    %328 = arith.mulf %324, %327 : vector<6x20xf32>
    %329 = arith.addf %322, %328 : vector<6x20xf32>
    %c0_168 = arith.constant 0 : index
    %c13_169 = arith.constant 13 : index
    %c0_170 = arith.constant 0 : index
    %c1_171 = arith.constant 1 : index
    %330 = vector.load %arg1[%c0_168, %c13_169, %c0_170, %c1_171] : memref<1x16x6x128xf32, #tpu.memory_space<vmem>>, vector<1x1x6x20xf32>
    %331 = vector.shape_cast %330 : vector<1x1x6x20xf32> to vector<6x20xf32>
    %332 = vector.extract_strided_slice %21 {offsets = [18, 0, 0], sizes = [1, 6, 1], strides = [1, 1, 1]} : vector<25x6x1xf32> to vector<1x6x1xf32>
    %333 = vector.shape_cast %332 : vector<1x6x1xf32> to vector<6x1xf32>
    %334 = vector.broadcast %333 : vector<6x1xf32> to vector<6x20xf32>
    %335 = arith.mulf %331, %334 : vector<6x20xf32>
    %336 = arith.addf %329, %335 : vector<6x20xf32>
    %c0_172 = arith.constant 0 : index
    %c14_173 = arith.constant 14 : index
    %c0_174 = arith.constant 0 : index
    %c1_175 = arith.constant 1 : index
    %337 = vector.load %arg1[%c0_172, %c14_173, %c0_174, %c1_175] : memref<1x16x6x128xf32, #tpu.memory_space<vmem>>, vector<1x1x6x20xf32>
    %338 = vector.shape_cast %337 : vector<1x1x6x20xf32> to vector<6x20xf32>
    %339 = vector.extract_strided_slice %21 {offsets = [19, 0, 0], sizes = [1, 6, 1], strides = [1, 1, 1]} : vector<25x6x1xf32> to vector<1x6x1xf32>
    %340 = vector.shape_cast %339 : vector<1x6x1xf32> to vector<6x1xf32>
    %341 = vector.broadcast %340 : vector<6x1xf32> to vector<6x20xf32>
    %342 = arith.mulf %338, %341 : vector<6x20xf32>
    %343 = arith.addf %336, %342 : vector<6x20xf32>
    %c0_176 = arith.constant 0 : index
    %c2_177 = arith.constant 2 : index
    %c0_178 = arith.constant 0 : index
    %c5_179 = arith.constant 5 : index
    %344 = vector.load %arg1[%c0_176, %c2_177, %c0_178, %c5_179] : memref<1x16x6x128xf32, #tpu.memory_space<vmem>>, vector<1x1x6x20xf32>
    %345 = vector.shape_cast %344 : vector<1x1x6x20xf32> to vector<6x20xf32>
    %346 = vector.extract_strided_slice %21 {offsets = [20, 0, 0], sizes = [1, 6, 1], strides = [1, 1, 1]} : vector<25x6x1xf32> to vector<1x6x1xf32>
    %347 = vector.shape_cast %346 : vector<1x6x1xf32> to vector<6x1xf32>
    %348 = vector.broadcast %347 : vector<6x1xf32> to vector<6x20xf32>
    %349 = arith.mulf %345, %348 : vector<6x20xf32>
    %350 = arith.addf %343, %349 : vector<6x20xf32>
    %c0_180 = arith.constant 0 : index
    %c3_181 = arith.constant 3 : index
    %c0_182 = arith.constant 0 : index
    %c5_183 = arith.constant 5 : index
    %351 = vector.load %arg1[%c0_180, %c3_181, %c0_182, %c5_183] : memref<1x16x6x128xf32, #tpu.memory_space<vmem>>, vector<1x1x6x20xf32>
    %352 = vector.shape_cast %351 : vector<1x1x6x20xf32> to vector<6x20xf32>
    %353 = vector.extract_strided_slice %21 {offsets = [21, 0, 0], sizes = [1, 6, 1], strides = [1, 1, 1]} : vector<25x6x1xf32> to vector<1x6x1xf32>
    %354 = vector.shape_cast %353 : vector<1x6x1xf32> to vector<6x1xf32>
    %355 = vector.broadcast %354 : vector<6x1xf32> to vector<6x20xf32>
    %356 = arith.mulf %352, %355 : vector<6x20xf32>
    %357 = arith.addf %350, %356 : vector<6x20xf32>
    %c0_184 = arith.constant 0 : index
    %c0_185 = arith.constant 0 : index
    %c0_186 = arith.constant 0 : index
    %c6_187 = arith.constant 6 : index
    %358 = vector.load %arg1[%c0_184, %c0_185, %c0_186, %c6_187] : memref<1x16x6x128xf32, #tpu.memory_space<vmem>>, vector<1x1x6x20xf32>
    %359 = vector.shape_cast %358 : vector<1x1x6x20xf32> to vector<6x20xf32>
    %360 = vector.extract_strided_slice %21 {offsets = [22, 0, 0], sizes = [1, 6, 1], strides = [1, 1, 1]} : vector<25x6x1xf32> to vector<1x6x1xf32>
    %361 = vector.shape_cast %360 : vector<1x6x1xf32> to vector<6x1xf32>
    %362 = vector.broadcast %361 : vector<6x1xf32> to vector<6x20xf32>
    %363 = arith.mulf %359, %362 : vector<6x20xf32>
    %364 = arith.addf %357, %363 : vector<6x20xf32>
    %c0_188 = arith.constant 0 : index
    %c1_189 = arith.constant 1 : index
    %c0_190 = arith.constant 0 : index
    %c6_191 = arith.constant 6 : index
    %365 = vector.load %arg1[%c0_188, %c1_189, %c0_190, %c6_191] : memref<1x16x6x128xf32, #tpu.memory_space<vmem>>, vector<1x1x6x20xf32>
    %366 = vector.shape_cast %365 : vector<1x1x6x20xf32> to vector<6x20xf32>
    %367 = vector.extract_strided_slice %21 {offsets = [23, 0, 0], sizes = [1, 6, 1], strides = [1, 1, 1]} : vector<25x6x1xf32> to vector<1x6x1xf32>
    %368 = vector.shape_cast %367 : vector<1x6x1xf32> to vector<6x1xf32>
    %369 = vector.broadcast %368 : vector<6x1xf32> to vector<6x20xf32>
    %370 = arith.mulf %366, %369 : vector<6x20xf32>
    %371 = arith.addf %364, %370 : vector<6x20xf32>
    %c0_192 = arith.constant 0 : index
    %c2_193 = arith.constant 2 : index
    %c0_194 = arith.constant 0 : index
    %c6_195 = arith.constant 6 : index
    %372 = vector.load %arg1[%c0_192, %c2_193, %c0_194, %c6_195] : memref<1x16x6x128xf32, #tpu.memory_space<vmem>>, vector<1x1x6x20xf32>
    %373 = vector.shape_cast %372 : vector<1x1x6x20xf32> to vector<6x20xf32>
    %374 = vector.extract_strided_slice %21 {offsets = [24, 0, 0], sizes = [1, 6, 1], strides = [1, 1, 1]} : vector<25x6x1xf32> to vector<1x6x1xf32>
    %375 = vector.shape_cast %374 : vector<1x6x1xf32> to vector<6x1xf32>
    %376 = vector.broadcast %375 : vector<6x1xf32> to vector<6x20xf32>
    %377 = arith.mulf %373, %376 : vector<6x20xf32>
    %378 = arith.addf %371, %377 : vector<6x20xf32>
    %379 = vector.broadcast %22 : vector<6x1xf32> to vector<6x20xf32>
    %380 = arith.addf %378, %379 : vector<6x20xf32>
    %381 = vector.broadcast %20 : vector<1x20xf32> to vector<6x20xf32>
    %382 = arith.mulf %380, %381 : vector<6x20xf32>
    %cst_196 = arith.constant dense<0.000000e+00> : vector<6xf32>
    %383 = vector.multi_reduction <add>, %382, %cst_196 [1] : vector<6x20xf32> to vector<6xf32>
    %384 = vector.shape_cast %383 : vector<6xf32> to vector<6x1xf32>
    %385 = arith.addf %204, %384 : vector<6x1xf32>
    %c0_197 = arith.constant 0 : index
    %c8_198 = arith.constant 8 : index
    %c0_199 = arith.constant 0 : index
    %c0_200 = arith.constant 0 : index
    %386 = vector.load %arg1[%c0_197, %c8_198, %c0_199, %c0_200] : memref<1x16x6x128xf32, #tpu.memory_space<vmem>>, vector<1x1x6x20xf32>
    %387 = vector.shape_cast %386 : vector<1x1x6x20xf32> to vector<6x20xf32>
    %388 = vector.extract_strided_slice %21 {offsets = [0, 0, 0], sizes = [1, 6, 1], strides = [1, 1, 1]} : vector<25x6x1xf32> to vector<1x6x1xf32>
    %389 = vector.shape_cast %388 : vector<1x6x1xf32> to vector<6x1xf32>
    %390 = vector.broadcast %389 : vector<6x1xf32> to vector<6x20xf32>
    %391 = arith.mulf %387, %390 : vector<6x20xf32>
    %c0_201 = arith.constant 0 : index
    %c9_202 = arith.constant 9 : index
    %c0_203 = arith.constant 0 : index
    %c0_204 = arith.constant 0 : index
    %392 = vector.load %arg1[%c0_201, %c9_202, %c0_203, %c0_204] : memref<1x16x6x128xf32, #tpu.memory_space<vmem>>, vector<1x1x6x20xf32>
    %393 = vector.shape_cast %392 : vector<1x1x6x20xf32> to vector<6x20xf32>
    %394 = vector.extract_strided_slice %21 {offsets = [1, 0, 0], sizes = [1, 6, 1], strides = [1, 1, 1]} : vector<25x6x1xf32> to vector<1x6x1xf32>
    %395 = vector.shape_cast %394 : vector<1x6x1xf32> to vector<6x1xf32>
    %396 = vector.broadcast %395 : vector<6x1xf32> to vector<6x20xf32>
    %397 = arith.mulf %393, %396 : vector<6x20xf32>
    %398 = arith.addf %391, %397 : vector<6x20xf32>
    %c0_205 = arith.constant 0 : index
    %c10_206 = arith.constant 10 : index
    %c0_207 = arith.constant 0 : index
    %c0_208 = arith.constant 0 : index
    %399 = vector.load %arg1[%c0_205, %c10_206, %c0_207, %c0_208] : memref<1x16x6x128xf32, #tpu.memory_space<vmem>>, vector<1x1x6x20xf32>
    %400 = vector.shape_cast %399 : vector<1x1x6x20xf32> to vector<6x20xf32>
    %401 = vector.extract_strided_slice %21 {offsets = [2, 0, 0], sizes = [1, 6, 1], strides = [1, 1, 1]} : vector<25x6x1xf32> to vector<1x6x1xf32>
    %402 = vector.shape_cast %401 : vector<1x6x1xf32> to vector<6x1xf32>
    %403 = vector.broadcast %402 : vector<6x1xf32> to vector<6x20xf32>
    %404 = arith.mulf %400, %403 : vector<6x20xf32>
    %405 = arith.addf %398, %404 : vector<6x20xf32>
    %c0_209 = arith.constant 0 : index
    %c11_210 = arith.constant 11 : index
    %c0_211 = arith.constant 0 : index
    %c0_212 = arith.constant 0 : index
    %406 = vector.load %arg1[%c0_209, %c11_210, %c0_211, %c0_212] : memref<1x16x6x128xf32, #tpu.memory_space<vmem>>, vector<1x1x6x20xf32>
    %407 = vector.shape_cast %406 : vector<1x1x6x20xf32> to vector<6x20xf32>
    %408 = vector.extract_strided_slice %21 {offsets = [3, 0, 0], sizes = [1, 6, 1], strides = [1, 1, 1]} : vector<25x6x1xf32> to vector<1x6x1xf32>
    %409 = vector.shape_cast %408 : vector<1x6x1xf32> to vector<6x1xf32>
    %410 = vector.broadcast %409 : vector<6x1xf32> to vector<6x20xf32>
    %411 = arith.mulf %407, %410 : vector<6x20xf32>
    %412 = arith.addf %405, %411 : vector<6x20xf32>
    %c0_213 = arith.constant 0 : index
    %c8_214 = arith.constant 8 : index
    %c0_215 = arith.constant 0 : index
    %c1_216 = arith.constant 1 : index
    %413 = vector.load %arg1[%c0_213, %c8_214, %c0_215, %c1_216] : memref<1x16x6x128xf32, #tpu.memory_space<vmem>>, vector<1x1x6x20xf32>
    %414 = vector.shape_cast %413 : vector<1x1x6x20xf32> to vector<6x20xf32>
    %415 = vector.extract_strided_slice %21 {offsets = [4, 0, 0], sizes = [1, 6, 1], strides = [1, 1, 1]} : vector<25x6x1xf32> to vector<1x6x1xf32>
    %416 = vector.shape_cast %415 : vector<1x6x1xf32> to vector<6x1xf32>
    %417 = vector.broadcast %416 : vector<6x1xf32> to vector<6x20xf32>
    %418 = arith.mulf %414, %417 : vector<6x20xf32>
    %419 = arith.addf %412, %418 : vector<6x20xf32>
    %c0_217 = arith.constant 0 : index
    %c12_218 = arith.constant 12 : index
    %c0_219 = arith.constant 0 : index
    %c0_220 = arith.constant 0 : index
    %420 = vector.load %arg1[%c0_217, %c12_218, %c0_219, %c0_220] : memref<1x16x6x128xf32, #tpu.memory_space<vmem>>, vector<1x1x6x20xf32>
    %421 = vector.shape_cast %420 : vector<1x1x6x20xf32> to vector<6x20xf32>
    %422 = vector.extract_strided_slice %21 {offsets = [5, 0, 0], sizes = [1, 6, 1], strides = [1, 1, 1]} : vector<25x6x1xf32> to vector<1x6x1xf32>
    %423 = vector.shape_cast %422 : vector<1x6x1xf32> to vector<6x1xf32>
    %424 = vector.broadcast %423 : vector<6x1xf32> to vector<6x20xf32>
    %425 = arith.mulf %421, %424 : vector<6x20xf32>
    %426 = arith.addf %419, %425 : vector<6x20xf32>
    %c0_221 = arith.constant 0 : index
    %c13_222 = arith.constant 13 : index
    %c0_223 = arith.constant 0 : index
    %c0_224 = arith.constant 0 : index
    %427 = vector.load %arg1[%c0_221, %c13_222, %c0_223, %c0_224] : memref<1x16x6x128xf32, #tpu.memory_space<vmem>>, vector<1x1x6x20xf32>
    %428 = vector.shape_cast %427 : vector<1x1x6x20xf32> to vector<6x20xf32>
    %429 = vector.extract_strided_slice %21 {offsets = [6, 0, 0], sizes = [1, 6, 1], strides = [1, 1, 1]} : vector<25x6x1xf32> to vector<1x6x1xf32>
    %430 = vector.shape_cast %429 : vector<1x6x1xf32> to vector<6x1xf32>
    %431 = vector.broadcast %430 : vector<6x1xf32> to vector<6x20xf32>
    %432 = arith.mulf %428, %431 : vector<6x20xf32>
    %433 = arith.addf %426, %432 : vector<6x20xf32>
    %c0_225 = arith.constant 0 : index
    %c14_226 = arith.constant 14 : index
    %c0_227 = arith.constant 0 : index
    %c0_228 = arith.constant 0 : index
    %434 = vector.load %arg1[%c0_225, %c14_226, %c0_227, %c0_228] : memref<1x16x6x128xf32, #tpu.memory_space<vmem>>, vector<1x1x6x20xf32>
    %435 = vector.shape_cast %434 : vector<1x1x6x20xf32> to vector<6x20xf32>
    %436 = vector.extract_strided_slice %21 {offsets = [7, 0, 0], sizes = [1, 6, 1], strides = [1, 1, 1]} : vector<25x6x1xf32> to vector<1x6x1xf32>
    %437 = vector.shape_cast %436 : vector<1x6x1xf32> to vector<6x1xf32>
    %438 = vector.broadcast %437 : vector<6x1xf32> to vector<6x20xf32>
    %439 = arith.mulf %435, %438 : vector<6x20xf32>
    %440 = arith.addf %433, %439 : vector<6x20xf32>
    %c0_229 = arith.constant 0 : index
    %c15_230 = arith.constant 15 : index
    %c0_231 = arith.constant 0 : index
    %c0_232 = arith.constant 0 : index
    %441 = vector.load %arg1[%c0_229, %c15_230, %c0_231, %c0_232] : memref<1x16x6x128xf32, #tpu.memory_space<vmem>>, vector<1x1x6x20xf32>
    %442 = vector.shape_cast %441 : vector<1x1x6x20xf32> to vector<6x20xf32>
    %443 = vector.extract_strided_slice %21 {offsets = [8, 0, 0], sizes = [1, 6, 1], strides = [1, 1, 1]} : vector<25x6x1xf32> to vector<1x6x1xf32>
    %444 = vector.shape_cast %443 : vector<1x6x1xf32> to vector<6x1xf32>
    %445 = vector.broadcast %444 : vector<6x1xf32> to vector<6x20xf32>
    %446 = arith.mulf %442, %445 : vector<6x20xf32>
    %447 = arith.addf %440, %446 : vector<6x20xf32>
    %c0_233 = arith.constant 0 : index
    %c12_234 = arith.constant 12 : index
    %c0_235 = arith.constant 0 : index
    %c1_236 = arith.constant 1 : index
    %448 = vector.load %arg1[%c0_233, %c12_234, %c0_235, %c1_236] : memref<1x16x6x128xf32, #tpu.memory_space<vmem>>, vector<1x1x6x20xf32>
    %449 = vector.shape_cast %448 : vector<1x1x6x20xf32> to vector<6x20xf32>
    %450 = vector.extract_strided_slice %21 {offsets = [9, 0, 0], sizes = [1, 6, 1], strides = [1, 1, 1]} : vector<25x6x1xf32> to vector<1x6x1xf32>
    %451 = vector.shape_cast %450 : vector<1x6x1xf32> to vector<6x1xf32>
    %452 = vector.broadcast %451 : vector<6x1xf32> to vector<6x20xf32>
    %453 = arith.mulf %449, %452 : vector<6x20xf32>
    %454 = arith.addf %447, %453 : vector<6x20xf32>
    %c0_237 = arith.constant 0 : index
    %c0_238 = arith.constant 0 : index
    %c0_239 = arith.constant 0 : index
    %c5_240 = arith.constant 5 : index
    %455 = vector.load %arg1[%c0_237, %c0_238, %c0_239, %c5_240] : memref<1x16x6x128xf32, #tpu.memory_space<vmem>>, vector<1x1x6x20xf32>
    %456 = vector.shape_cast %455 : vector<1x1x6x20xf32> to vector<6x20xf32>
    %457 = vector.extract_strided_slice %21 {offsets = [10, 0, 0], sizes = [1, 6, 1], strides = [1, 1, 1]} : vector<25x6x1xf32> to vector<1x6x1xf32>
    %458 = vector.shape_cast %457 : vector<1x6x1xf32> to vector<6x1xf32>
    %459 = vector.broadcast %458 : vector<6x1xf32> to vector<6x20xf32>
    %460 = arith.mulf %456, %459 : vector<6x20xf32>
    %461 = arith.addf %454, %460 : vector<6x20xf32>
    %c0_241 = arith.constant 0 : index
    %c1_242 = arith.constant 1 : index
    %c0_243 = arith.constant 0 : index
    %c5_244 = arith.constant 5 : index
    %462 = vector.load %arg1[%c0_241, %c1_242, %c0_243, %c5_244] : memref<1x16x6x128xf32, #tpu.memory_space<vmem>>, vector<1x1x6x20xf32>
    %463 = vector.shape_cast %462 : vector<1x1x6x20xf32> to vector<6x20xf32>
    %464 = vector.extract_strided_slice %21 {offsets = [11, 0, 0], sizes = [1, 6, 1], strides = [1, 1, 1]} : vector<25x6x1xf32> to vector<1x6x1xf32>
    %465 = vector.shape_cast %464 : vector<1x6x1xf32> to vector<6x1xf32>
    %466 = vector.broadcast %465 : vector<6x1xf32> to vector<6x20xf32>
    %467 = arith.mulf %463, %466 : vector<6x20xf32>
    %468 = arith.addf %461, %467 : vector<6x20xf32>
    %c0_245 = arith.constant 0 : index
    %c2_246 = arith.constant 2 : index
    %c0_247 = arith.constant 0 : index
    %c5_248 = arith.constant 5 : index
    %469 = vector.load %arg1[%c0_245, %c2_246, %c0_247, %c5_248] : memref<1x16x6x128xf32, #tpu.memory_space<vmem>>, vector<1x1x6x20xf32>
    %470 = vector.shape_cast %469 : vector<1x1x6x20xf32> to vector<6x20xf32>
    %471 = vector.extract_strided_slice %21 {offsets = [12, 0, 0], sizes = [1, 6, 1], strides = [1, 1, 1]} : vector<25x6x1xf32> to vector<1x6x1xf32>
    %472 = vector.shape_cast %471 : vector<1x6x1xf32> to vector<6x1xf32>
    %473 = vector.broadcast %472 : vector<6x1xf32> to vector<6x20xf32>
    %474 = arith.mulf %470, %473 : vector<6x20xf32>
    %475 = arith.addf %468, %474 : vector<6x20xf32>
    %c0_249 = arith.constant 0 : index
    %c3_250 = arith.constant 3 : index
    %c0_251 = arith.constant 0 : index
    %c5_252 = arith.constant 5 : index
    %476 = vector.load %arg1[%c0_249, %c3_250, %c0_251, %c5_252] : memref<1x16x6x128xf32, #tpu.memory_space<vmem>>, vector<1x1x6x20xf32>
    %477 = vector.shape_cast %476 : vector<1x1x6x20xf32> to vector<6x20xf32>
    %478 = vector.extract_strided_slice %21 {offsets = [13, 0, 0], sizes = [1, 6, 1], strides = [1, 1, 1]} : vector<25x6x1xf32> to vector<1x6x1xf32>
    %479 = vector.shape_cast %478 : vector<1x6x1xf32> to vector<6x1xf32>
    %480 = vector.broadcast %479 : vector<6x1xf32> to vector<6x20xf32>
    %481 = arith.mulf %477, %480 : vector<6x20xf32>
    %482 = arith.addf %475, %481 : vector<6x20xf32>
    %c0_253 = arith.constant 0 : index
    %c0_254 = arith.constant 0 : index
    %c0_255 = arith.constant 0 : index
    %c6_256 = arith.constant 6 : index
    %483 = vector.load %arg1[%c0_253, %c0_254, %c0_255, %c6_256] : memref<1x16x6x128xf32, #tpu.memory_space<vmem>>, vector<1x1x6x20xf32>
    %484 = vector.shape_cast %483 : vector<1x1x6x20xf32> to vector<6x20xf32>
    %485 = vector.extract_strided_slice %21 {offsets = [14, 0, 0], sizes = [1, 6, 1], strides = [1, 1, 1]} : vector<25x6x1xf32> to vector<1x6x1xf32>
    %486 = vector.shape_cast %485 : vector<1x6x1xf32> to vector<6x1xf32>
    %487 = vector.broadcast %486 : vector<6x1xf32> to vector<6x20xf32>
    %488 = arith.mulf %484, %487 : vector<6x20xf32>
    %489 = arith.addf %482, %488 : vector<6x20xf32>
    %c0_257 = arith.constant 0 : index
    %c4_258 = arith.constant 4 : index
    %c0_259 = arith.constant 0 : index
    %c5_260 = arith.constant 5 : index
    %490 = vector.load %arg1[%c0_257, %c4_258, %c0_259, %c5_260] : memref<1x16x6x128xf32, #tpu.memory_space<vmem>>, vector<1x1x6x20xf32>
    %491 = vector.shape_cast %490 : vector<1x1x6x20xf32> to vector<6x20xf32>
    %492 = vector.extract_strided_slice %21 {offsets = [15, 0, 0], sizes = [1, 6, 1], strides = [1, 1, 1]} : vector<25x6x1xf32> to vector<1x6x1xf32>
    %493 = vector.shape_cast %492 : vector<1x6x1xf32> to vector<6x1xf32>
    %494 = vector.broadcast %493 : vector<6x1xf32> to vector<6x20xf32>
    %495 = arith.mulf %491, %494 : vector<6x20xf32>
    %496 = arith.addf %489, %495 : vector<6x20xf32>
    %c0_261 = arith.constant 0 : index
    %c5_262 = arith.constant 5 : index
    %c0_263 = arith.constant 0 : index
    %c5_264 = arith.constant 5 : index
    %497 = vector.load %arg1[%c0_261, %c5_262, %c0_263, %c5_264] : memref<1x16x6x128xf32, #tpu.memory_space<vmem>>, vector<1x1x6x20xf32>
    %498 = vector.shape_cast %497 : vector<1x1x6x20xf32> to vector<6x20xf32>
    %499 = vector.extract_strided_slice %21 {offsets = [16, 0, 0], sizes = [1, 6, 1], strides = [1, 1, 1]} : vector<25x6x1xf32> to vector<1x6x1xf32>
    %500 = vector.shape_cast %499 : vector<1x6x1xf32> to vector<6x1xf32>
    %501 = vector.broadcast %500 : vector<6x1xf32> to vector<6x20xf32>
    %502 = arith.mulf %498, %501 : vector<6x20xf32>
    %503 = arith.addf %496, %502 : vector<6x20xf32>
    %c0_265 = arith.constant 0 : index
    %c6_266 = arith.constant 6 : index
    %c0_267 = arith.constant 0 : index
    %c5_268 = arith.constant 5 : index
    %504 = vector.load %arg1[%c0_265, %c6_266, %c0_267, %c5_268] : memref<1x16x6x128xf32, #tpu.memory_space<vmem>>, vector<1x1x6x20xf32>
    %505 = vector.shape_cast %504 : vector<1x1x6x20xf32> to vector<6x20xf32>
    %506 = vector.extract_strided_slice %21 {offsets = [17, 0, 0], sizes = [1, 6, 1], strides = [1, 1, 1]} : vector<25x6x1xf32> to vector<1x6x1xf32>
    %507 = vector.shape_cast %506 : vector<1x6x1xf32> to vector<6x1xf32>
    %508 = vector.broadcast %507 : vector<6x1xf32> to vector<6x20xf32>
    %509 = arith.mulf %505, %508 : vector<6x20xf32>
    %510 = arith.addf %503, %509 : vector<6x20xf32>
    %c0_269 = arith.constant 0 : index
    %c7_270 = arith.constant 7 : index
    %c0_271 = arith.constant 0 : index
    %c5_272 = arith.constant 5 : index
    %511 = vector.load %arg1[%c0_269, %c7_270, %c0_271, %c5_272] : memref<1x16x6x128xf32, #tpu.memory_space<vmem>>, vector<1x1x6x20xf32>
    %512 = vector.shape_cast %511 : vector<1x1x6x20xf32> to vector<6x20xf32>
    %513 = vector.extract_strided_slice %21 {offsets = [18, 0, 0], sizes = [1, 6, 1], strides = [1, 1, 1]} : vector<25x6x1xf32> to vector<1x6x1xf32>
    %514 = vector.shape_cast %513 : vector<1x6x1xf32> to vector<6x1xf32>
    %515 = vector.broadcast %514 : vector<6x1xf32> to vector<6x20xf32>
    %516 = arith.mulf %512, %515 : vector<6x20xf32>
    %517 = arith.addf %510, %516 : vector<6x20xf32>
    %c0_273 = arith.constant 0 : index
    %c4_274 = arith.constant 4 : index
    %c0_275 = arith.constant 0 : index
    %c6_276 = arith.constant 6 : index
    %518 = vector.load %arg1[%c0_273, %c4_274, %c0_275, %c6_276] : memref<1x16x6x128xf32, #tpu.memory_space<vmem>>, vector<1x1x6x20xf32>
    %519 = vector.shape_cast %518 : vector<1x1x6x20xf32> to vector<6x20xf32>
    %520 = vector.extract_strided_slice %21 {offsets = [19, 0, 0], sizes = [1, 6, 1], strides = [1, 1, 1]} : vector<25x6x1xf32> to vector<1x6x1xf32>
    %521 = vector.shape_cast %520 : vector<1x6x1xf32> to vector<6x1xf32>
    %522 = vector.broadcast %521 : vector<6x1xf32> to vector<6x20xf32>
    %523 = arith.mulf %519, %522 : vector<6x20xf32>
    %524 = arith.addf %517, %523 : vector<6x20xf32>
    %c0_277 = arith.constant 0 : index
    %c8_278 = arith.constant 8 : index
    %c0_279 = arith.constant 0 : index
    %c5_280 = arith.constant 5 : index
    %525 = vector.load %arg1[%c0_277, %c8_278, %c0_279, %c5_280] : memref<1x16x6x128xf32, #tpu.memory_space<vmem>>, vector<1x1x6x20xf32>
    %526 = vector.shape_cast %525 : vector<1x1x6x20xf32> to vector<6x20xf32>
    %527 = vector.extract_strided_slice %21 {offsets = [20, 0, 0], sizes = [1, 6, 1], strides = [1, 1, 1]} : vector<25x6x1xf32> to vector<1x6x1xf32>
    %528 = vector.shape_cast %527 : vector<1x6x1xf32> to vector<6x1xf32>
    %529 = vector.broadcast %528 : vector<6x1xf32> to vector<6x20xf32>
    %530 = arith.mulf %526, %529 : vector<6x20xf32>
    %531 = arith.addf %524, %530 : vector<6x20xf32>
    %c0_281 = arith.constant 0 : index
    %c9_282 = arith.constant 9 : index
    %c0_283 = arith.constant 0 : index
    %c5_284 = arith.constant 5 : index
    %532 = vector.load %arg1[%c0_281, %c9_282, %c0_283, %c5_284] : memref<1x16x6x128xf32, #tpu.memory_space<vmem>>, vector<1x1x6x20xf32>
    %533 = vector.shape_cast %532 : vector<1x1x6x20xf32> to vector<6x20xf32>
    %534 = vector.extract_strided_slice %21 {offsets = [21, 0, 0], sizes = [1, 6, 1], strides = [1, 1, 1]} : vector<25x6x1xf32> to vector<1x6x1xf32>
    %535 = vector.shape_cast %534 : vector<1x6x1xf32> to vector<6x1xf32>
    %536 = vector.broadcast %535 : vector<6x1xf32> to vector<6x20xf32>
    %537 = arith.mulf %533, %536 : vector<6x20xf32>
    %538 = arith.addf %531, %537 : vector<6x20xf32>
    %c0_285 = arith.constant 0 : index
    %c10_286 = arith.constant 10 : index
    %c0_287 = arith.constant 0 : index
    %c5_288 = arith.constant 5 : index
    %539 = vector.load %arg1[%c0_285, %c10_286, %c0_287, %c5_288] : memref<1x16x6x128xf32, #tpu.memory_space<vmem>>, vector<1x1x6x20xf32>
    %540 = vector.shape_cast %539 : vector<1x1x6x20xf32> to vector<6x20xf32>
    %541 = vector.extract_strided_slice %21 {offsets = [22, 0, 0], sizes = [1, 6, 1], strides = [1, 1, 1]} : vector<25x6x1xf32> to vector<1x6x1xf32>
    %542 = vector.shape_cast %541 : vector<1x6x1xf32> to vector<6x1xf32>
    %543 = vector.broadcast %542 : vector<6x1xf32> to vector<6x20xf32>
    %544 = arith.mulf %540, %543 : vector<6x20xf32>
    %545 = arith.addf %538, %544 : vector<6x20xf32>
    %c0_289 = arith.constant 0 : index
    %c11_290 = arith.constant 11 : index
    %c0_291 = arith.constant 0 : index
    %c5_292 = arith.constant 5 : index
    %546 = vector.load %arg1[%c0_289, %c11_290, %c0_291, %c5_292] : memref<1x16x6x128xf32, #tpu.memory_space<vmem>>, vector<1x1x6x20xf32>
    %547 = vector.shape_cast %546 : vector<1x1x6x20xf32> to vector<6x20xf32>
    %548 = vector.extract_strided_slice %21 {offsets = [23, 0, 0], sizes = [1, 6, 1], strides = [1, 1, 1]} : vector<25x6x1xf32> to vector<1x6x1xf32>
    %549 = vector.shape_cast %548 : vector<1x6x1xf32> to vector<6x1xf32>
    %550 = vector.broadcast %549 : vector<6x1xf32> to vector<6x20xf32>
    %551 = arith.mulf %547, %550 : vector<6x20xf32>
    %552 = arith.addf %545, %551 : vector<6x20xf32>
    %c0_293 = arith.constant 0 : index
    %c8_294 = arith.constant 8 : index
    %c0_295 = arith.constant 0 : index
    %c6_296 = arith.constant 6 : index
    %553 = vector.load %arg1[%c0_293, %c8_294, %c0_295, %c6_296] : memref<1x16x6x128xf32, #tpu.memory_space<vmem>>, vector<1x1x6x20xf32>
    %554 = vector.shape_cast %553 : vector<1x1x6x20xf32> to vector<6x20xf32>
    %555 = vector.extract_strided_slice %21 {offsets = [24, 0, 0], sizes = [1, 6, 1], strides = [1, 1, 1]} : vector<25x6x1xf32> to vector<1x6x1xf32>
    %556 = vector.shape_cast %555 : vector<1x6x1xf32> to vector<6x1xf32>
    %557 = vector.broadcast %556 : vector<6x1xf32> to vector<6x20xf32>
    %558 = arith.mulf %554, %557 : vector<6x20xf32>
    %559 = arith.addf %552, %558 : vector<6x20xf32>
    %560 = vector.broadcast %22 : vector<6x1xf32> to vector<6x20xf32>
    %561 = arith.addf %559, %560 : vector<6x20xf32>
    %562 = vector.broadcast %20 : vector<1x20xf32> to vector<6x20xf32>
    %563 = arith.mulf %561, %562 : vector<6x20xf32>
    %cst_297 = arith.constant dense<0.000000e+00> : vector<6xf32>
    %564 = vector.multi_reduction <add>, %563, %cst_297 [1] : vector<6x20xf32> to vector<6xf32>
    %565 = vector.shape_cast %564 : vector<6xf32> to vector<6x1xf32>
    %566 = arith.addf %385, %565 : vector<6x1xf32>
    %c0_298 = arith.constant 0 : index
    %c10_299 = arith.constant 10 : index
    %c0_300 = arith.constant 0 : index
    %c0_301 = arith.constant 0 : index
    %567 = vector.load %arg1[%c0_298, %c10_299, %c0_300, %c0_301] : memref<1x16x6x128xf32, #tpu.memory_space<vmem>>, vector<1x1x6x20xf32>
    %568 = vector.shape_cast %567 : vector<1x1x6x20xf32> to vector<6x20xf32>
    %569 = vector.extract_strided_slice %21 {offsets = [0, 0, 0], sizes = [1, 6, 1], strides = [1, 1, 1]} : vector<25x6x1xf32> to vector<1x6x1xf32>
    %570 = vector.shape_cast %569 : vector<1x6x1xf32> to vector<6x1xf32>
    %571 = vector.broadcast %570 : vector<6x1xf32> to vector<6x20xf32>
    %572 = arith.mulf %568, %571 : vector<6x20xf32>
    %c0_302 = arith.constant 0 : index
    %c11_303 = arith.constant 11 : index
    %c0_304 = arith.constant 0 : index
    %c0_305 = arith.constant 0 : index
    %573 = vector.load %arg1[%c0_302, %c11_303, %c0_304, %c0_305] : memref<1x16x6x128xf32, #tpu.memory_space<vmem>>, vector<1x1x6x20xf32>
    %574 = vector.shape_cast %573 : vector<1x1x6x20xf32> to vector<6x20xf32>
    %575 = vector.extract_strided_slice %21 {offsets = [1, 0, 0], sizes = [1, 6, 1], strides = [1, 1, 1]} : vector<25x6x1xf32> to vector<1x6x1xf32>
    %576 = vector.shape_cast %575 : vector<1x6x1xf32> to vector<6x1xf32>
    %577 = vector.broadcast %576 : vector<6x1xf32> to vector<6x20xf32>
    %578 = arith.mulf %574, %577 : vector<6x20xf32>
    %579 = arith.addf %572, %578 : vector<6x20xf32>
    %c0_306 = arith.constant 0 : index
    %c8_307 = arith.constant 8 : index
    %c0_308 = arith.constant 0 : index
    %c1_309 = arith.constant 1 : index
    %580 = vector.load %arg1[%c0_306, %c8_307, %c0_308, %c1_309] : memref<1x16x6x128xf32, #tpu.memory_space<vmem>>, vector<1x1x6x20xf32>
    %581 = vector.shape_cast %580 : vector<1x1x6x20xf32> to vector<6x20xf32>
    %582 = vector.extract_strided_slice %21 {offsets = [2, 0, 0], sizes = [1, 6, 1], strides = [1, 1, 1]} : vector<25x6x1xf32> to vector<1x6x1xf32>
    %583 = vector.shape_cast %582 : vector<1x6x1xf32> to vector<6x1xf32>
    %584 = vector.broadcast %583 : vector<6x1xf32> to vector<6x20xf32>
    %585 = arith.mulf %581, %584 : vector<6x20xf32>
    %586 = arith.addf %579, %585 : vector<6x20xf32>
    %c0_310 = arith.constant 0 : index
    %c9_311 = arith.constant 9 : index
    %c0_312 = arith.constant 0 : index
    %c1_313 = arith.constant 1 : index
    %587 = vector.load %arg1[%c0_310, %c9_311, %c0_312, %c1_313] : memref<1x16x6x128xf32, #tpu.memory_space<vmem>>, vector<1x1x6x20xf32>
    %588 = vector.shape_cast %587 : vector<1x1x6x20xf32> to vector<6x20xf32>
    %589 = vector.extract_strided_slice %21 {offsets = [3, 0, 0], sizes = [1, 6, 1], strides = [1, 1, 1]} : vector<25x6x1xf32> to vector<1x6x1xf32>
    %590 = vector.shape_cast %589 : vector<1x6x1xf32> to vector<6x1xf32>
    %591 = vector.broadcast %590 : vector<6x1xf32> to vector<6x20xf32>
    %592 = arith.mulf %588, %591 : vector<6x20xf32>
    %593 = arith.addf %586, %592 : vector<6x20xf32>
    %c0_314 = arith.constant 0 : index
    %c10_315 = arith.constant 10 : index
    %c0_316 = arith.constant 0 : index
    %c1_317 = arith.constant 1 : index
    %594 = vector.load %arg1[%c0_314, %c10_315, %c0_316, %c1_317] : memref<1x16x6x128xf32, #tpu.memory_space<vmem>>, vector<1x1x6x20xf32>
    %595 = vector.shape_cast %594 : vector<1x1x6x20xf32> to vector<6x20xf32>
    %596 = vector.extract_strided_slice %21 {offsets = [4, 0, 0], sizes = [1, 6, 1], strides = [1, 1, 1]} : vector<25x6x1xf32> to vector<1x6x1xf32>
    %597 = vector.shape_cast %596 : vector<1x6x1xf32> to vector<6x1xf32>
    %598 = vector.broadcast %597 : vector<6x1xf32> to vector<6x20xf32>
    %599 = arith.mulf %595, %598 : vector<6x20xf32>
    %600 = arith.addf %593, %599 : vector<6x20xf32>
    %c0_318 = arith.constant 0 : index
    %c14_319 = arith.constant 14 : index
    %c0_320 = arith.constant 0 : index
    %c0_321 = arith.constant 0 : index
    %601 = vector.load %arg1[%c0_318, %c14_319, %c0_320, %c0_321] : memref<1x16x6x128xf32, #tpu.memory_space<vmem>>, vector<1x1x6x20xf32>
    %602 = vector.shape_cast %601 : vector<1x1x6x20xf32> to vector<6x20xf32>
    %603 = vector.extract_strided_slice %21 {offsets = [5, 0, 0], sizes = [1, 6, 1], strides = [1, 1, 1]} : vector<25x6x1xf32> to vector<1x6x1xf32>
    %604 = vector.shape_cast %603 : vector<1x6x1xf32> to vector<6x1xf32>
    %605 = vector.broadcast %604 : vector<6x1xf32> to vector<6x20xf32>
    %606 = arith.mulf %602, %605 : vector<6x20xf32>
    %607 = arith.addf %600, %606 : vector<6x20xf32>
    %c0_322 = arith.constant 0 : index
    %c15_323 = arith.constant 15 : index
    %c0_324 = arith.constant 0 : index
    %c0_325 = arith.constant 0 : index
    %608 = vector.load %arg1[%c0_322, %c15_323, %c0_324, %c0_325] : memref<1x16x6x128xf32, #tpu.memory_space<vmem>>, vector<1x1x6x20xf32>
    %609 = vector.shape_cast %608 : vector<1x1x6x20xf32> to vector<6x20xf32>
    %610 = vector.extract_strided_slice %21 {offsets = [6, 0, 0], sizes = [1, 6, 1], strides = [1, 1, 1]} : vector<25x6x1xf32> to vector<1x6x1xf32>
    %611 = vector.shape_cast %610 : vector<1x6x1xf32> to vector<6x1xf32>
    %612 = vector.broadcast %611 : vector<6x1xf32> to vector<6x20xf32>
    %613 = arith.mulf %609, %612 : vector<6x20xf32>
    %614 = arith.addf %607, %613 : vector<6x20xf32>
    %c0_326 = arith.constant 0 : index
    %c12_327 = arith.constant 12 : index
    %c0_328 = arith.constant 0 : index
    %c1_329 = arith.constant 1 : index
    %615 = vector.load %arg1[%c0_326, %c12_327, %c0_328, %c1_329] : memref<1x16x6x128xf32, #tpu.memory_space<vmem>>, vector<1x1x6x20xf32>
    %616 = vector.shape_cast %615 : vector<1x1x6x20xf32> to vector<6x20xf32>
    %617 = vector.extract_strided_slice %21 {offsets = [7, 0, 0], sizes = [1, 6, 1], strides = [1, 1, 1]} : vector<25x6x1xf32> to vector<1x6x1xf32>
    %618 = vector.shape_cast %617 : vector<1x6x1xf32> to vector<6x1xf32>
    %619 = vector.broadcast %618 : vector<6x1xf32> to vector<6x20xf32>
    %620 = arith.mulf %616, %619 : vector<6x20xf32>
    %621 = arith.addf %614, %620 : vector<6x20xf32>
    %c0_330 = arith.constant 0 : index
    %c13_331 = arith.constant 13 : index
    %c0_332 = arith.constant 0 : index
    %c1_333 = arith.constant 1 : index
    %622 = vector.load %arg1[%c0_330, %c13_331, %c0_332, %c1_333] : memref<1x16x6x128xf32, #tpu.memory_space<vmem>>, vector<1x1x6x20xf32>
    %623 = vector.shape_cast %622 : vector<1x1x6x20xf32> to vector<6x20xf32>
    %624 = vector.extract_strided_slice %21 {offsets = [8, 0, 0], sizes = [1, 6, 1], strides = [1, 1, 1]} : vector<25x6x1xf32> to vector<1x6x1xf32>
    %625 = vector.shape_cast %624 : vector<1x6x1xf32> to vector<6x1xf32>
    %626 = vector.broadcast %625 : vector<6x1xf32> to vector<6x20xf32>
    %627 = arith.mulf %623, %626 : vector<6x20xf32>
    %628 = arith.addf %621, %627 : vector<6x20xf32>
    %c0_334 = arith.constant 0 : index
    %c14_335 = arith.constant 14 : index
    %c0_336 = arith.constant 0 : index
    %c1_337 = arith.constant 1 : index
    %629 = vector.load %arg1[%c0_334, %c14_335, %c0_336, %c1_337] : memref<1x16x6x128xf32, #tpu.memory_space<vmem>>, vector<1x1x6x20xf32>
    %630 = vector.shape_cast %629 : vector<1x1x6x20xf32> to vector<6x20xf32>
    %631 = vector.extract_strided_slice %21 {offsets = [9, 0, 0], sizes = [1, 6, 1], strides = [1, 1, 1]} : vector<25x6x1xf32> to vector<1x6x1xf32>
    %632 = vector.shape_cast %631 : vector<1x6x1xf32> to vector<6x1xf32>
    %633 = vector.broadcast %632 : vector<6x1xf32> to vector<6x20xf32>
    %634 = arith.mulf %630, %633 : vector<6x20xf32>
    %635 = arith.addf %628, %634 : vector<6x20xf32>
    %c0_338 = arith.constant 0 : index
    %c2_339 = arith.constant 2 : index
    %c0_340 = arith.constant 0 : index
    %c5_341 = arith.constant 5 : index
    %636 = vector.load %arg1[%c0_338, %c2_339, %c0_340, %c5_341] : memref<1x16x6x128xf32, #tpu.memory_space<vmem>>, vector<1x1x6x20xf32>
    %637 = vector.shape_cast %636 : vector<1x1x6x20xf32> to vector<6x20xf32>
    %638 = vector.extract_strided_slice %21 {offsets = [10, 0, 0], sizes = [1, 6, 1], strides = [1, 1, 1]} : vector<25x6x1xf32> to vector<1x6x1xf32>
    %639 = vector.shape_cast %638 : vector<1x6x1xf32> to vector<6x1xf32>
    %640 = vector.broadcast %639 : vector<6x1xf32> to vector<6x20xf32>
    %641 = arith.mulf %637, %640 : vector<6x20xf32>
    %642 = arith.addf %635, %641 : vector<6x20xf32>
    %c0_342 = arith.constant 0 : index
    %c3_343 = arith.constant 3 : index
    %c0_344 = arith.constant 0 : index
    %c5_345 = arith.constant 5 : index
    %643 = vector.load %arg1[%c0_342, %c3_343, %c0_344, %c5_345] : memref<1x16x6x128xf32, #tpu.memory_space<vmem>>, vector<1x1x6x20xf32>
    %644 = vector.shape_cast %643 : vector<1x1x6x20xf32> to vector<6x20xf32>
    %645 = vector.extract_strided_slice %21 {offsets = [11, 0, 0], sizes = [1, 6, 1], strides = [1, 1, 1]} : vector<25x6x1xf32> to vector<1x6x1xf32>
    %646 = vector.shape_cast %645 : vector<1x6x1xf32> to vector<6x1xf32>
    %647 = vector.broadcast %646 : vector<6x1xf32> to vector<6x20xf32>
    %648 = arith.mulf %644, %647 : vector<6x20xf32>
    %649 = arith.addf %642, %648 : vector<6x20xf32>
    %c0_346 = arith.constant 0 : index
    %c0_347 = arith.constant 0 : index
    %c0_348 = arith.constant 0 : index
    %c6_349 = arith.constant 6 : index
    %650 = vector.load %arg1[%c0_346, %c0_347, %c0_348, %c6_349] : memref<1x16x6x128xf32, #tpu.memory_space<vmem>>, vector<1x1x6x20xf32>
    %651 = vector.shape_cast %650 : vector<1x1x6x20xf32> to vector<6x20xf32>
    %652 = vector.extract_strided_slice %21 {offsets = [12, 0, 0], sizes = [1, 6, 1], strides = [1, 1, 1]} : vector<25x6x1xf32> to vector<1x6x1xf32>
    %653 = vector.shape_cast %652 : vector<1x6x1xf32> to vector<6x1xf32>
    %654 = vector.broadcast %653 : vector<6x1xf32> to vector<6x20xf32>
    %655 = arith.mulf %651, %654 : vector<6x20xf32>
    %656 = arith.addf %649, %655 : vector<6x20xf32>
    %c0_350 = arith.constant 0 : index
    %c1_351 = arith.constant 1 : index
    %c0_352 = arith.constant 0 : index
    %c6_353 = arith.constant 6 : index
    %657 = vector.load %arg1[%c0_350, %c1_351, %c0_352, %c6_353] : memref<1x16x6x128xf32, #tpu.memory_space<vmem>>, vector<1x1x6x20xf32>
    %658 = vector.shape_cast %657 : vector<1x1x6x20xf32> to vector<6x20xf32>
    %659 = vector.extract_strided_slice %21 {offsets = [13, 0, 0], sizes = [1, 6, 1], strides = [1, 1, 1]} : vector<25x6x1xf32> to vector<1x6x1xf32>
    %660 = vector.shape_cast %659 : vector<1x6x1xf32> to vector<6x1xf32>
    %661 = vector.broadcast %660 : vector<6x1xf32> to vector<6x20xf32>
    %662 = arith.mulf %658, %661 : vector<6x20xf32>
    %663 = arith.addf %656, %662 : vector<6x20xf32>
    %c0_354 = arith.constant 0 : index
    %c2_355 = arith.constant 2 : index
    %c0_356 = arith.constant 0 : index
    %c6_357 = arith.constant 6 : index
    %664 = vector.load %arg1[%c0_354, %c2_355, %c0_356, %c6_357] : memref<1x16x6x128xf32, #tpu.memory_space<vmem>>, vector<1x1x6x20xf32>
    %665 = vector.shape_cast %664 : vector<1x1x6x20xf32> to vector<6x20xf32>
    %666 = vector.extract_strided_slice %21 {offsets = [14, 0, 0], sizes = [1, 6, 1], strides = [1, 1, 1]} : vector<25x6x1xf32> to vector<1x6x1xf32>
    %667 = vector.shape_cast %666 : vector<1x6x1xf32> to vector<6x1xf32>
    %668 = vector.broadcast %667 : vector<6x1xf32> to vector<6x20xf32>
    %669 = arith.mulf %665, %668 : vector<6x20xf32>
    %670 = arith.addf %663, %669 : vector<6x20xf32>
    %c0_358 = arith.constant 0 : index
    %c6_359 = arith.constant 6 : index
    %c0_360 = arith.constant 0 : index
    %c5_361 = arith.constant 5 : index
    %671 = vector.load %arg1[%c0_358, %c6_359, %c0_360, %c5_361] : memref<1x16x6x128xf32, #tpu.memory_space<vmem>>, vector<1x1x6x20xf32>
    %672 = vector.shape_cast %671 : vector<1x1x6x20xf32> to vector<6x20xf32>
    %673 = vector.extract_strided_slice %21 {offsets = [15, 0, 0], sizes = [1, 6, 1], strides = [1, 1, 1]} : vector<25x6x1xf32> to vector<1x6x1xf32>
    %674 = vector.shape_cast %673 : vector<1x6x1xf32> to vector<6x1xf32>
    %675 = vector.broadcast %674 : vector<6x1xf32> to vector<6x20xf32>
    %676 = arith.mulf %672, %675 : vector<6x20xf32>
    %677 = arith.addf %670, %676 : vector<6x20xf32>
    %c0_362 = arith.constant 0 : index
    %c7_363 = arith.constant 7 : index
    %c0_364 = arith.constant 0 : index
    %c5_365 = arith.constant 5 : index
    %678 = vector.load %arg1[%c0_362, %c7_363, %c0_364, %c5_365] : memref<1x16x6x128xf32, #tpu.memory_space<vmem>>, vector<1x1x6x20xf32>
    %679 = vector.shape_cast %678 : vector<1x1x6x20xf32> to vector<6x20xf32>
    %680 = vector.extract_strided_slice %21 {offsets = [16, 0, 0], sizes = [1, 6, 1], strides = [1, 1, 1]} : vector<25x6x1xf32> to vector<1x6x1xf32>
    %681 = vector.shape_cast %680 : vector<1x6x1xf32> to vector<6x1xf32>
    %682 = vector.broadcast %681 : vector<6x1xf32> to vector<6x20xf32>
    %683 = arith.mulf %679, %682 : vector<6x20xf32>
    %684 = arith.addf %677, %683 : vector<6x20xf32>
    %c0_366 = arith.constant 0 : index
    %c4_367 = arith.constant 4 : index
    %c0_368 = arith.constant 0 : index
    %c6_369 = arith.constant 6 : index
    %685 = vector.load %arg1[%c0_366, %c4_367, %c0_368, %c6_369] : memref<1x16x6x128xf32, #tpu.memory_space<vmem>>, vector<1x1x6x20xf32>
    %686 = vector.shape_cast %685 : vector<1x1x6x20xf32> to vector<6x20xf32>
    %687 = vector.extract_strided_slice %21 {offsets = [17, 0, 0], sizes = [1, 6, 1], strides = [1, 1, 1]} : vector<25x6x1xf32> to vector<1x6x1xf32>
    %688 = vector.shape_cast %687 : vector<1x6x1xf32> to vector<6x1xf32>
    %689 = vector.broadcast %688 : vector<6x1xf32> to vector<6x20xf32>
    %690 = arith.mulf %686, %689 : vector<6x20xf32>
    %691 = arith.addf %684, %690 : vector<6x20xf32>
    %c0_370 = arith.constant 0 : index
    %c5_371 = arith.constant 5 : index
    %c0_372 = arith.constant 0 : index
    %c6_373 = arith.constant 6 : index
    %692 = vector.load %arg1[%c0_370, %c5_371, %c0_372, %c6_373] : memref<1x16x6x128xf32, #tpu.memory_space<vmem>>, vector<1x1x6x20xf32>
    %693 = vector.shape_cast %692 : vector<1x1x6x20xf32> to vector<6x20xf32>
    %694 = vector.extract_strided_slice %21 {offsets = [18, 0, 0], sizes = [1, 6, 1], strides = [1, 1, 1]} : vector<25x6x1xf32> to vector<1x6x1xf32>
    %695 = vector.shape_cast %694 : vector<1x6x1xf32> to vector<6x1xf32>
    %696 = vector.broadcast %695 : vector<6x1xf32> to vector<6x20xf32>
    %697 = arith.mulf %693, %696 : vector<6x20xf32>
    %698 = arith.addf %691, %697 : vector<6x20xf32>
    %c0_374 = arith.constant 0 : index
    %c6_375 = arith.constant 6 : index
    %c0_376 = arith.constant 0 : index
    %c6_377 = arith.constant 6 : index
    %699 = vector.load %arg1[%c0_374, %c6_375, %c0_376, %c6_377] : memref<1x16x6x128xf32, #tpu.memory_space<vmem>>, vector<1x1x6x20xf32>
    %700 = vector.shape_cast %699 : vector<1x1x6x20xf32> to vector<6x20xf32>
    %701 = vector.extract_strided_slice %21 {offsets = [19, 0, 0], sizes = [1, 6, 1], strides = [1, 1, 1]} : vector<25x6x1xf32> to vector<1x6x1xf32>
    %702 = vector.shape_cast %701 : vector<1x6x1xf32> to vector<6x1xf32>
    %703 = vector.broadcast %702 : vector<6x1xf32> to vector<6x20xf32>
    %704 = arith.mulf %700, %703 : vector<6x20xf32>
    %705 = arith.addf %698, %704 : vector<6x20xf32>
    %c0_378 = arith.constant 0 : index
    %c10_379 = arith.constant 10 : index
    %c0_380 = arith.constant 0 : index
    %c5_381 = arith.constant 5 : index
    %706 = vector.load %arg1[%c0_378, %c10_379, %c0_380, %c5_381] : memref<1x16x6x128xf32, #tpu.memory_space<vmem>>, vector<1x1x6x20xf32>
    %707 = vector.shape_cast %706 : vector<1x1x6x20xf32> to vector<6x20xf32>
    %708 = vector.extract_strided_slice %21 {offsets = [20, 0, 0], sizes = [1, 6, 1], strides = [1, 1, 1]} : vector<25x6x1xf32> to vector<1x6x1xf32>
    %709 = vector.shape_cast %708 : vector<1x6x1xf32> to vector<6x1xf32>
    %710 = vector.broadcast %709 : vector<6x1xf32> to vector<6x20xf32>
    %711 = arith.mulf %707, %710 : vector<6x20xf32>
    %712 = arith.addf %705, %711 : vector<6x20xf32>
    %c0_382 = arith.constant 0 : index
    %c11_383 = arith.constant 11 : index
    %c0_384 = arith.constant 0 : index
    %c5_385 = arith.constant 5 : index
    %713 = vector.load %arg1[%c0_382, %c11_383, %c0_384, %c5_385] : memref<1x16x6x128xf32, #tpu.memory_space<vmem>>, vector<1x1x6x20xf32>
    %714 = vector.shape_cast %713 : vector<1x1x6x20xf32> to vector<6x20xf32>
    %715 = vector.extract_strided_slice %21 {offsets = [21, 0, 0], sizes = [1, 6, 1], strides = [1, 1, 1]} : vector<25x6x1xf32> to vector<1x6x1xf32>
    %716 = vector.shape_cast %715 : vector<1x6x1xf32> to vector<6x1xf32>
    %717 = vector.broadcast %716 : vector<6x1xf32> to vector<6x20xf32>
    %718 = arith.mulf %714, %717 : vector<6x20xf32>
    %719 = arith.addf %712, %718 : vector<6x20xf32>
    %c0_386 = arith.constant 0 : index
    %c8_387 = arith.constant 8 : index
    %c0_388 = arith.constant 0 : index
    %c6_389 = arith.constant 6 : index
    %720 = vector.load %arg1[%c0_386, %c8_387, %c0_388, %c6_389] : memref<1x16x6x128xf32, #tpu.memory_space<vmem>>, vector<1x1x6x20xf32>
    %721 = vector.shape_cast %720 : vector<1x1x6x20xf32> to vector<6x20xf32>
    %722 = vector.extract_strided_slice %21 {offsets = [22, 0, 0], sizes = [1, 6, 1], strides = [1, 1, 1]} : vector<25x6x1xf32> to vector<1x6x1xf32>
    %723 = vector.shape_cast %722 : vector<1x6x1xf32> to vector<6x1xf32>
    %724 = vector.broadcast %723 : vector<6x1xf32> to vector<6x20xf32>
    %725 = arith.mulf %721, %724 : vector<6x20xf32>
    %726 = arith.addf %719, %725 : vector<6x20xf32>
    %c0_390 = arith.constant 0 : index
    %c9_391 = arith.constant 9 : index
    %c0_392 = arith.constant 0 : index
    %c6_393 = arith.constant 6 : index
    %727 = vector.load %arg1[%c0_390, %c9_391, %c0_392, %c6_393] : memref<1x16x6x128xf32, #tpu.memory_space<vmem>>, vector<1x1x6x20xf32>
    %728 = vector.shape_cast %727 : vector<1x1x6x20xf32> to vector<6x20xf32>
    %729 = vector.extract_strided_slice %21 {offsets = [23, 0, 0], sizes = [1, 6, 1], strides = [1, 1, 1]} : vector<25x6x1xf32> to vector<1x6x1xf32>
    %730 = vector.shape_cast %729 : vector<1x6x1xf32> to vector<6x1xf32>
    %731 = vector.broadcast %730 : vector<6x1xf32> to vector<6x20xf32>
    %732 = arith.mulf %728, %731 : vector<6x20xf32>
    %733 = arith.addf %726, %732 : vector<6x20xf32>
    %c0_394 = arith.constant 0 : index
    %c10_395 = arith.constant 10 : index
    %c0_396 = arith.constant 0 : index
    %c6_397 = arith.constant 6 : index
    %734 = vector.load %arg1[%c0_394, %c10_395, %c0_396, %c6_397] : memref<1x16x6x128xf32, #tpu.memory_space<vmem>>, vector<1x1x6x20xf32>
    %735 = vector.shape_cast %734 : vector<1x1x6x20xf32> to vector<6x20xf32>
    %736 = vector.extract_strided_slice %21 {offsets = [24, 0, 0], sizes = [1, 6, 1], strides = [1, 1, 1]} : vector<25x6x1xf32> to vector<1x6x1xf32>
    %737 = vector.shape_cast %736 : vector<1x6x1xf32> to vector<6x1xf32>
    %738 = vector.broadcast %737 : vector<6x1xf32> to vector<6x20xf32>
    %739 = arith.mulf %735, %738 : vector<6x20xf32>
    %740 = arith.addf %733, %739 : vector<6x20xf32>
    %741 = vector.broadcast %22 : vector<6x1xf32> to vector<6x20xf32>
    %742 = arith.addf %740, %741 : vector<6x20xf32>
    %743 = vector.broadcast %20 : vector<1x20xf32> to vector<6x20xf32>
    %744 = arith.mulf %742, %743 : vector<6x20xf32>
    %cst_398 = arith.constant dense<0.000000e+00> : vector<6xf32>
    %745 = vector.multi_reduction <add>, %744, %cst_398 [1] : vector<6x20xf32> to vector<6xf32>
    %746 = vector.shape_cast %745 : vector<6xf32> to vector<6x1xf32>
    %747 = arith.addf %566, %746 : vector<6x1xf32>
    %cst_399 = arith.constant 1.562500e-02 : f32
    %748 = vector.broadcast %cst_399 : f32 to vector<6x1xf32>
    %749 = arith.mulf %747, %748 : vector<6x1xf32>
    %cst_400 = arith.constant dense<0.000000e+00> : vector<24x1xf32>
    %750 = tpu.matmul %23, %749, %cst_400 {dimension_numbers = #tpu.dot_dimension_numbers<[1], [0], [0], [1], [0, 0, 1, 1], [], []>} : vector<24x6xf32>, vector<6x1xf32>, vector<24x1xf32> -> vector<24x1xf32>
    %751 = arith.addf %750, %24 : vector<24x1xf32>
    %c0_401 = arith.constant 0 : index
    %c0_402 = arith.constant 0 : index
    %752 = vector.load %arg6[%c0_401, %c0_402] : memref<6x24xf32, #tpu.memory_space<vmem>>, vector<6x24xf32>
    %cst_403 = arith.constant dense<0.000000e+00> : vector<6x1xf32>
    %753 = tpu.matmul %752, %751, %cst_403 {dimension_numbers = #tpu.dot_dimension_numbers<[1], [0], [0], [1], [0, 0, 1, 1], [], []>} : vector<6x24xf32>, vector<24x1xf32>, vector<6x1xf32> -> vector<6x1xf32>
    %c0_404 = arith.constant 0 : index
    %c0_405 = arith.constant 0 : index
    %754 = vector.load %arg7[%c0_404, %c0_405] : memref<6x1xf32, #tpu.memory_space<vmem>>, vector<6x1xf32>
    %755 = arith.addf %753, %754 : vector<6x1xf32>
    %cst_406 = arith.constant 0.000000e+00 : f32
    %756 = vector.broadcast %cst_406 : f32 to vector<6x1xf32>
    %757 = arith.maximumf %755, %756 : vector<6x1xf32>
    %c0_407 = arith.constant 0 : index
    %c0_408 = arith.constant 0 : index
    %758 = vector.load %arg8[%c0_407, %c0_408] : memref<24x6xf32, #tpu.memory_space<vmem>>, vector<24x6xf32>
    %cst_409 = arith.constant dense<0.000000e+00> : vector<24x1xf32>
    %759 = tpu.matmul %758, %757, %cst_409 {dimension_numbers = #tpu.dot_dimension_numbers<[1], [0], [0], [1], [0, 0, 1, 1], [], []>} : vector<24x6xf32>, vector<6x1xf32>, vector<24x1xf32> -> vector<24x1xf32>
    %c0_410 = arith.constant 0 : index
    %c0_411 = arith.constant 0 : index
    %760 = vector.load %arg9[%c0_410, %c0_411] : memref<24x1xf32, #tpu.memory_space<vmem>>, vector<24x1xf32>
    %761 = arith.addf %759, %760 : vector<24x1xf32>
    %762 = math.absf %761 : vector<24x1xf32>
    %cst_412 = arith.constant 0.000000e+00 : f32
    %763 = vector.broadcast %cst_412 : f32 to vector<24x1xf32>
    %764 = arith.subf %763, %762 : vector<24x1xf32>
    %765 = math.exp %764 : vector<24x1xf32>
    %cst_413 = arith.constant 0.000000e+00 : f32
    %766 = vector.broadcast %cst_413 : f32 to vector<24x1xf32>
    %767 = arith.cmpf oge, %761, %766 : vector<24x1xf32>
    %cst_414 = arith.constant 1.000000e+00 : f32
    %768 = vector.broadcast %cst_414 : f32 to vector<24x1xf32>
    %769 = arith.addf %768, %765 : vector<24x1xf32>
    %cst_415 = arith.constant 1.000000e+00 : f32
    %770 = vector.broadcast %cst_415 : f32 to vector<24x1xf32>
    %771 = arith.divf %770, %769 : vector<24x1xf32>
    %cst_416 = arith.constant 1.000000e+00 : f32
    %772 = vector.broadcast %cst_416 : f32 to vector<24x1xf32>
    %773 = arith.addf %772, %765 : vector<24x1xf32>
    %774 = arith.divf %765, %773 : vector<24x1xf32>
    %775 = arith.select %767, %771, %774 : vector<24x1xi1>, vector<24x1xf32>
    %c0_417 = arith.constant 0 : index
    %c0_418 = arith.constant 0 : index
    %776 = vector.load %arg10[%c0_417, %c0_418] : memref<24x1xf32, #tpu.memory_space<vmem>>, vector<24x1xf32>
    %777 = arith.mulf %775, %776 : vector<24x1xf32>
    %c0_419 = arith.constant 0 : index
    %c0_420 = arith.constant 0 : index
    %778 = vector.load %arg11[%c0_419, %c0_420] : memref<24x1xf32, #tpu.memory_space<vmem>>, vector<24x1xf32>
    %cst_421 = arith.constant dense<0.000000e+00> : vector<24x20xf32>
    %779 = tpu.matmul %23, %200, %cst_421 {dimension_numbers = #tpu.dot_dimension_numbers<[1], [0], [0], [1], [0, 0, 1, 1], [], []>} : vector<24x6xf32>, vector<6x20xf32>, vector<24x20xf32> -> vector<24x20xf32>
    %780 = vector.broadcast %24 : vector<24x1xf32> to vector<24x20xf32>
    %781 = arith.addf %779, %780 : vector<24x20xf32>
    %782 = vector.broadcast %777 : vector<24x1xf32> to vector<24x20xf32>
    %783 = arith.mulf %781, %782 : vector<24x20xf32>
    %784 = vector.broadcast %778 : vector<24x1xf32> to vector<24x20xf32>
    %785 = arith.addf %783, %784 : vector<24x20xf32>
    %cst_422 = arith.constant 0.000000e+00 : f32
    %786 = vector.broadcast %cst_422 : f32 to vector<24x20xf32>
    %787 = arith.maximumf %785, %786 : vector<24x20xf32>
    %cst_423 = arith.constant dense<0.000000e+00> : vector<24x20xf32>
    %788 = tpu.matmul %23, %380, %cst_423 {dimension_numbers = #tpu.dot_dimension_numbers<[1], [0], [0], [1], [0, 0, 1, 1], [], []>} : vector<24x6xf32>, vector<6x20xf32>, vector<24x20xf32> -> vector<24x20xf32>
    %789 = vector.broadcast %24 : vector<24x1xf32> to vector<24x20xf32>
    %790 = arith.addf %788, %789 : vector<24x20xf32>
    %791 = vector.broadcast %777 : vector<24x1xf32> to vector<24x20xf32>
    %792 = arith.mulf %790, %791 : vector<24x20xf32>
    %793 = vector.broadcast %778 : vector<24x1xf32> to vector<24x20xf32>
    %794 = arith.addf %792, %793 : vector<24x20xf32>
    %cst_424 = arith.constant 0.000000e+00 : f32
    %795 = vector.broadcast %cst_424 : f32 to vector<24x20xf32>
    %796 = arith.maximumf %794, %795 : vector<24x20xf32>
    %797 = arith.addf %787, %796 : vector<24x20xf32>
    %cst_425 = arith.constant dense<0.000000e+00> : vector<24x20xf32>
    %798 = tpu.matmul %23, %561, %cst_425 {dimension_numbers = #tpu.dot_dimension_numbers<[1], [0], [0], [1], [0, 0, 1, 1], [], []>} : vector<24x6xf32>, vector<6x20xf32>, vector<24x20xf32> -> vector<24x20xf32>
    %799 = vector.broadcast %24 : vector<24x1xf32> to vector<24x20xf32>
    %800 = arith.addf %798, %799 : vector<24x20xf32>
    %801 = vector.broadcast %777 : vector<24x1xf32> to vector<24x20xf32>
    %802 = arith.mulf %800, %801 : vector<24x20xf32>
    %803 = vector.broadcast %778 : vector<24x1xf32> to vector<24x20xf32>
    %804 = arith.addf %802, %803 : vector<24x20xf32>
    %cst_426 = arith.constant 0.000000e+00 : f32
    %805 = vector.broadcast %cst_426 : f32 to vector<24x20xf32>
    %806 = arith.maximumf %804, %805 : vector<24x20xf32>
    %807 = arith.addf %797, %806 : vector<24x20xf32>
    %cst_427 = arith.constant dense<0.000000e+00> : vector<24x20xf32>
    %808 = tpu.matmul %23, %742, %cst_427 {dimension_numbers = #tpu.dot_dimension_numbers<[1], [0], [0], [1], [0, 0, 1, 1], [], []>} : vector<24x6xf32>, vector<6x20xf32>, vector<24x20xf32> -> vector<24x20xf32>
    %809 = vector.broadcast %24 : vector<24x1xf32> to vector<24x20xf32>
    %810 = arith.addf %808, %809 : vector<24x20xf32>
    %811 = vector.broadcast %777 : vector<24x1xf32> to vector<24x20xf32>
    %812 = arith.mulf %810, %811 : vector<24x20xf32>
    %813 = vector.broadcast %778 : vector<24x1xf32> to vector<24x20xf32>
    %814 = arith.addf %812, %813 : vector<24x20xf32>
    %cst_428 = arith.constant 0.000000e+00 : f32
    %815 = vector.broadcast %cst_428 : f32 to vector<24x20xf32>
    %816 = arith.maximumf %814, %815 : vector<24x20xf32>
    %817 = arith.addf %807, %816 : vector<24x20xf32>
    %cst_429 = arith.constant 2.500000e-01 : f32
    %818 = vector.broadcast %cst_429 : f32 to vector<24x20xf32>
    %819 = arith.mulf %818, %817 : vector<24x20xf32>
    %c0_430 = arith.constant 0 : index
    %c0_431 = arith.constant 0 : index
    %c0_432 = arith.constant 0 : index
    %820 = vector.load %arg12[%c0_430, %c0_431, %c0_432] : memref<1x24x20xf32, #tpu.memory_space<vmem>>, vector<1x24x20xf32>
    %821 = vector.shape_cast %820 : vector<1x24x20xf32> to vector<24x20xf32>
    %822 = vector.shape_cast %819 : vector<24x20xf32> to vector<1x24x20xf32>
    tpu.vector_store %arg12[%c0_430, %c0_431, %c0_432], %822 {strides = array<i32>} : memref<1x24x20xf32, #tpu.memory_space<vmem>>, vector<1x24x20xf32>,
    return
  }
  func.func @transform_0(%arg0: i32) -> (i32, i32, i32, i32) {
    %c0_i32 = arith.constant 0 : i32
    %c0_i32_0 = arith.constant 0 : i32
    %c0_i32_1 = arith.constant 0 : i32
    %c0_i32_2 = arith.constant 0 : i32
    return %arg0, %c0_i32, %c0_i32_0, %c0_i32_1 : i32, i32, i32, i32
  }
  func.func @transform_1(%arg0: i32) -> (i32, i32, i32) {
    %c0_i32 = arith.constant 0 : i32
    %c0_i32_0 = arith.constant 0 : i32
    %c0_i32_1 = arith.constant 0 : i32
    %c0_i32_2 = arith.constant 0 : i32
    return %c0_i32, %c0_i32_0, %c0_i32_1 : i32, i32, i32
  }
  func.func @transform_2(%arg0: i32) -> (i32, i32) {
    %c0_i32 = arith.constant 0 : i32
    %c0_i32_0 = arith.constant 0 : i32
    %c0_i32_1 = arith.constant 0 : i32
    return %c0_i32, %c0_i32_0 : i32, i32
  }
  func.func @transform_3(%arg0: i32) -> (i32, i32) {
    %c0_i32 = arith.constant 0 : i32
    %c0_i32_0 = arith.constant 0 : i32
    %c0_i32_1 = arith.constant 0 : i32
    return %c0_i32, %c0_i32_0 : i32, i32
  }
  func.func @transform_4(%arg0: i32) -> (i32, i32) {
    %c0_i32 = arith.constant 0 : i32
    %c0_i32_0 = arith.constant 0 : i32
    %c0_i32_1 = arith.constant 0 : i32
    return %c0_i32, %c0_i32_0 : i32, i32
  }
  func.func @transform_5(%arg0: i32) -> (i32, i32) {
    %c0_i32 = arith.constant 0 : i32
    %c0_i32_0 = arith.constant 0 : i32
    %c0_i32_1 = arith.constant 0 : i32
    return %c0_i32, %c0_i32_0 : i32, i32
  }
  func.func @transform_6(%arg0: i32) -> (i32, i32) {
    %c0_i32 = arith.constant 0 : i32
    %c0_i32_0 = arith.constant 0 : i32
    %c0_i32_1 = arith.constant 0 : i32
    return %c0_i32, %c0_i32_0 : i32, i32
  }
  func.func @transform_7(%arg0: i32) -> (i32, i32) {
    %c0_i32 = arith.constant 0 : i32
    %c0_i32_0 = arith.constant 0 : i32
    %c0_i32_1 = arith.constant 0 : i32
    return %c0_i32, %c0_i32_0 : i32, i32
  }
  func.func @transform_8(%arg0: i32) -> (i32, i32) {
    %c0_i32 = arith.constant 0 : i32
    %c0_i32_0 = arith.constant 0 : i32
    %c0_i32_1 = arith.constant 0 : i32
    return %c0_i32, %c0_i32_0 : i32, i32
  }
  func.func @transform_9(%arg0: i32) -> (i32, i32) {
    %c0_i32 = arith.constant 0 : i32
    %c0_i32_0 = arith.constant 0 : i32
    %c0_i32_1 = arith.constant 0 : i32
    return %c0_i32, %c0_i32_0 : i32, i32
  }
  func.func @transform_10(%arg0: i32) -> (i32, i32) {
    %c0_i32 = arith.constant 0 : i32
    %c0_i32_0 = arith.constant 0 : i32
    %c0_i32_1 = arith.constant 0 : i32
    return %c0_i32, %c0_i32_0 : i32, i32
  }
  func.func @transform_11(%arg0: i32) -> (i32, i32, i32) {
    %c0_i32 = arith.constant 0 : i32
    %c0_i32_0 = arith.constant 0 : i32
    %c0_i32_1 = arith.constant 0 : i32
    return %arg0, %c0_i32, %c0_i32_0 : i32, i32, i32
  }
}

</mosaic_0001>

<bundles_post_ra>
// kernel: tsdm_module_forward.1
= control target key start
LH: loop header
LB: loop body
LE: loop exit
PB: predicated region body
PF: predicated region fallthrough
CT: control target
= control target key end

     0   :  { %s2135_s17 = smov 0   ;;  %s2854_s0 = inlined_call_operand.vmem [shape: f32[16,16,6,128], index: 0, kind: input, shape index: {}]   ;;  %s2855_s1 = inlined_call_operand.vmem [shape: f32[25,6,1], index: 1, kind: input, shape index: {}]   ;;  %s2856_s2 = inlined_call_operand.vmem [shape: f32[6,1], index: 2, kind: input, shape index: {}]   ;;  %s2857_s3 = inlined_call_operand.vmem [shape: f32[24,6], index: 3, kind: input, shape index: {}]   ;;  %s2858_s4 = inlined_call_operand.vmem [shape: f32[24,1], index: 4, kind: input, shape index: {}]   ;;  %s2859_s5 = inlined_call_operand.vmem [shape: f32[6,24], index: 5, kind: input, shape index: {}]   ;;  %s2860_s6 = inlined_call_operand.vmem [shape: f32[6,1], index: 6, kind: input, shape index: {}]   ;;  %s2861_s7 = inlined_call_operand.vmem [shape: f32[24,6], index: 7, kind: input, shape index: {}]   ;;  %s2862_s8 = inlined_call_operand.vmem [shape: f32[24,1], index: 8, kind: input, shape index: {}]   ;;  %s2863_s9 = inlined_call_operand.vmem [shape: f32[24,1], index: 9, kind: input, shape index: {}]   ;;  %s2864_s10 = inlined_call_operand.vmem [shape: f32[24,1], index: 10, kind: input, shape index: {}]   ;;  %s2865_s11 = inlined_call_operand.vmem [shape: f32[16,24,20], index: 11, kind: output, shape index: {}]  }
   0x1 LB: > { %s1870_s18 = sadd.s32 4294967295, %s2066_s17   ;;  %p1874_p0 = scmp.ge.s32.totalorder %s2066_s17, 1  ;;  %s2066_s17 = sphi %s2135_s17, %s21_s17  }
   0x2   : > { %p337_p1 = scmp.lt.s32.totalorder %s2066_s17, 17 }
   0x4   : > { %p338_p2 = pnand %p1874_p0, %p337_p1 }
   0x5   : > { %v412_v0 = vld [vmem:[%s2855_s1 + $0x20] sm:$0x3f] (!%p338_p2)  ;;  %v410_v1 = vld [vmem:[%s2855_s1 + $0x10] sm:$0x3f] (!%p338_p2)  ;;  %v2068_v2 = vmov (!%p338_p2), 0   ;;  %p377_p3 = scmp.lt.s32.totalorder (!%p338_p2), %s1870_s18, 15 }
   0x6   : > { %341 = sbr.rel (%p338_p2) target bundleno = 1394 (0x572), region = 64  ;;  %2047 = vset.pattern.permute.xlu1 (!%p338_p2), %v2068_v2  ;;  %2046 = vset.pattern.permute.xlu0 (!%p338_p2), %v2068_v2  ;;  %v415_v3 = vld [vmem:[%s2855_s1 + $0x38] sm:$0x3f] (!%p338_p2)  ;;  %v417_v5 = vld [vmem:[%s2855_s1 + $0x48] sm:$0x3f] (!%p338_p2)  ;;  %s2069_s22 = smov (!%p338_p2), 127  }
   0x7   : > { %476 = vperm.xlu1 (!%p338_p2), %2047, %v412_v0   ;;  %460 = vperm.xlu0 (!%p338_p2), %2046, %v410_v1   ;;  %v411_v4 = vld [vmem:[%s2855_s1 + $0x18] sm:$0x3f] (!%p338_p2)  ;;  %v416_v6 = vld [vmem:[%s2855_s1 + $0x40] sm:$0x3f] (!%p338_p2)  ;;  %v418_v8 = vld [vmem:[%s2855_s1 + $0x50] sm:$0x3f] (!%p338_p2) }
   0x8   : > { %v419_v7 = vld [vmem:[%s2855_s1 + $0x58] sm:$0x3f] (!%p338_p2)  ;;  %v421_v9 = vld [vmem:[%s2855_s1 + $0x68] sm:$0x3f] (!%p338_p2)  ;;  %v420_v10 = vld [vmem:[%s2855_s1 + $0x60] sm:$0x3f] (!%p338_p2) }
   0x9   : > { %v423_v11 = vld [vmem:[%s2855_s1 + $0x78] sm:$0x3f] (!%p338_p2)  ;;  %v422_v12 = vld [vmem:[%s2855_s1 + $0x70] sm:$0x3f] (!%p338_p2)  ;;  %v425_v13 = vld [vmem:[%s2855_s1 + $0x88] sm:$0x3f] (!%p338_p2) }
   0xa   : > { %v424_v14 = vld [vmem:[%s2855_s1 + $0x80] sm:$0x3f] (!%p338_p2)  ;;  %v427_v15 = vld [vmem:[%s2855_s1 + $0x98] sm:$0x3f] (!%p338_p2)  ;;  %v426_v16 = vld [vmem:[%s2855_s1 + $0x90] sm:$0x3f] (!%p338_p2) }
   0xb   : > { %507 = vperm.xlu1 (!%p338_p2), %2047, %v415_v3   ;;  %469 = vperm.xlu0 (!%p338_p2), %2046, %v411_v4   ;;  %v429_v17 = vld [vmem:[%s2855_s1 + $0xa8] sm:$0x3f] (!%p338_p2)  ;;  %v428_v18 = vld [vmem:[%s2855_s1 + $0xa0] sm:$0x3f] (!%p338_p2)  ;;  %v431_v19 = vld [vmem:[%s2855_s1 + $0xb8] sm:$0x3f] (!%p338_p2) }
   0xc   : > { %v430_v20 = vld [vmem:[%s2855_s1 + $0xb0] sm:$0x3f] (!%p338_p2)  ;;  %v432_v21 = vld [vmem:[%s2855_s1 + $0xc0] sm:$0x3f] (!%p338_p2)  ;;  %v409_v23 = vld [vmem:[%s2855_s1 + $0x8] sm:$0x3f] (!%p338_p2) }
   0xd   : > { %v408_v22 = vld [vmem:[%s2855_s1] sm:$0x3f]  ;;  %v413_v24 = vld [vmem:[%s2855_s1 + $0x28] sm:$0x3f]  ;;  %v414_v25 = vld [vmem:[%s2855_s1 + $0x30] sm:$0x3f] }
   0xe   : > { %s2867_s18 = smov (!%p377_p3, %s1870_s18), 15  ;;  %s2070_s23 = smov 123   ;;  %vm688_vm4 = vcmask 160768   ;;  %vm2073_vm5 = vmmov 0   ;;  %vm1088_vm6 = vcmask 1045504   ;;  %vm1078_vm7 = vcmask 48128  }
   0xf   : > { %523 = vperm.xlu1 %2047, %v417_v5   ;;  %516 = vperm.xlu0 %2046, %v416_v6   ;;  %s1921_s16 = sshll.u32 %s2867_s18, 7  ;;  %s2071_s24 = smov 122   ;;  %vm1174_vm8 = vcmask 195584   ;;  %vm1811_vm12 = vcmask 162816  }
  0x10   : > { %s2228_s21 = scalar_lea.vmem %s2854_s0, %s1921_s16  ;;  %s2028_s14 = smul.u32 24, %s2867_s18 }
  0x11   : > { %v2231_v26 = vld [vmem:[%s2228_s21] sm:$0x3f]  ;;  %v2238_v30 = vld [vmem:[%s2228_s21 + $0x8] sm:$0x3f]  ;;  %v2249_v35 = vld [vmem:[%s2228_s21 + $0x10] sm:$0x3f] }
  0x12   : > { %v2252_v36 = vld [vmem:[%s2228_s21 + $0x40] sm:$0x3f]  ;;  %v2262_v41 = vld [vmem:[%s2228_s21 + $0x48] sm:$0x3f]  ;;  %v2278_v47 = vld [vmem:[%s2228_s21 + $0x50] sm:$0x3f]  ;;  %s2843_s18 = scalar_lea.vmem %s2865_s11, %s2028_s14 }
  0x13   : > { %545 = vperm.xlu1 %2047, %v419_v7   ;;  %536 = vperm.xlu0 %2046, %v418_v8   ;;  %v2281_v48 = vld [vmem:[%s2228_s21 + $0x58] sm:$0x3f]  ;;  %v2284_v49 = vld [vmem:[%s2228_s21 + $0x20] sm:$0x3f]  ;;  %v2312_v58 = vld [vmem:[%s2228_s21 + $0x28] sm:$0x3f] }
  0x14   : > { %v2328_v0 = vld [vmem:[%s2228_s21 + $0x70] sm:$0x3f]  ;;  %v2331_v1 = vld [vmem:[%s2228_s21 + $0x60] sm:$0x3f]  ;;  %v2351_v7 = vld [vmem:[%s2228_s21 + $0x68] sm:$0x3f] }
  0x15   : > { %v2334_v2 = vld [vmem:[%s2228_s21 + $0x30] sm:$0x3f] }
  0x17   : > { %563 = vperm.xlu1 %2047, %v421_v9   ;;  %554 = vperm.xlu0 %2046, %v420_v10  }
  0x1b   : > { %583 = vperm.xlu1 %2047, %v423_v11   ;;  %570 = vperm.xlu0 %2046, %v422_v12   ;;  %v2365_v12 = vld [vmem:[%s2228_s21 + $0x78] sm:$0x3f] }
  0x1f   : > { %601 = vperm.xlu1 %2047, %v425_v13   ;;  %592 = vperm.xlu0 %2046, %v424_v14  }
  0x23   : > { %617 = vperm.xlu1 %2047, %v427_v15   ;;  %610 = vperm.xlu0 %2046, %v426_v16  }
  0x27   : > { %639 = vperm.xlu1 %2047, %v429_v17   ;;  %628 = vperm.xlu0 %2046, %v428_v18  }
  0x2b   : > { %661 = vperm.xlu1 %2047, %v431_v19   ;;  %650 = vperm.xlu0 %2046, %v430_v20  }
  0x2f   : > { %672 = vperm.xlu0 %2046, %v432_v21   ;;  %443 = vperm.xlu1 %2047, %v408_v22  }
  0x33   : > { %451 = vperm.xlu0 %2046, %v409_v23   ;;  %489 = vperm.xlu1 %2047, %v413_v24  }
  0x37   : > { %498 = vperm.xlu0 %2046, %v414_v25  }
  0x86   : > { %v477_v27 = vpop.permute.xlu1 %476  ;;  %v2233_v28 = vpop.permute.xlu0 %460 }
  0x87   : > { %v695_v29 = vmul.f32 %v2233_v28, %v2231_v26  ;;  %v479_v31 = vmul.f32 %v477_v27, %v2231_v26  ;;  %v707_v37 = vmul.f32 %v2249_v35, %v477_v27  ;;  %v941_v40 = vmul.f32 %v2252_v36, %v2233_v28 }
  0x88   : > { %v822_v45 = vmul.f32 %v2252_v36, %v477_v27  ;;  %v953_v56 = vmul.f32 %v2278_v47, %v477_v27 }
  0x89   : > { %697 = vrot.lane.b32.xlu1 %v695_v29, %s2069_s22 }
  0x8a   : > { %v2242_v32 = vpop.permute.xlu1 %507  ;;  %v2244_v33 = vpop.permute.xlu0 %469 }
  0x8b   : > { %v701_v34 = vmul.f32 %v2238_v30, %v2244_v33  ;;  %v947_v46 = vmul.f32 %v2262_v41, %v2244_v33  ;;  %v717_v57 = vmul.f32 %v2284_v49, %v2242_v32  ;;  %v963_v11 = vmul.f32 %v2331_v1, %v2242_v32 }
  0x8d   : > { %703 = vrot.lane.b32.xlu0 %v701_v34, %s2069_s22  ;;  %481 = vrot.lane.b32.xlu1 %v479_v31, %s2069_s22 }
  0x8e   : > { %v524_v38 = vpop.permute.xlu1 %523  ;;  %v2257_v39 = vpop.permute.xlu0 %516 }
  0x8f   : > { %v723_v62 = vmul.f32 %v2312_v58, %v2257_v39  ;;  %v526_v63 = vmul.f32 %v2284_v49, %v524_v38  ;;  %v729_v10 = vmul.f32 %v2334_v2, %v524_v38  ;;  %v836_v16 = vmul.f32 %v2331_v1, %v524_v38 }
  0x90   : > { %v969_v17 = vmul.f32 %v2351_v7, %v2257_v39  ;;  %v975_v22 = vmul.f32 %v2328_v0, %v524_v38 }
  0x91   : > { %709 = vrot.lane.b32.xlu0 %v707_v37, %s2069_s22  ;;  %943 = vrot.lane.b32.xlu1 %v941_v40, %s2069_s22 }
  0x92   : > { %v2266_v42 = vpop.permute.xlu1 %545  ;;  %v2268_v43 = vpop.permute.xlu0 %536 }
  0x93   : > { %v2272_v44 = vmul.f32 %v2262_v41, %v2266_v42  ;;  %v2288_v50 = vmul.f32 %v2252_v36, %v2268_v43  ;;  %v2292_v51 = vmul.f32 %v2278_v47, %v2268_v43  ;;  %v2296_v52 = vmul.f32 %v2281_v48, %v2266_v42 }
  0x94   : > { %v842_v21 = vmul.f32 %v2268_v43, %v2231_v26  ;;  %v848_v27 = vmul.f32 %v2238_v30, %v2266_v42  ;;  %v981_v34 = vmul.f32 %v2249_v35, %v2268_v43 }
  0x95   : > { %824 = vrot.lane.b32.xlu0 %v822_v45, %s2069_s22  ;;  %949 = vrot.lane.b32.xlu1 %v947_v46, %s2069_s22 }
  0x96   : > { %v2300_v53 = vpop.permute.xlu1 %563  ;;  %v2302_v54 = vpop.permute.xlu0 %554 }
  0x97   : > { %v2306_v55 = vmul.f32 %v2278_v47, %v2302_v54  ;;  %v2316_v59 = vmul.f32 %v2281_v48, %v2300_v53  ;;  %v739_v25 = vmul.f32 %v2252_v36, %v2302_v54  ;;  %v745_v40 = vmul.f32 %v2262_v41, %v2300_v53 }
  0x99   : > { %955 = vrot.lane.b32.xlu0 %v953_v56, %s2069_s22  ;;  %719 = vrot.lane.b32.xlu1 %v717_v57, %s2069_s22  ;;  %v2418_v56 = vld [vmem:[%s2228_s21 + $0x18] sm:$0x3f] }
  0x9a   : > { %v2320_v60 = vpop.permute.xlu1 %583  ;;  %v2322_v61 = vpop.permute.xlu0 %570  ;;  %v987_v43 = vmul.f32 %v2418_v56, %v2266_v42 }
  0x9b   : > { %v2338_v3 = vmul.f32 %v2331_v1, %v2320_v60  ;;  %v2342_v4 = vmul.f32 %v2328_v0, %v2320_v60 }
  0x9d   : > { %725 = vrot.lane.b32.xlu0 %v723_v62, %s2069_s22  ;;  %528 = vrot.lane.b32.xlu1 %v526_v63, %s2069_s22 }
  0x9e   : > { %v2346_v5 = vpop.permute.xlu1 %601  ;;  %v2348_v6 = vpop.permute.xlu0 %592 }
  0x9f   : > { %v2355_v8 = vmul.f32 %v2328_v0, %v2346_v5  ;;  %v2359_v9 = vmul.f32 %v2351_v7, %v2348_v6  ;;  %v2369_v13 = vmul.f32 %v2365_v12, %v2348_v6 }
  0xa1   : > { %731 = vrot.lane.b32.xlu0 %v729_v10, %s2069_s22  ;;  %965 = vrot.lane.b32.xlu1 %v963_v11, %s2069_s22  ;;  %v854_v10 = vmul.f32 %v2249_v35, %v2302_v54 }
  0xa2   : > { %v2373_v14 = vpop.permute.xlu1 %617  ;;  %v2375_v15 = vpop.permute.xlu0 %610 }
  0xa3   : > { %v2382_v18 = vmul.f32 %v2365_v12, %v2375_v15 }
  0xa5   : > { %838 = vrot.lane.b32.xlu0 %v836_v16, %s2069_s22  ;;  %971 = vrot.lane.b32.xlu1 %v969_v17, %s2069_s22  ;;  %v463_v16 = vmul.f32 %v2249_v35, %v2233_v28 }
  0xa6   : > { %v2386_v19 = vpop.permute.xlu1 %639  ;;  %v2388_v20 = vpop.permute.xlu0 %628 }
  0xa9   : > { %844 = vrot.lane.b32.xlu0 %v842_v21, %s2070_s23  ;;  %977 = vrot.lane.b32.xlu1 %v975_v22, %s2069_s22  ;;  %v818_v21 = vmul.f32 %v2278_v47, %v2233_v28  ;;  %v751_v28 = vmul.f32 %v2278_v47, %v2322_v61 }
  0xaa   : > { %v2395_v23 = vpop.permute.xlu1 %661  ;;  %v2397_v24 = vpop.permute.xlu0 %650 }
  0xad   : > { %741 = vrot.lane.b32.xlu0 %v739_v25, %s2069_s22  ;;  %850 = vrot.lane.b32.xlu1 %v848_v27, %s2070_s23  ;;  %v472_v27 = vmul.f32 %v2418_v56, %v2244_v33 }
  0xae   : > { %v2405_v29 = vpop.permute.xlu0 %672  ;;  %v444_v31 = vpop.permute.xlu1 %443 }
  0xaf   : > { %v446_v37 = vmul.f32 %v444_v31, %v2231_v26  ;;  %v815_v38 = vmul.f32 %v2252_v36, %v444_v31  ;;  %v692_v45 = vmul.f32 %v2249_v35, %v444_v31  ;;  %v938_v46 = vmul.f32 %v2278_v47, %v444_v31 }
  0xb1   : > { %983 = vrot.lane.b32.xlu0 %v981_v34, %s2070_s23  ;;  %747 = vrot.lane.b32.xlu1 %v745_v40, %s2069_s22  ;;  %v820_v34 = vmul.f32 %v2281_v48, %v2244_v33  ;;  %v573_v40 = vmul.f32 %v2252_v36, %v2322_v61  ;;  %v993_v33 = vmul.f32 %v2302_v54, %v2231_v26 }
  0xb2   : > { %v452_v57 = vpop.permute.xlu0 %451  ;;  %v1005_v54 = vmul.f32 %v2249_v35, %v2322_v61 }
  0xb3   : > { %v454_v62 = vmul.f32 %v2238_v30, %v452_v57  ;;  %v816_v63 = vmul.f32 %v2262_v41, %v452_v57  ;;  %v693_v11 = vmul.f32 %v2418_v56, %v452_v57  ;;  %v939_v17 = vmul.f32 %v2281_v48, %v452_v57 }
  0xb5   : > { %856 = vrot.lane.b32.xlu0 %v854_v10, %s2070_s23  ;;  %989 = vrot.lane.b32.xlu1 %v987_v43, %s2070_s23  ;;  %v2434_v42 = vadd.f32 %v693_v11, %v692_v45  ;;  %v455_v22 = vadd.f32 %v454_v62, %v446_v37  ;;  %v817_v25 = vadd.f32 %v816_v63, %v815_v38 }
  0xb6   : > { %v2438_v31 = vadd.f32 %v939_v17, %v938_v46  ;;  %v860_v45 = vmul.f32 %v2418_v56, %v2300_v53  ;;  %v866_v46 = vmul.f32 %v2322_v61, %v2231_v26  ;;  %v999_v62 = vmul.f32 %v2238_v30, %v2300_v53 }
  0xb7   : > { %v464_v57 = vadd.f32 %v463_v16, %v455_v22  ;;  %v819_v43 = vadd.f32 %v818_v21, %v817_v25  ;;  %v872_v63 = vmul.f32 %v2284_v49, %v2320_v60  ;;  %v761_v10 = vmul.f32 %v2331_v1, %v2346_v5  ;;  %v2483_v16 = vld [vmem:[%s2228_s21 + $0x38] sm:$0x3f] }
  0xb8   : > { %v878_v53 = vmul.f32 %v2312_v58, %v2348_v6  ;;  %v1011_v11 = vmul.f32 %v2334_v2, %v2320_v60  ;;  %v767_v61 = vmul.f32 %v2351_v7, %v2375_v15  ;;  %v884_v17 = vmul.f32 %v2334_v2, %v2346_v5 }
  0xb9   : > { %575 = vrot.lane.b32.xlu0 %v573_v40, %s2069_s22  ;;  %753 = vrot.lane.b32.xlu1 %v751_v28, %s2069_s22  ;;  %v2448_v37 = vadd.f32 %v472_v27, %v464_v57  ;;  %v2450_v38 = vadd.f32 %v820_v34, %v819_v43  ;;  %v1017_v21 = vmul.f32 %v2483_v16, %v2348_v6 }
  0xba   : > { %v620_v60 = vmul.f32 %v2331_v1, %v2373_v14  ;;  %v773_v22 = vmul.f32 %v2328_v0, %v2373_v14  ;;  %v890_v25 = vmul.f32 %v2483_v16, %v2375_v15  ;;  %v1023_v6 = vmul.f32 %v2284_v49, %v2346_v5 }
  0xbb   : > { %v631_v27 = vmul.f32 %v2388_v20, %v2231_v26  ;;  %v779_v34 = vmul.f32 %v2249_v35, %v2388_v20  ;;  %v896_v40 = vmul.f32 %v2284_v49, %v2373_v14  ;;  %v1029_v5 = vmul.f32 %v2312_v58, %v2375_v15 }
  0xbc   : > { %v642_v28 = vmul.f32 %v2238_v30, %v2386_v19  ;;  %v785_v57 = vmul.f32 %v2418_v56, %v2386_v19  ;;  %v902_v43 = vmul.f32 %v2252_v36, %v2388_v20  ;;  %v1035_v15 = vmul.f32 %v2334_v2, %v2373_v14 }
  0xbd   : > { %862 = vrot.lane.b32.xlu0 %v860_v45, %s2070_s23  ;;  %995 = vrot.lane.b32.xlu1 %v993_v33, %s2071_s24  ;;  %v433_v45 = vld [vmem:[%s2856_s2] sm:$0x3f]  ;;  %v653_v33 = vmul.f32 %v2249_v35, %v2397_v24  ;;  %v908_v14 = vmul.f32 %v2262_v41, %v2386_v19 }
  0xc1   : > { %868 = vrot.lane.b32.xlu0 %v866_v46, %s2071_s24  ;;  %1001 = vrot.lane.b32.xlu1 %v999_v62, %s2071_s24  ;;  %v791_v46 = vmul.f32 %v2397_v24, %v2231_v26  ;;  %v1041_v62 = vmul.f32 %v2278_v47, %v2388_v20  ;;  %v499_v20 = vpop.permute.xlu0 %498 }
  0xc5   : > { %874 = vrot.lane.b32.xlu0 %v872_v63, %s2070_s23  ;;  %1007 = vrot.lane.b32.xlu1 %v1005_v54, %s2071_s24  ;;  %v664_v63 = vmul.f32 %v2418_v56, %v2395_v23  ;;  %v2072_v54 = vmov 0.0  }
  0xc6   : > { %1950 = vmatprep.subr.mxu0 %v2072_v54  ;;  %1970 = vmatprep.subr.mxu1 %v2072_v54 }
  0xc7   : > { %1952 = vmatprep.mubr.msk.f32.mxu0 %vm2073_vm5, %v2072_v54  ;;  %1972 = vmatprep.mubr.msk.f32.mxu1 %vm2073_vm5, %v2072_v54 }
  0xc9   : > { %763 = vrot.lane.b32.xlu0 %v761_v10, %s2069_s22  ;;  %880 = vrot.lane.b32.xlu1 %v878_v53, %s2070_s23  ;;  %v490_v10 = vpop.permute.xlu1 %489  ;;  %v797_v53 = vmul.f32 %v2238_v30, %v2395_v23 }
  0xcd   : > { %1013 = vrot.lane.b32.xlu0 %v1011_v11, %s2070_s23  ;;  %769 = vrot.lane.b32.xlu1 %v767_v61, %s2069_s22  ;;  %v914_v11 = vmul.f32 %v2278_v47, %v2397_v24  ;;  %v1047_v61 = vmul.f32 %v2281_v48, %v2386_v19  ;;  %v492_v19 = vmul.f32 %v2284_v49, %v490_v10 }
  0xce   : > { %v510_v49 = vmul.f32 %v2334_v2, %v2242_v32 }
  0xd1   : > { %886 = vrot.lane.b32.xlu0 %v884_v17, %s2070_s23  ;;  %1019 = vrot.lane.b32.xlu1 %v1017_v21, %s2070_s23  ;;  %v675_v17 = vmul.f32 %v2405_v29, %v2231_v26  ;;  %v501_v26 = vmul.f32 %v2312_v58, %v499_v20 }
  0xd5   : > { %622 = vrot.lane.b32.xlu0 %v620_v60, %s2069_s22  ;;  %775 = vrot.lane.b32.xlu1 %v773_v22, %s2069_s22  ;;  %v803_v22 = vmul.f32 %v2249_v35, %v2405_v29  ;;  %v1053_v35 = vmul.f32 %v2252_v36, %v2397_v24  ;;  %v519_v24 = vmul.f32 %v2483_v16, %v2257_v39 }
  0xd9   : > { %892 = vrot.lane.b32.xlu0 %v890_v25, %s2070_s23  ;;  %1025 = vrot.lane.b32.xlu1 %v1023_v6, %s2071_s24  ;;  %v920_v25 = vmul.f32 %v2281_v48, %v2395_v23  ;;  %v926_v48 = vmul.f32 %v2252_v36, %v2405_v29 }
  0xdd   : > { %633 = vrot.lane.b32.xlu0 %v631_v27, %s2070_s23  ;;  %781 = vrot.lane.b32.xlu1 %v779_v34, %s2070_s23 }
  0xe1   : > { %898 = vrot.lane.b32.xlu0 %v896_v40, %s2071_s24  ;;  %1031 = vrot.lane.b32.xlu1 %v1029_v5, %s2071_s24 }
  0xe5   : > { %644 = vrot.lane.b32.xlu0 %v642_v28, %s2070_s23  ;;  %787 = vrot.lane.b32.xlu1 %v785_v57, %s2070_s23 }
  0xe9   : > { %904 = vrot.lane.b32.xlu0 %v902_v43, %s2070_s23  ;;  %1037 = vrot.lane.b32.xlu1 %v1035_v15, %s2071_s24  ;;  %v715_v43 = vmul.f32 %v2483_v16, %v499_v20  ;;  %v828_v15 = vmul.f32 %v2331_v1, %v490_v10  ;;  %v830_v16 = vmul.f32 %v2351_v7, %v499_v20 }
  0xed   : > { %683 = vperm.xlu0 %2046, %v433_v45   ;;  %655 = vrot.lane.b32.xlu1 %v653_v33, %s2070_s23 }
  0xf1   : > { %793 = vrot.lane.b32.xlu0 %v791_v46, %s2071_s24  ;;  %910 = vrot.lane.b32.xlu1 %v908_v14, %s2070_s23 }
  0xf5   : > { %1043 = vrot.lane.b32.xlu0 %v1041_v62, %s2070_s23  ;;  %666 = vrot.lane.b32.xlu1 %v664_v63, %s2070_s23 }
  0xf9   : > { %799 = vrot.lane.b32.xlu0 %v797_v53, %s2071_s24  ;;  %916 = vrot.lane.b32.xlu1 %v914_v11, %s2070_s23 }
  0xfb   : > { %v698_v56 = vpop.permute.xlu1 %697 }
  0xfc   : > { %v700_v21 = vadd.f32 %v698_v56, %v2434_v42 }
  0xfd   : > { %1049 = vrot.lane.b32.xlu0 %v1047_v61, %s2070_s23  ;;  %677 = vrot.lane.b32.xlu1 %v675_v17, %s2071_s24  ;;  %v961_v61 = vmul.f32 %v2365_v12, %v499_v20 }
  0xff   : > { %v704_v30 = vpop.permute.xlu0 %703  ;;  %v482_v60 = vpop.permute.xlu1 %481 }
 0x100   : > { %v706_v6 = vadd.f32 %v704_v30, %v700_v21  ;;  %v484_v27 = vadd.f32 %v482_v60, %v2448_v37  ;;  %v713_v37 = vmul.f32 %v2334_v2, %v490_v10  ;;  %v1059_v2 = vmul.f32 %v2262_v41, %v2395_v23 }
 0x101   : > { %805 = vrot.lane.b32.xlu0 %v803_v22, %s2071_s24  ;;  %922 = vrot.lane.b32.xlu1 %v920_v25, %s2070_s23  ;;  %v832_v41 = vmul.f32 %v2328_v0, %v2242_v32  ;;  %v834_v21 = vmul.f32 %v2365_v12, %v2257_v39 }
 0x102   : > { %v493_v42 = vadd.f32 %v492_v19, %v484_v27 }
 0x103   : > { %v710_v34 = vpop.permute.xlu0 %709  ;;  %v944_v40 = vpop.permute.xlu1 %943 }
 0x104   : > { %v502_v5 = vadd.f32 %v501_v26, %v493_v42  ;;  %v712_v28 = vadd.f32 %v710_v34, %v706_v6  ;;  %v946_v57 = vadd.f32 %v944_v40, %v2438_v31  ;;  %v1065_v31 = vmul.f32 %v2278_v47, %v2405_v29 }
 0x105   : > { %1055 = vrot.lane.b32.xlu0 %v1053_v35, %s2071_s24  ;;  %928 = vrot.lane.b32.xlu1 %v926_v48, %s2071_s24  ;;  %v959_v47 = vmul.f32 %v2328_v0, %v490_v10 }
 0x106   : > { %v714_v58 = vadd.f32 %v713_v37, %v712_v28  ;;  %v511_v36 = vadd.f32 %v510_v49, %v502_v5 }
 0x107   : > { %v825_v45 = vpop.permute.xlu0 %824  ;;  %v950_v33 = vpop.permute.xlu1 %949 }
 0x108   : > { %v827_v46 = vadd.f32 %v825_v45, %v2450_v38  ;;  %v952_v14 = vadd.f32 %v950_v33, %v946_v57  ;;  %v716_v62 = vadd.f32 %v715_v43, %v714_v58  ;;  %v520_v63 = vadd.f32 %v519_v24, %v511_v36 }
 0x109   : > { %1061 = vrot.lane.b32.xlu0 %v1059_v2, %s2071_s24  ;;  %1067 = vrot.lane.b32.xlu1 %v1065_v31, %s2071_s24 }
 0x10a   : > { %v829_v1 = vadd.f32 %v828_v15, %v827_v46 }
 0x10b   : > { %v956_v53 = vpop.permute.xlu0 %955  ;;  %v720_v11 = vpop.permute.xlu1 %719 }
 0x10c   : > { %v831_v23 = vadd.f32 %v830_v16, %v829_v1  ;;  %v958_v29 = vadd.f32 %v956_v53, %v952_v14  ;;  %v722_v38 = vadd.f32 %v720_v11, %v716_v62 }
 0x10e   : > { %v960_v56 = vadd.f32 %v959_v47, %v958_v29  ;;  %v833_v17 = vadd.f32 %v832_v41, %v831_v23 }
 0x10f   : > { %v726_v30 = vpop.permute.xlu0 %725  ;;  %v529_v7 = vpop.permute.xlu1 %528 }
 0x110   : > { %v728_v60 = vadd.f32 %v726_v30, %v722_v38  ;;  %v531_v22 = vadd.f32 %v529_v7, %v520_v63  ;;  %v962_v25 = vadd.f32 %v961_v61, %v960_v56  ;;  %v2597_v6 = vadd.f32 %v834_v21, %v833_v17 }
 0x112   : > { %v540_v32 = vadd.f32 %v2288_v50, %v531_v22 }
 0x113   : > { %v732_v19 = vpop.permute.xlu0 %731  ;;  %v966_v0 = vpop.permute.xlu1 %965 }
 0x114   : > { %v549_v10 = vadd.f32 %v2272_v44, %v540_v32  ;;  %v734_v27 = vadd.f32 %v732_v19, %v728_v60  ;;  %v968_v26 = vadd.f32 %v966_v0, %v962_v25 }
 0x116   : > { %v736_v20 = vadd.f32 %v2292_v51, %v734_v27  ;;  %v558_v42 = vadd.f32 %v2306_v55, %v549_v10 }
 0x117   : > { %v839_v39 = vpop.permute.xlu0 %838  ;;  %v972_v12 = vpop.permute.xlu1 %971 }
 0x118   : > { %v974_v34 = vadd.f32 %v972_v12, %v968_v26  ;;  %v738_v40 = vadd.f32 %v2296_v52, %v736_v20  ;;  %v567_v35 = vadd.f32 %v2316_v59, %v558_v42  ;;  %v841_v19 = vadd.f32 %v839_v39, %v2597_v6 }
 0x11b   : > { %v845_v48 = vpop.permute.xlu0 %844  ;;  %v978_v49 = vpop.permute.xlu1 %977 }
 0x11c   : > { %v980_v50 = vadd.f32 %v978_v49, %v974_v34  ;;  %v847_v10 = vadd.f32 %v845_v48, %v841_v19 }
 0x11f   : > { %v742_v5 = vpop.permute.xlu0 %741  ;;  %v851_v37 = vpop.permute.xlu1 %850 }
 0x120   : > { %v744_v28 = vadd.f32 %v742_v5, %v738_v40  ;;  %v853_v20 = vadd.f32 %v851_v37, %v847_v10 }
 0x123   : > { %v984_v44 = vpop.permute.xlu0 %983  ;;  %v748_v57 = vpop.permute.xlu1 %747 }
 0x124   : > { %v750_v58 = vadd.f32 %v748_v57, %v744_v28  ;;  %v986_v43 = vadd.f32 %v984_v44, %v980_v50 }
 0x127   : > { %v857_v51 = vpop.permute.xlu0 %856  ;;  %v990_v24 = vpop.permute.xlu1 %989 }
 0x128   : > { %v992_v55 = vadd.f32 %v990_v24, %v986_v43  ;;  %v859_v12 = vadd.f32 %v857_v51, %v853_v20 }
 0x12b   : > { %v576_v36 = vpop.permute.xlu0 %575  ;;  %v754_v15 = vpop.permute.xlu1 %753 }
 0x12c   : > { %v578_v45 = vadd.f32 %v576_v36, %v567_v35  ;;  %v756_v33 = vadd.f32 %v754_v15, %v750_v58 }
 0x12e   : > { %v587_v52 = vadd.f32 %v2338_v3, %v578_v45  ;;  %v758_v59 = vadd.f32 %v2342_v4, %v756_v33 }
 0x12f   : > { %v863_v2 = vpop.permute.xlu0 %862  ;;  %v996_v31 = vpop.permute.xlu1 %995 }
 0x130   : > { %v596_v46 = vadd.f32 %v2359_v9, %v587_v52  ;;  %v998_v14 = vadd.f32 %v996_v31, %v992_v55  ;;  %v2609_v62 = vadd.f32 %v2369_v13, %v758_v59  ;;  %v865_v40 = vadd.f32 %v863_v2, %v859_v12 }
 0x132   : > { %v605_v63 = vadd.f32 %v2355_v8, %v596_v46  ;;  %v387_v8 = vlaneseq }
 0x133   : > { %v869_v16 = vpop.permute.xlu0 %868  ;;  %v1002_v1 = vpop.permute.xlu1 %1001 }
 0x134   : > { %v2612_v53 = vadd.f32 %v1002_v1, %v998_v14  ;;  %v614_v11 = vadd.f32 %v2382_v18, %v605_v63  ;;  %v388_v17 = vand.u32 127, %v387_v8  ;;  %v871_v50 = vadd.f32 %v869_v16, %v865_v40 }
 0x136   : > { %v2627_v30 = vmul.u32.u64.low 3435973837, %v388_v17  ;;  %v2628_v7 = vmul.u32.u64.high 3435973837, %v388_v17, %v2627_v30 }
 0x137   : > { %v875_v41 = vpop.permute.xlu0 %874  ;;  %v2615_v3 = vpop.permute.xlu1 %1007 }
 0x138   : > { %v395_v32 = vshrl.u32 %v2628_v7, 2  ;;  %v877_v5 = vadd.f32 %v875_v41, %v871_v50 }
 0x13a   : > { %v396_v26 = vmul.u32 5, %v395_v32 }
 0x13b   : > { %v764_v4 = vpop.permute.xlu0 %763  ;;  %v881_v23 = vpop.permute.xlu1 %880 }
 0x13c   : > { %v397_v34 = vsub.s32 %v388_v17, %v396_v26  ;;  %v883_v6 = vadd.f32 %v881_v23, %v877_v5  ;;  %v766_v63 = vadd.f32 %v764_v4, %v2609_v62 }
 0x13e   : > { %vm400_vm0 = vcmp.ne.s32.totalorder %v397_v34, 0  ;;  %vm401_vm1 = vcmp.lt.s32.totalorder %v397_v34, 0  ;;  %v403_v57 = vadd.s32 5, %v397_v34 }
 0x13f   : > { %v2617_v47 = vpop.permute.xlu0 %1013  ;;  %v770_v9 = vpop.permute.xlu1 %769  ;;  %vm402_vm2 = vmand %vm401_vm1, %vm400_vm0 }
 0x140   : > { %v404_v24 = vsel %vm402_vm2, %v403_v57, %v397_v34  ;;  %v772_v23 = vadd.f32 %v770_v9, %v766_v63  ;;  %v439_v57 = vld [vmem:[%s2858_s4 + $0x10] sm:$0xff] }
 0x141   : > { %vm405_vm3 = vcmp.lt.s32.totalorder %v404_v24, 4 }
 0x142   : > { %v1878_v31 = vsel %vm405_vm3, 1.0, %v2072_v54 }
 0x143   : > { %v2619_v29 = vpop.permute.xlu1 %1019  ;;  %v887_v13 = vpop.permute.xlu0 %886 }
 0x144   : > { %v889_v48 = vadd.f32 %v887_v13, %v883_v6  ;;  %v438_v6 = vld [vmem:[%s2858_s4 + $0x8] sm:$0xff] }
 0x147   : > { %v2621_v38 = vpop.permute.xlu1 %775  ;;  %v623_v56 = vpop.permute.xlu0 %622 }
 0x148   : > { %v625_v28 = vadd.f32 %v623_v56, %v614_v11  ;;  %v1010_v56 = vadd.f32 %v2615_v3, %v2612_v53  ;;  %v778_v17 = vadd.f32 %v2621_v38, %v772_v23 }
 0x14a   : > { %v1016_v62 = vadd.f32 %v2617_v47, %v1010_v56 }
 0x14b   : > { %v2623_v61 = vpop.permute.xlu1 %1025  ;;  %v893_v18 = vpop.permute.xlu0 %892 }
 0x14c   : > { %v895_v51 = vadd.f32 %v893_v18, %v889_v48  ;;  %v1022_v9 = vadd.f32 %v2619_v29, %v1016_v62 }
 0x14e   : > { %v1028_v53 = vadd.f32 %v2623_v61, %v1022_v9 }
 0x14f   : > { %v2625_v21 = vpop.permute.xlu1 %781  ;;  %v634_v22 = vpop.permute.xlu0 %633 }
 0x150   : > { %v636_v39 = vadd.f32 %v634_v22, %v625_v28  ;;  %v784_v4 = vadd.f32 %v2625_v21, %v778_v17 }
 0x153   : > { %v2630_v60 = vpop.permute.xlu1 %1031  ;;  %v899_v27 = vpop.permute.xlu0 %898 }
 0x154   : > { %v901_v15 = vadd.f32 %v899_v27, %v895_v51  ;;  %v1034_v27 = vadd.f32 %v2630_v60, %v1028_v53 }
 0x157   : > { %v788_v25 = vpop.permute.xlu1 %787  ;;  %v645_v35 = vpop.permute.xlu0 %644 }
 0x158   : > { %v647_v43 = vadd.f32 %v645_v35, %v636_v39  ;;  %v790_v32 = vadd.f32 %v788_v25, %v784_v4  ;;  %v1383_v39 = vld [vmem:[%s2864_s10] sm:$0xff]  ;;  %v1250_v4 = vld [vmem:[%s2861_s7 + $0x8] sm:$0xff] }
 0x15b   : > { %v2634_v0 = vpop.permute.xlu1 %1037  ;;  %v905_v58 = vpop.permute.xlu0 %904 }
 0x15c   : > { %v907_v52 = vadd.f32 %v905_v58, %v901_v15  ;;  %v1040_v21 = vadd.f32 %v2634_v0, %v1034_v27  ;;  %v2682_v15 = vld [vmem:[%s2857_s3] sm:$0xff] }
 0x15f   : > { %v656_v42 = vpop.permute.xlu1 %655 }
 0x160   : > { %v658_v55 = vadd.f32 %v656_v42, %v647_v43 }
 0x163   : > { %v911_v49 = vpop.permute.xlu1 %910 }
 0x164   : > { %v913_v46 = vadd.f32 %v911_v49, %v907_v52  ;;  %v2074_v52 = vmov 0.0|0.0  }
 0x167   : > { %v667_v44 = vpop.permute.xlu1 %666 }
 0x168   : > { %v669_v45 = vadd.f32 %v667_v44, %v658_v55  ;;  %v437_v44 = vld [vmem:[%s2858_s4] sm:$0xff] }
 0x16b   : > { %v917_v37 = vpop.permute.xlu1 %916 }
 0x16c   : > { %v684_v36 = vpop.permute.xlu0 %683  ;;  %v919_v1 = vadd.f32 %v917_v37, %v913_v46 }
 0x16f   : > { %v678_v33 = vpop.permute.xlu1 %677 }
 0x170   : > { %v680_v59 = vadd.f32 %v678_v33, %v669_v45  ;;  %v794_v2 = vpop.permute.xlu0 %793  ;;  %v2692_v45 = vld [vmem:[%s2857_s3 + $0x8] sm:$0xff]  ;;  %v2701_v33 = vld [vmem:[%s2857_s3 + $0x10] sm:$0xff] }
 0x171   : > { %v796_v3 = vadd.f32 %v794_v2, %v790_v32  ;;  %v1251_v32 = vld [vmem:[%s2861_s7 + $0x10] sm:$0xff] }
 0x172   : > { %v2637_v14 = vadd.f32 %v684_v36, %v680_v59 }
 0x173   : > { %v923_v16 = vpop.permute.xlu1 %922 }
 0x174   : > { %v1044_v11 = vpop.permute.xlu0 %1043  ;;  %v687_v41 = vmul.f32 %v1878_v31, %v2637_v14  ;;  %v925_v13 = vadd.f32 %v923_v16, %v919_v1 }
 0x175   : > { %v1046_v42 = vadd.f32 %v1044_v11, %v1040_v21  ;;  %v1252_v21 = vld [vmem:[%s2862_s8] sm:$0xff] }
 0x176   : > { %v689_v8 = vsel %vm688_vm4, %v687_v41, 0.0 }
 0x177   : > { %v929_v18 = vpop.permute.xlu1 %928  ;;  %690 = vadd.xlane.f32.xlu0 %v689_v8 }
 0x178   : > { %v931_v30 = vadd.f32 %v929_v18, %v925_v13  ;;  %v800_v7 = vpop.permute.xlu0 %799  ;;  %v1172_v13 = vld [vmem:[%s2859_s5] sm:$0x3f] }
 0x179   : > { %v802_v26 = vadd.f32 %v800_v7, %v796_v3 }
 0x17a   : > { %v2647_v22 = vadd.f32 %v931_v30, %v684_v36  ;;  %v1249_v30 = vld [vmem:[%s2861_s7] sm:$0xff] }
 0x17b   : > { %v1068_v60 = vpop.permute.xlu1 %1067 }
 0x17c   : > { %v1050_v19 = vpop.permute.xlu0 %1049  ;;  %v933_v10 = vmul.f32 %v1878_v31, %v2647_v22 }
 0x17d   : > { %v1052_v25 = vadd.f32 %v1050_v19, %v1046_v42 }
 0x17e   : > { %v934_v38 = vsel %vm688_vm4, %v933_v10, 0.0 }
 0x17f   : > { %935 = vadd.xlane.f32.xlu0 %v934_v38 }
 0x180   : > { %v806_v47 = vpop.permute.xlu0 %805 }
 0x181   : > { %v808_v20 = vadd.f32 %v806_v47, %v802_v26 }
 0x183   : > { %v2655_v12 = vadd.f32 %v808_v20, %v684_v36 }
 0x184   : > { %v1056_v29 = vpop.permute.xlu0 %1055 }
 0x185   : > { %v810_v34 = vmul.f32 %v1878_v31, %v2655_v12  ;;  %v1058_v40 = vadd.f32 %v1056_v29, %v1052_v25  ;;  %v1253_v29 = vld [vmem:[%s2862_s8 + $0x8] sm:$0xff] }
 0x187   : > { %v811_v61 = vsel %vm688_vm4, %v810_v34, 0.0 }
 0x188   : > { %v1062_v35 = vpop.permute.xlu0 %1061  ;;  %812 = vadd.xlane.f32.xlu1 %v811_v61 }
 0x189   : > { %v1064_v49 = vadd.f32 %v1062_v35, %v1058_v40 }
 0x18b   : > { %v1070_v50 = vadd.f32 %v1068_v60, %v1064_v49 }
 0x18d   : > { %v2659_v5 = vadd.f32 %v1070_v50, %v684_v36 }
 0x18f   : > { %v1072_v0 = vmul.f32 %v1878_v31, %v2659_v5 }
 0x191   : > { %v1073_v28 = vsel %vm688_vm4, %v1072_v0, 0.0 }
 0x192   : > { %1074 = vadd.xlane.f32.xlu0 %v1073_v28 }
 0x199   : > { %1388 = vperm.xlu1 %2047, %v437_v44  }
 0x19d   : > { %1398 = vperm.xlu1 %2047, %v439_v57  }
 0x1a8   : > { %1393 = vperm.xlu0 %2046, %v438_v6  }
 0x1ac   : > { %1504 = vperm.xlu0 %2046, %v1383_v39  }
 0x204   : > { %v691_v58 = vpop.xlane.xlu0 %690 }
 0x20c   : > { %v936_v37 = vpop.xlane.xlu0 %935 }
 0x215   : > { %v813_v48 = vpop.xlane.xlu1 %812 }
 0x216   : > { %v814_v43 = vadd.f32 %v813_v48, %v691_v58 }
 0x218   : > { %v937_v24 = vadd.f32 %v936_v37, %v814_v43 }
 0x21f   : > { %v1075_v51 = vpop.xlane.xlu0 %1074 }
 0x220   : > { %v1076_v55 = vadd.f32 %v1075_v51, %v937_v24 }
 0x222   : > { %v1077_v36 = vmul.f32 0.015625, %v1076_v55 }
 0x224   : > { %1951 = vmatpush3.msk.msra.mxu0 %vm1088_vm6, %v1077_v36 }
 0x225   : > { %1953 = vmatmul.mubr.msk.f32.vlgmr.msra.gmra.mrb[0].mxu0 %vm1078_vm7, %v2682_v15  ;;  %2025 = vmatprep.subr.bf16.mxu0 %v2074_v52 }
 0x226   : > { %1955 = vmatprep.mubr.msk.f32.mxu0 %vm2073_vm5, %v2072_v54 }
 0x229   : > { %1956 = vmatmul.mubr.msk.f32.gmra.mrb[2].mxu0 %vm1078_vm7, %v2692_v45 }
 0x22a   : > { %1958 = vmatprep.mubr.msk.f32.mxu0 %vm2073_vm5, %v2072_v54 }
 0x22d   : > { %1959 = vmatmul.mubr.msk.f32.gmra.mrb[4].mxu0 %vm1078_vm7, %v2701_v33 }
 0x22e   : > { %1967 = vmatprep.mubr.msk.f32.mxu0 %vm2073_vm5, %v2072_v54 }
 0x2f8   : > { %v1158_v59 = vpop.f32.mrb[0].mxu0 }
 0x2f9   : > { %v1954_v2 = vpop.f32.mrb[1].mxu0  ;;  %v1159_v46 = vadd.f32 %v1158_v59, %v437_v44 }
 0x2fc   : > { %v1163_v31 = vpop.f32.mrb[2].mxu0 }
 0x2fd   : > { %v1164_v63 = vadd.f32 %v1163_v31, %v438_v6  ;;  %v1957_v16 = vpop.f32.mrb[3].mxu0 }
 0x2ff   : > { %v2026_v1 = vpack.c.bf16 %v1164_v63, %v1159_v46 }
 0x300   : > { %v1168_v11 = vpop.f32.mrb[4].mxu0 }
 0x301   : > { %2027 = vmatpush3.bf16.msra.mxu0 %v2026_v1  ;;  %v1169_v41 = vadd.f32 %v1168_v11, %v439_v57  ;;  %v1960_v23 = vpop.f32.mrb[5].mxu0  ;;  %v1377_v11 = vld [vmem:[%s2863_s9] sm:$0xff] }
 0x302   : > { %1965 = vmatprep.subr.mxu0 %v2072_v54 }
 0x305   : > { %1966 = vmatpush3.msra.mxu0 %v1169_v41 }
 0x306   : > { %1968 = vmatmul.mubr.msk.f32.vlgmr.msra.gmra.mrb[6].mxu0 %vm1174_vm8, %v1172_v13  ;;  %1981 = vmatprep.subr.mxu0 %v2072_v54 }
 0x307   : > { %1982 = vmatpush3.msk.msra.mxu0 %vm1088_vm6, %v2637_v14  ;;  %1983 = vmatprep.mubr.msk.f32.mxu0 %vm2073_vm5, %v2072_v54  ;;  %v1173_v14 = vld [vmem:[%s2860_s6] sm:$0x3f] }
 0x308   : > { %2003 = vmatprep.subr.mxu0 %v2072_v54 }
 0x30a   : > { %1984 = vmatmul.mubr.msk.f32.vlgmr.msra.gmra.mrb[8].mxu0 %vm1078_vm7, %v2682_v15 }
 0x30b   : > { %2004 = vmatpush3.msk.msra.mxu0 %vm1088_vm6, %v2647_v22  ;;  %1986 = vmatprep.mubr.msk.f32.mxu0 %vm2073_vm5, %v2072_v54 }
 0x30e   : > { %1987 = vmatmul.mubr.msk.f32.gmra.mrb[10].mxu0 %vm1078_vm7, %v2692_v45 }
 0x30f   : > { %1989 = vmatprep.mubr.msk.f32.mxu0 %vm2073_vm5, %v2072_v54 }
 0x312   : > { %1990 = vmatmul.mubr.msk.f32.gmra.mrb[12].mxu0 %vm1078_vm7, %v2701_v33 }
 0x313   : > { %2005 = vmatprep.mubr.msk.f32.mxu0 %vm2073_vm5, %v2072_v54 }
 0x316   : > { %2006 = vmatmul.mubr.msk.f32.vlgmr.msra.gmra.mrb[14].mxu0 %vm1078_vm7, %v2682_v15 }
 0x317   : > { %2008 = vmatprep.mubr.msk.f32.mxu0 %vm2073_vm5, %v2072_v54 }
 0x31a   : > { %2009 = vmatmul.mubr.msk.f32.gmra.mrb[16].mxu0 %vm1078_vm7, %v2692_v45 }
 0x31b   : > { %2011 = vmatprep.mubr.msk.f32.mxu0 %vm2073_vm5, %v2072_v54 }
 0x31e   : > { %2012 = vmatmul.mubr.msk.f32.gmra.mrb[18].mxu0 %vm1078_vm7, %v2701_v33 }
 0x3d9   : > { %v1244_v8 = vpop.f32.mrb[6].mxu0 }
 0x3da   : > { %v1245_v56 = vadd.f32 %v1244_v8, %v1173_v14  ;;  %v1969_v17 = vpop.f32.mrb[7].mxu0 }
 0x3dc   : > { %v1248_v18 = vmax.f32 %v1245_v56, 0.0  ;;  %v1378_v56 = vld [vmem:[%s2863_s9 + $0x8] sm:$0xff] }
 0x3dd   : > { %v2747_v7 = vpop.f32.mrb[8].mxu0 }
 0x3de   : > { %1971 = vmatpush3.msk.msra.mxu1 %vm1088_vm6, %v1248_v18  ;;  %v1985_v62 = vpop.f32.mrb[9].mxu0 }
 0x3df   : > { %1973 = vmatmul.mubr.msk.f32.vlgmr.msra.gmra.mrb[0].mxu1 %vm1078_vm7, %v1249_v30  ;;  %1992 = vmatprep.subr.mxu1 %v2072_v54 }
 0x3e0   : > { %1993 = vmatpush3.msk.msra.mxu1 %vm1088_vm6, %v2655_v12  ;;  %1975 = vmatprep.mubr.msk.f32.mxu1 %vm2073_vm5, %v2072_v54 }
 0x3e1   : > { %v2759_v22 = vpop.f32.mrb[10].mxu0  ;;  %2014 = vmatprep.subr.mxu1 %v2072_v54 }
 0x3e2   : > { %v1988_v9 = vpop.f32.mrb[11].mxu0 }
 0x3e3   : > { %1976 = vmatmul.mubr.msk.f32.gmra.mrb[2].mxu1 %vm1078_vm7, %v1250_v4  ;;  %v1379_v4 = vld [vmem:[%s2863_s9 + $0x10] sm:$0xff] }
 0x3e4   : > { %1978 = vmatprep.mubr.msk.f32.mxu1 %vm2073_vm5, %v2072_v54 }
 0x3e5   : > { %v2768_v19 = vpop.f32.mrb[12].mxu0 }
 0x3e6   : > { %v1991_v10 = vpop.f32.mrb[13].mxu0 }
 0x3e7   : > { %1979 = vmatmul.mubr.msk.f32.gmra.mrb[4].mxu1 %vm1078_vm7, %v1251_v32  ;;  %v1385_v32 = vld [vmem:[%s2864_s10 + $0x10] sm:$0xff] }
 0x3e8   : > { %1994 = vmatprep.mubr.msk.f32.mxu1 %vm2073_vm5, %v2072_v54 }
 0x3e9   : > { %v2773_v53 = vpop.f32.mrb[14].mxu0 }
 0x3ea   : > { %v2007_v3 = vpop.f32.mrb[15].mxu0 }
 0x3eb   : > { %1995 = vmatmul.mubr.msk.f32.vlgmr.msra.gmra.mrb[6].mxu1 %vm1078_vm7, %v2682_v15  ;;  %v1384_v3 = vld [vmem:[%s2864_s10 + $0x8] sm:$0xff] }
 0x3ec   : > { %2015 = vmatpush3.msk.msra.mxu1 %vm1088_vm6, %v2659_v5  ;;  %1997 = vmatprep.mubr.msk.f32.mxu1 %vm2073_vm5, %v2072_v54 }
 0x3ed   : > { %v2781_v38 = vpop.f32.mrb[16].mxu0 }
 0x3ee   : > { %v2010_v27 = vpop.f32.mrb[17].mxu0 }
 0x3ef   : > { %1998 = vmatmul.mubr.msk.f32.gmra.mrb[8].mxu1 %vm1078_vm7, %v2692_v45  ;;  %v1389_v27 = vpop.permute.xlu1 %1388 }
 0x3f0   : > { %2000 = vmatprep.mubr.msk.f32.mxu1 %vm2073_vm5, %v2072_v54 }
 0x3f1   : > { %v2787_v26 = vpop.f32.mrb[18].mxu0 }
 0x3f2   : > { %v2013_v47 = vpop.f32.mrb[19].mxu0 }
 0x3f3   : > { %2001 = vmatmul.mubr.msk.f32.gmra.mrb[10].mxu1 %vm1078_vm7, %v2701_v33  ;;  %v1394_v47 = vpop.permute.xlu0 %1393 }
 0x3f4   : > { %2016 = vmatprep.mubr.msk.f32.mxu1 %vm2073_vm5, %v2072_v54 }
 0x3f7   : > { %2017 = vmatmul.mubr.msk.f32.vlgmr.msra.gmra.mrb[12].mxu1 %vm1078_vm7, %v2682_v15 }
 0x3f8   : > { %2019 = vmatprep.mubr.msk.f32.mxu1 %vm2073_vm5, %v2072_v54 }
 0x3fb   : > { %2020 = vmatmul.mubr.msk.f32.gmra.mrb[14].mxu1 %vm1078_vm7, %v2692_v45 }
 0x3fc   : > { %2022 = vmatprep.mubr.msk.f32.mxu1 %vm2073_vm5, %v2072_v54  ;;  %v1254_v54 = vld [vmem:[%s2862_s8 + $0x10] sm:$0xff] }
 0x3ff   : > { %2023 = vmatmul.mubr.msk.f32.gmra.mrb[16].mxu1 %vm1078_vm7, %v2701_v33 }
 0x4b2   : > { %v1333_v20 = vpop.f32.mrb[0].mxu1 }
 0x4b3   : > { %v1334_v42 = vadd.f32 %v1333_v20, %v1252_v21  ;;  %v1974_v12 = vpop.f32.mrb[1].mxu1  ;;  %v1399_v21 = vpop.permute.xlu1 %1398  ;;  %v1471_v20 = vadd.f32 %v2747_v7, %v1389_v27 }
 0x4b4   : > { %v1481_v7 = vadd.f32 %v2768_v19, %v1399_v21 }
 0x4b5   : > { %v1347_v25 = vand.u32 2147483647, %v1334_v42  ;;  %vm1359_vm9 = vcmp.ge.f32.partialorder %v1334_v42, 0.0  ;;  %v1688_v42 = vadd.f32 %v2773_v53, %v1389_v27  ;;  %v1698_v53 = vadd.f32 %v2787_v26, %v1399_v21 }
 0x4b6   : > { %v1338_v34 = vpop.f32.mrb[2].mxu1 }
 0x4b7   : > { %v1350_v40 = vsub.f32 0.0, %v1347_v25  ;;  %v1339_v61 = vadd.f32 %v1338_v34, %v1253_v29  ;;  %v1977_v35 = vpop.f32.mrb[3].mxu1  ;;  %v1505_v25 = vpop.permute.xlu0 %1504 }
 0x4b9   : > { %v1353_v49 = vmul.f32 1.442695, %v1350_v40  ;;  %v1348_v60 = vand.u32 2147483647, %v1339_v61  ;;  %vm1360_vm10 = vcmp.ge.f32.partialorder %v1339_v61, 0.0 }
 0x4ba   : > { %v1343_v50 = vpop.f32.mrb[4].mxu1 }
 0x4bb   : > { %2048 = vpow2.f32 %v1353_v49  ;;  %v1351_v5 = vsub.f32 0.0, %v1348_v60  ;;  %v1344_v0 = vadd.f32 %v1343_v50, %v1254_v54  ;;  %v1980_v28 = vpop.f32.mrb[5].mxu1 }
 0x4bd   : > { %v1355_v44 = vmul.f32 1.442695, %v1351_v5  ;;  %v1349_v57 = vand.u32 2147483647, %v1344_v0  ;;  %vm1361_vm11 = vcmp.ge.f32.partialorder %v1344_v0, 0.0 }
 0x4be   : > { %v1592_v6 = vpop.f32.mrb[6].mxu1 }
 0x4bf   : > { %2050 = vpow2.f32 %v1355_v44  ;;  %v1352_v39 = vsub.f32 0.0, %v1349_v57  ;;  %v1996_v58 = vpop.f32.mrb[7].mxu1  ;;  %v1593_v12 = vadd.f32 %v1592_v6, %v1389_v27 }
 0x4c0   : > { %v1476_v58 = vadd.f32 %v2759_v22, %v1394_v47 }
 0x4c1   : > { %v1357_v48 = vmul.f32 1.442695, %v1352_v39 }
 0x4c2   : > { %v2812_v43 = vpop.f32.mrb[8].mxu1 }
 0x4c3   : > { %2052 = vpow2.f32 %v1357_v48  ;;  %v1999_v37 = vpop.f32.mrb[9].mxu1 }
 0x4c5   : > { %v2049_v24 = vpop.eup %2048 }
 0x4c6   : > { %v1362_v51 = vadd.f32 1.0, %v2049_v24  ;;  %v1602_v55 = vpop.f32.mrb[10].mxu1 }
 0x4c7   : > { %v2002_v36 = vpop.f32.mrb[11].mxu1  ;;  %v1603_v57 = vadd.f32 %v1602_v55, %v1399_v21 }
 0x4c8   : > { %2054 = vrcp.f32 %v1362_v51 }
 0x4c9   : > { %v2051_v15 = vpop.eup %2050 }
 0x4ca   : > { %v1363_v45 = vadd.f32 1.0, %v2051_v15  ;;  %v1782_v33 = vpop.f32.mrb[12].mxu1 }
 0x4cb   : > { %v2018_v52 = vpop.f32.mrb[13].mxu1  ;;  %v1783_v29 = vadd.f32 %v1782_v33, %v1389_v27  ;;  %v1693_v33 = vadd.f32 %v2781_v38, %v1394_v47 }
 0x4cc   : > { %2056 = vrcp.f32 %v1363_v45  ;;  %v1598_v52 = vadd.f32 %v2812_v43, %v1394_v47 }
 0x4cd   : > { %v2053_v59 = vpop.eup %2052 }
 0x4ce   : > { %v1364_v2 = vadd.f32 1.0, %v2053_v59  ;;  %v2814_v31 = vpop.f32.mrb[14].mxu1 }
 0x4cf   : > { %v2021_v46 = vpop.f32.mrb[15].mxu1  ;;  %v1788_v19 = vadd.f32 %v2814_v31, %v1394_v47 }
 0x4d0   : > { %2058 = vrcp.f32 %v1364_v2 }
 0x4d2   : > { %v2055_v63 = vpop.eup %2054  ;;  %v1792_v16 = vpop.f32.mrb[16].mxu1 }
 0x4d3   : > { %v1371_v1 = vmul.f32 %v2055_v63, %v2049_v24  ;;  %v2024_v41 = vpop.f32.mrb[17].mxu1  ;;  %v1793_v48 = vadd.f32 %v1792_v16, %v1399_v21 }
 0x4d5   : > { %v1374_v23 = vsel %vm1359_vm9, %v2055_v63, %v1371_v1 }
 0x4d6   : > { %v2057_v13 = vpop.eup %2056  ;;  %v1380_v14 = vmul.f32 %v1377_v11, %v1374_v23 }
 0x4d7   : > { %v1372_v8 = vmul.f32 %v2057_v13, %v2051_v15 }
 0x4d8   : > { %1486 = vperm.xlu1 %2047, %v1380_v14  }
 0x4d9   : > { %v1375_v17 = vsel %vm1360_vm10, %v2057_v13, %v1372_v8 }
 0x4da   : > { %v2059_v18 = vpop.eup %2058  ;;  %v1381_v30 = vmul.f32 %v1378_v56, %v1375_v17 }
 0x4db   : > { %v1373_v62 = vmul.f32 %v2059_v18, %v2053_v59 }
 0x4dc   : > { %1491 = vperm.xlu0 %2046, %v1381_v30  }
 0x4dd   : > { %v1376_v9 = vsel %vm1361_vm11, %v2059_v18, %v1373_v62 }
 0x4de   : > { %v1382_v10 = vmul.f32 %v1379_v4, %v1376_v9 }
 0x4e0   : > { %1514 = vperm.xlu0 %2046, %v1385_v32   ;;  %1496 = vperm.xlu1 %2047, %v1382_v10  }
 0x4e4   : > { %1509 = vperm.xlu1 %2047, %v1384_v3  }
 0x557   : > { %v1487_v34 = vpop.permute.xlu1 %1486 }
 0x558   : > { %v1499_v40 = vmul.f32 %v1487_v34, %v1471_v20  ;;  %v1606_v61 = vmul.f32 %v1593_v12, %v1487_v34  ;;  %v1701_v35 = vmul.f32 %v1688_v42, %v1487_v34  ;;  %v1796_v54 = vmul.f32 %v1783_v29, %v1487_v34 }
 0x55a   : > { %v1517_v49 = vadd.f32 %v1505_v25, %v1499_v40  ;;  %v1609_v60 = vadd.f32 %v1606_v61, %v1505_v25  ;;  %v1704_v50 = vadd.f32 %v1701_v35, %v1505_v25  ;;  %v1799_v5 = vadd.f32 %v1796_v54, %v1505_v25 }
 0x55b   : > { %v1492_v0 = vpop.permute.xlu0 %1491 }
 0x55c   : > { %v1520_v28 = vmax.f32 %v1517_v49, 0.0  ;;  %v1612_v44 = vmax.f32 %v1609_v60, 0.0  ;;  %v1707_v39 = vmax.f32 %v1704_v50, 0.0  ;;  %v1802_v37 = vmax.f32 %v1799_v5, 0.0 }
 0x55d   : > { %v1500_v16 = vmul.f32 %v1492_v0, %v1476_v58  ;;  %v1607_v38 = vmul.f32 %v1598_v52, %v1492_v0  ;;  %v1702_v1 = vmul.f32 %v1693_v33, %v1492_v0  ;;  %v1797_v8 = vmul.f32 %v1788_v19, %v1492_v0 }
 0x55e   : > { %v1615_v6 = vadd.f32 %v1612_v44, %v1520_v28 }
 0x55f   : > { %v1497_v24 = vpop.permute.xlu1 %1496  ;;  %v1515_v55 = vpop.permute.xlu0 %1514 }
 0x560   : > { %v1710_v51 = vadd.f32 %v1707_v39, %v1615_v6  ;;  %v1501_v36 = vmul.f32 %v1497_v24, %v1481_v7  ;;  %v1608_v15 = vmul.f32 %v1603_v57, %v1497_v24  ;;  %v1703_v45 = vmul.f32 %v1698_v53, %v1497_v24 }
 0x561   : > { %v1798_v26 = vmul.f32 %v1793_v48, %v1497_v24 }
 0x562   : > { %v1805_v59 = vadd.f32 %v1802_v37, %v1710_v51  ;;  %v1519_v2 = vadd.f32 %v1515_v55, %v1501_v36  ;;  %v1611_v46 = vadd.f32 %v1608_v15, %v1515_v55  ;;  %v1706_v22 = vadd.f32 %v1703_v45, %v1515_v55 }
 0x563   : > { %v1510_v63 = vpop.permute.xlu1 %1509  ;;  %v1801_v41 = vadd.f32 %v1798_v26, %v1515_v55 }
 0x564   : > { %v1808_v43 = vmul.f32 0.25, %v1805_v59  ;;  %v1522_v11 = vmax.f32 %v1519_v2, 0.0  ;;  %v1614_v31 = vmax.f32 %v1611_v46, 0.0  ;;  %v1518_v23 = vadd.f32 %v1510_v63, %v1500_v16 }
 0x565   : > { %v1610_v13 = vadd.f32 %v1607_v38, %v1510_v63  ;;  %v1705_v14 = vadd.f32 %v1702_v1, %v1510_v63  ;;  %v1709_v17 = vmax.f32 %v1706_v22, 0.0  ;;  %v1800_v62 = vadd.f32 %v1797_v8, %v1510_v63 }
 0x566   : > { %1812 = vst.msk [vmem:[%s2843_s18] sm:$0xff] %vm1811_vm12, %v1808_v43  ;;  %v1617_v56 = vadd.f32 %v1614_v31, %v1522_v11  ;;  %v1521_v18 = vmax.f32 %v1518_v23, 0.0  ;;  %v1804_v9 = vmax.f32 %v1801_v41, 0.0 }
 0x567   : > { %v1613_v30 = vmax.f32 %v1610_v13, 0.0  ;;  %v1708_v10 = vmax.f32 %v1705_v14, 0.0  ;;  %v1803_v47 = vmax.f32 %v1800_v62, 0.0 }
 0x568   : > { %v1712_v4 = vadd.f32 %v1709_v17, %v1617_v56 }
 0x569   : > { %v1616_v32 = vadd.f32 %v1613_v30, %v1521_v18 }
 0x56a   : > { %v1807_v3 = vadd.f32 %v1804_v9, %v1712_v4 }
 0x56b   : > { %v1711_v27 = vadd.f32 %v1708_v10, %v1616_v32 }
 0x56c   : > { %v1810_v21 = vmul.f32 0.25, %v1807_v3 }
 0x56d   : > { %v1806_v20 = vadd.f32 %v1803_v47, %v1711_v27 }
 0x56e   : > { %1814 = vst.msk [vmem:[%s2843_s18 + $0x10] sm:$0xff] %vm1811_vm12, %v1810_v21 }
 0x56f   : > { %v1809_v42 = vmul.f32 0.25, %v1806_v20 }
 0x571   : > { %1813 = vst.msk [vmem:[%s2843_s18 + $0x8] sm:$0xff] %vm1811_vm12, %v1809_v42 }
 0x572 PF: > { %s21_s17 = sadd.s32 1, %s2066_s17  }
 0x573   : > { %p18_p4 = scmp.ge.s32.totalorder %s21_s17, 18  }
 0x575   :  { %20 = sbr.rel (!%p18_p4) target bundleno = 1 (0x1), region = 109 }

</bundles_post_ra>
